<compile_context>
chip_gen: v6e
topology: v6e:2x2x1
jax: 0.10.0
libtpu: 0.0.40
codegen_flags: <defaults>
</compile_context>

<pallas_src>
import functools

import jax
import jax.numpy as jnp
from jax.experimental import pallas as pl
from jax.experimental.pallas import tpu as pltpu

EPS = 1e-5

# Rows of the packed (8, hidden) parameter slab.
_B1, _G1, _BE1, _B2, _G2, _BE2, _WV = range(7)


# ----------------------------- kernel ---------------------------------------


def _layernorm(x, gamma, beta, n_features):
    """Per-sample mean / unbiased std over features, eps on std, affine."""
    mean = jnp.mean(x, axis=1, keepdims=True)
    xc = x - mean                                    # reused for var + normalize
    var = jnp.sum(xc * xc, axis=1, keepdims=True) / (n_features - 1)
    inv = pl.reciprocal(jnp.sqrt(var) + EPS, approx=False)   # exact recip
    return gamma * (xc * inv) + beta


def _critic_kernel(hidden_size,
                   x_ref, a_ref, w1_ref, w2a_ref, w2b_ref, slab_ref, bv_ref,
                   v_ref):
    x = x_ref[...]                                   # (tb, num_inputs)
    a = a_ref[...]                                   # (tb, num_actions)

    b1 = slab_ref[_B1:_B1 + 1, :]
    g1 = slab_ref[_G1:_G1 + 1, :]
    be1 = slab_ref[_BE1:_BE1 + 1, :]
    b2 = slab_ref[_B2:_B2 + 1, :]
    g2 = slab_ref[_G2:_G2 + 1, :]
    be2 = slab_ref[_BE2:_BE2 + 1, :]
    wv = slab_ref[_WV:_WV + 1, :]

    # linear1 -> ln1 -> relu
    h1 = jnp.dot(x, w1_ref[...], preferred_element_type=jnp.float32) + b1
    h1 = _layernorm(h1, g1, be1, hidden_size)
    h1 = jnp.maximum(h1, 0.0)

    # cat((h1, actions), 1) @ W2 == h1 @ W2a + actions @ W2b  (no scratch)
    h2 = (jnp.dot(h1, w2a_ref[...], preferred_element_type=jnp.float32)
          + jnp.dot(a, w2b_ref[...], preferred_element_type=jnp.float32)
          + b2)
    h2 = _layernorm(h2, g2, be2, hidden_size)
    h2 = jnp.maximum(h2, 0.0)

    # Value head (out_features == 1): VPU multiply + lane reduction,
    # written lane-dense as one (1, tb) row.  bv is a scalar read from SMEM.
    v_ref[0, :] = jnp.sum(h2 * wv, axis=1) + bv_ref[0]


# ----------------------------- wrapper ---------------------------------------


def _choose_batch_tile(batch, max_tb):
    """Full batch if it fits; else a multiple-of-128 tile, preferring one
    that divides the batch so no padding copy is needed."""
    if batch <= max_tb:
        return batch                      # single step, block == full array
    hi = max_tb - (max_tb % 128)
    for tb in range(hi, 127, -128):       # multiples of 128 (lane-dense out)
        if batch % tb == 0:
            return tb                     # divides B -> no padding copy
    return hi                             # fall back: pad the tail


def critic_forward(inputs, actions, params, *, max_tb=1024):
    """inputs: (B, num_inputs), actions: (B, num_actions) -> V: (B, 1)."""
    B, num_inputs = inputs.shape
    num_actions = actions.shape[1]
    hidden_size = params["w1"].shape[1]
    assert hidden_size > 1, "unbiased std needs at least 2 features"

    tb = _choose_batch_tile(B, max_tb)
    bp = pl.cdiv(B, tb) * tb
    if bp != B:                           # rare: only when no 128-tile divides B
        pad = bp - B
        inputs = jnp.concatenate(
            [inputs, jnp.zeros((pad, num_inputs), inputs.dtype)], axis=0)
        actions = jnp.concatenate(
            [actions, jnp.zeros((pad, num_actions), actions.dtype)], axis=0)
    steps = bp // tb
    # NOTE: on v7x (2 TCs) one could force steps >= 2 for small batches to use
    # both cores; on v5e/v6e a single step avoids the per-step overhead.

    # Split W2 and pack the tiny per-feature params into one resident slab.
    w2a = params["w2"][:hidden_size]                       # (hidden, hidden)
    w2b = params["w2"][hidden_size:]                       # (num_actions, hidden)
    slab = jnp.concatenate(
        [params["b1"], params["g1"], params["be1"],
         params["b2"], params["g2"], params["be2"],
         params["wv"], jnp.zeros((1, hidden_size), jnp.float32)], axis=0)  # (8, hidden)
    bv = params["bv"].reshape(1)                           # scalar -> SMEM

    def act_spec(d):                      # batch-tiled activations
        return pl.BlockSpec((tb, d), lambda i: (i, 0))

    def resident(arr):                    # weights resident across grid steps
        return pl.BlockSpec(arr.shape, lambda i: (0, 0))

    kernel = functools.partial(_critic_kernel, hidden_size)

    out = pl.pallas_call(
        kernel,
        out_shape=jax.ShapeDtypeStruct((1, bp), jnp.float32),
        grid_spec=pltpu.PrefetchScalarGridSpec(
            num_scalar_prefetch=0,
            grid=(steps,),
            in_specs=[
                act_spec(num_inputs),
                act_spec(num_actions),
                resident(params["w1"]),
                resident(w2a),
                resident(w2b),
                resident(slab),
                pl.BlockSpec(memory_space=pltpu.MemorySpace.SMEM),  # bv scalar
            ],
            out_specs=pl.BlockSpec((1, tb), lambda i: (0, i)),      # lane-dense
        ),
        compiler_params=pltpu.CompilerParams(
            dimension_semantics=("parallel",)),
    )(inputs, actions, params["w1"], w2a, w2b, slab, bv)

    return out[0, :B].reshape(B, 1)


# ------------------------- params + reference --------------------------------


def init_params(key, num_inputs, hidden_size, num_actions):
    """Deterministic synthetic init mirroring the PyTorch module's shapes.
    Weights are stored as (in_features, out_features) so the kernel computes
    x @ W + b (same math as torch's x @ W.T + b)."""
    ks = jax.random.split(key, 8)

    def linear(kw, kb, fan_in, fan_out):
        bound = 1.0 / jnp.sqrt(fan_in)
        w = jax.random.uniform(kw, (fan_in, fan_out), jnp.float32, -bound, bound)
        b = jax.random.uniform(kb, (1, fan_out), jnp.float32, -bound, bound)
        return w, b

    w1, b1 = linear(ks[0], ks[1], num_inputs, hidden_size)
    w2, b2 = linear(ks[2], ks[3], hidden_size + num_actions, hidden_size)
    wv_col, bv = linear(ks[4], ks[5], hidden_size, 1)
    # V.weight / V.bias are scaled by 0.1 in __init__; store wv as a (1, hidden)
    # row so the kernel can use a VPU reduction for the value head.
    wv = (wv_col * 0.1).T
    bv = bv * 0.1

    # LayerNorm affine params: gamma ~ U(0,1), beta = 0 (matches the module).
    g1 = jax.random.uniform(ks[6], (1, hidden_size), jnp.float32)
    g2 = jax.random.uniform(ks[7], (1, hidden_size), jnp.float32)
    be1 = jnp.zeros((1, hidden_size), jnp.float32)
    be2 = jnp.zeros((1, hidden_size), jnp.float32)

    return {"w1": w1, "b1": b1, "g1": g1, "be1": be1,
            "w2": w2, "b2": b2, "g2": g2, "be2": be2,
            "wv": wv, "bv": bv}


def _layernorm_ref(x, gamma, beta, n_features):
    mean = jnp.mean(x, axis=1, keepdims=True)
    xc = x - mean
    var = jnp.sum(xc * xc, axis=1, keepdims=True) / (n_features - 1)
    return gamma * (xc / (jnp.sqrt(var) + EPS)) + beta


def critic_reference(inputs, actions, params):
    """Pure-JAX reference of the PyTorch forward (custom LayerNorm: unbiased
    std, eps added to std — exactly the module in the spec)."""
    hidden_size = params["w1"].shape[1]
    x = inputs @ params["w1"] + params["b1"]
    x = _layernorm_ref(x, params["g1"], params["be1"], hidden_size)
    x = jnp.maximum(x, 0.0)
    x = jnp.concatenate([x, actions], axis=1) @ params["w2"] + params["b2"]
    x = _layernorm_ref(x, params["g2"], params["be2"], hidden_size)
    x = jnp.maximum(x, 0.0)
    return x @ params["wv"].T + params["bv"]


# --------------------------------- main ---------------------------------------


if __name__ == "__main__":
    NUM_INPUTS = 16   # state dim
    HIDDEN = 32       # hidden_size
    NUM_ACTIONS = 4   # action_space.shape[0]

    key = jax.random.PRNGKey(0)
    k_par, k_rest = jax.random.split(key)
    params = init_params(k_par, NUM_INPUTS, HIDDEN, NUM_ACTIONS)

    # B=200  -> single grid step (block == full array), no padding.
    # B=1536 -> tb=768, grid=2 (exercises multi-step + lane-dense output path).
    for B in (200, 1536):
        k_rest, k_in, k_act = jax.random.split(k_rest, 3)
        inputs = jax.random.normal(k_in, (B, NUM_INPUTS), jnp.float32)
        actions = jax.random.normal(k_act, (B, NUM_ACTIONS), jnp.float32)

        v = jax.block_until_ready(critic_forward(inputs, actions, params))
        v_ref = critic_reference(inputs, actions, params)

        assert v.shape == (B, 1)
        max_err = float(jnp.max(jnp.abs(v - v_ref)))
        assert jnp.allclose(v, v_ref, atol=1e-4, rtol=1e-4), max_err

    print("KERNEL_OK")
</pallas_src>

<mosaic_0001>
module attributes {stable_mosaic.version = 11 : i64} {
  func.func @_critic_kernel(%arg0: i32, %arg1: memref<200x16xf32, #tpu.memory_space<vmem>>, %arg2: memref<200x4xf32, #tpu.memory_space<vmem>>, %arg3: memref<16x32xf32, #tpu.memory_space<vmem>>, %arg4: memref<32x32xf32, #tpu.memory_space<vmem>>, %arg5: memref<4x32xf32, #tpu.memory_space<vmem>>, %arg6: memref<8x32xf32, #tpu.memory_space<vmem>>, %arg7: memref<1xf32, #tpu.memory_space<smem>>, %arg8: memref<1x200xf32, #tpu.memory_space<vmem>>) attributes {dimension_semantics = [#tpu.dimension_semantics<parallel>], iteration_bounds = array<i64: 1>, scalar_prefetch = 0 : i64, scratch_operands = 0 : i64, tpu.core_type = #tpu.core_type<tc>, window_params = [{transform_indices = @transform_0, window_bounds = array<i64: 200, 16>}, {transform_indices = @transform_1, window_bounds = array<i64: 200, 4>}, {pipeline_mode = #tpu.pipeline_mode<synchronous>, transform_indices = @transform_2, window_bounds = array<i64: 16, 32>}, {pipeline_mode = #tpu.pipeline_mode<synchronous>, transform_indices = @transform_3, window_bounds = array<i64: 32, 32>}, {pipeline_mode = #tpu.pipeline_mode<synchronous>, transform_indices = @transform_4, window_bounds = array<i64: 4, 32>}, {pipeline_mode = #tpu.pipeline_mode<synchronous>, transform_indices = @transform_5, window_bounds = array<i64: 8, 32>}, {transform_indices = @transform_6, window_bounds = array<i64: 1>}, {transform_indices = @transform_7, window_bounds = array<i64: 1, 200>}]} {
    %c0 = arith.constant 0 : index
    %c0_0 = arith.constant 0 : index
    %0 = vector.load %arg1[%c0, %c0_0] : memref<200x16xf32, #tpu.memory_space<vmem>>, vector<200x16xf32>
    %c0_1 = arith.constant 0 : index
    %c0_2 = arith.constant 0 : index
    %1 = vector.load %arg2[%c0_1, %c0_2] : memref<200x4xf32, #tpu.memory_space<vmem>>, vector<200x4xf32>
    %c0_3 = arith.constant 0 : index
    %c0_4 = arith.constant 0 : index
    %2 = vector.load %arg6[%c0_3, %c0_4] : memref<8x32xf32, #tpu.memory_space<vmem>>, vector<1x32xf32>
    %c1 = arith.constant 1 : index
    %c0_5 = arith.constant 0 : index
    %3 = vector.load %arg6[%c1, %c0_5] : memref<8x32xf32, #tpu.memory_space<vmem>>, vector<1x32xf32>
    %c2 = arith.constant 2 : index
    %c0_6 = arith.constant 0 : index
    %4 = vector.load %arg6[%c2, %c0_6] : memref<8x32xf32, #tpu.memory_space<vmem>>, vector<1x32xf32>
    %c3 = arith.constant 3 : index
    %c0_7 = arith.constant 0 : index
    %5 = vector.load %arg6[%c3, %c0_7] : memref<8x32xf32, #tpu.memory_space<vmem>>, vector<1x32xf32>
    %c4 = arith.constant 4 : index
    %c0_8 = arith.constant 0 : index
    %6 = vector.load %arg6[%c4, %c0_8] : memref<8x32xf32, #tpu.memory_space<vmem>>, vector<1x32xf32>
    %c5 = arith.constant 5 : index
    %c0_9 = arith.constant 0 : index
    %7 = vector.load %arg6[%c5, %c0_9] : memref<8x32xf32, #tpu.memory_space<vmem>>, vector<1x32xf32>
    %c6 = arith.constant 6 : index
    %c0_10 = arith.constant 0 : index
    %8 = vector.load %arg6[%c6, %c0_10] : memref<8x32xf32, #tpu.memory_space<vmem>>, vector<1x32xf32>
    %c0_11 = arith.constant 0 : index
    %c0_12 = arith.constant 0 : index
    %9 = vector.load %arg3[%c0_11, %c0_12] : memref<16x32xf32, #tpu.memory_space<vmem>>, vector<16x32xf32>
    %cst = arith.constant dense<0.000000e+00> : vector<200x32xf32>
    %10 = tpu.matmul %0, %9, %cst {dimension_numbers = #tpu.dot_dimension_numbers<[1], [0], [0], [1], [0, 0, 1, 1], [], []>} : vector<200x16xf32>, vector<16x32xf32>, vector<200x32xf32> -> vector<200x32xf32>
    %11 = vector.broadcast %2 : vector<1x32xf32> to vector<200x32xf32>
    %12 = arith.addf %10, %11 : vector<200x32xf32>
    %cst_13 = arith.constant dense<0.000000e+00> : vector<200xf32>
    %13 = vector.multi_reduction <add>, %12, %cst_13 [1] : vector<200x32xf32> to vector<200xf32>
    %14 = vector.shape_cast %13 : vector<200xf32> to vector<200x1xf32>
    %cst_14 = arith.constant 3.200000e+01 : f32
    %15 = vector.broadcast %cst_14 : f32 to vector<200x1xf32>
    %16 = arith.divf %14, %15 : vector<200x1xf32>
    %17 = vector.broadcast %16 : vector<200x1xf32> to vector<200x32xf32>
    %18 = arith.subf %12, %17 : vector<200x32xf32>
    %19 = arith.mulf %18, %18 : vector<200x32xf32>
    %cst_15 = arith.constant dense<0.000000e+00> : vector<200xf32>
    %20 = vector.multi_reduction <add>, %19, %cst_15 [1] : vector<200x32xf32> to vector<200xf32>
    %21 = vector.shape_cast %20 : vector<200xf32> to vector<200x1xf32>
    %cst_16 = arith.constant 3.100000e+01 : f32
    %22 = vector.broadcast %cst_16 : f32 to vector<200x1xf32>
    %23 = arith.divf %21, %22 : vector<200x1xf32>
    %24 = math.sqrt %23 : vector<200x1xf32>
    %cst_17 = arith.constant 9.99999974E-6 : f32
    %25 = vector.broadcast %cst_17 : f32 to vector<200x1xf32>
    %26 = arith.addf %24, %25 : vector<200x1xf32>
    %27 = tpu.reciprocal %26 : vector<200x1xf32> -> vector<200x1xf32>
    %28 = vector.broadcast %27 : vector<200x1xf32> to vector<200x32xf32>
    %29 = arith.mulf %18, %28 : vector<200x32xf32>
    %30 = vector.broadcast %3 : vector<1x32xf32> to vector<200x32xf32>
    %31 = arith.mulf %30, %29 : vector<200x32xf32>
    %32 = vector.broadcast %4 : vector<1x32xf32> to vector<200x32xf32>
    %33 = arith.addf %31, %32 : vector<200x32xf32>
    %cst_18 = arith.constant 0.000000e+00 : f32
    %34 = vector.broadcast %cst_18 : f32 to vector<200x32xf32>
    %35 = arith.maximumf %33, %34 : vector<200x32xf32>
    %c0_19 = arith.constant 0 : index
    %c0_20 = arith.constant 0 : index
    %36 = vector.load %arg4[%c0_19, %c0_20] : memref<32x32xf32, #tpu.memory_space<vmem>>, vector<32x32xf32>
    %cst_21 = arith.constant dense<0.000000e+00> : vector<200x32xf32>
    %37 = tpu.matmul %35, %36, %cst_21 {dimension_numbers = #tpu.dot_dimension_numbers<[1], [0], [0], [1], [0, 0, 1, 1], [], []>} : vector<200x32xf32>, vector<32x32xf32>, vector<200x32xf32> -> vector<200x32xf32>
    %c0_22 = arith.constant 0 : index
    %c0_23 = arith.constant 0 : index
    %38 = vector.load %arg5[%c0_22, %c0_23] : memref<4x32xf32, #tpu.memory_space<vmem>>, vector<4x32xf32>
    %cst_24 = arith.constant dense<0.000000e+00> : vector<200x32xf32>
    %39 = tpu.matmul %1, %38, %cst_24 {dimension_numbers = #tpu.dot_dimension_numbers<[1], [0], [0], [1], [0, 0, 1, 1], [], []>} : vector<200x4xf32>, vector<4x32xf32>, vector<200x32xf32> -> vector<200x32xf32>
    %40 = arith.addf %37, %39 : vector<200x32xf32>
    %41 = vector.broadcast %5 : vector<1x32xf32> to vector<200x32xf32>
    %42 = arith.addf %40, %41 : vector<200x32xf32>
    %cst_25 = arith.constant dense<0.000000e+00> : vector<200xf32>
    %43 = vector.multi_reduction <add>, %42, %cst_25 [1] : vector<200x32xf32> to vector<200xf32>
    %44 = vector.shape_cast %43 : vector<200xf32> to vector<200x1xf32>
    %cst_26 = arith.constant 3.200000e+01 : f32
    %45 = vector.broadcast %cst_26 : f32 to vector<200x1xf32>
    %46 = arith.divf %44, %45 : vector<200x1xf32>
    %47 = vector.broadcast %46 : vector<200x1xf32> to vector<200x32xf32>
    %48 = arith.subf %42, %47 : vector<200x32xf32>
    %49 = arith.mulf %48, %48 : vector<200x32xf32>
    %cst_27 = arith.constant dense<0.000000e+00> : vector<200xf32>
    %50 = vector.multi_reduction <add>, %49, %cst_27 [1] : vector<200x32xf32> to vector<200xf32>
    %51 = vector.shape_cast %50 : vector<200xf32> to vector<200x1xf32>
    %cst_28 = arith.constant 3.100000e+01 : f32
    %52 = vector.broadcast %cst_28 : f32 to vector<200x1xf32>
    %53 = arith.divf %51, %52 : vector<200x1xf32>
    %54 = math.sqrt %53 : vector<200x1xf32>
    %cst_29 = arith.constant 9.99999974E-6 : f32
    %55 = vector.broadcast %cst_29 : f32 to vector<200x1xf32>
    %56 = arith.addf %54, %55 : vector<200x1xf32>
    %57 = tpu.reciprocal %56 : vector<200x1xf32> -> vector<200x1xf32>
    %58 = vector.broadcast %57 : vector<200x1xf32> to vector<200x32xf32>
    %59 = arith.mulf %48, %58 : vector<200x32xf32>
    %60 = vector.broadcast %6 : vector<1x32xf32> to vector<200x32xf32>
    %61 = arith.mulf %60, %59 : vector<200x32xf32>
    %62 = vector.broadcast %7 : vector<1x32xf32> to vector<200x32xf32>
    %63 = arith.addf %61, %62 : vector<200x32xf32>
    %cst_30 = arith.constant 0.000000e+00 : f32
    %64 = vector.broadcast %cst_30 : f32 to vector<200x32xf32>
    %65 = arith.maximumf %63, %64 : vector<200x32xf32>
    %66 = vector.broadcast %8 : vector<1x32xf32> to vector<200x32xf32>
    %67 = arith.mulf %65, %66 : vector<200x32xf32>
    %cst_31 = arith.constant dense<0.000000e+00> : vector<200xf32>
    %68 = vector.multi_reduction <add>, %67, %cst_31 [1] : vector<200x32xf32> to vector<200xf32>
    %c0_32 = arith.constant 0 : index
    %69 = memref.load %arg7[%c0_32] : memref<1xf32, #tpu.memory_space<smem>>
    %70 = vector.broadcast %69 : f32 to vector<200xf32>
    %71 = arith.addf %68, %70 : vector<200xf32>
    %c0_33 = arith.constant 0 : index
    %c0_34 = arith.constant 0 : index
    %72 = vector.load %arg8[%c0_33, %c0_34] : memref<1x200xf32, #tpu.memory_space<vmem>>, vector<1x200xf32>
    %73 = vector.shape_cast %72 : vector<1x200xf32> to vector<200xf32>
    %74 = vector.shape_cast %71 : vector<200xf32> to vector<1x200xf32>
    tpu.vector_store %arg8[%c0_33, %c0_34], %74 {strides = array<i32>} : memref<1x200xf32, #tpu.memory_space<vmem>>, vector<1x200xf32>,
    return
  }
  func.func @transform_0(%arg0: i32) -> (i32, i32) {
    %c0_i32 = arith.constant 0 : i32
    %c0_i32_0 = arith.constant 0 : i32
    return %arg0, %c0_i32 : i32, i32
  }
  func.func @transform_1(%arg0: i32) -> (i32, i32) {
    %c0_i32 = arith.constant 0 : i32
    %c0_i32_0 = arith.constant 0 : i32
    return %arg0, %c0_i32 : i32, i32
  }
  func.func @transform_2(%arg0: i32) -> (i32, i32) {
    %c0_i32 = arith.constant 0 : i32
    %c0_i32_0 = arith.constant 0 : i32
    %c0_i32_1 = arith.constant 0 : i32
    return %c0_i32, %c0_i32_0 : i32, i32
  }
  func.func @transform_3(%arg0: i32) -> (i32, i32) {
    %c0_i32 = arith.constant 0 : i32
    %c0_i32_0 = arith.constant 0 : i32
    %c0_i32_1 = arith.constant 0 : i32
    return %c0_i32, %c0_i32_0 : i32, i32
  }
  func.func @transform_4(%arg0: i32) -> (i32, i32) {
    %c0_i32 = arith.constant 0 : i32
    %c0_i32_0 = arith.constant 0 : i32
    %c0_i32_1 = arith.constant 0 : i32
    return %c0_i32, %c0_i32_0 : i32, i32
  }
  func.func @transform_5(%arg0: i32) -> (i32, i32) {
    %c0_i32 = arith.constant 0 : i32
    %c0_i32_0 = arith.constant 0 : i32
    %c0_i32_1 = arith.constant 0 : i32
    return %c0_i32, %c0_i32_0 : i32, i32
  }
  func.func @transform_6(%arg0: i32) -> i32 {
    %c0_i32 = arith.constant 0 : i32
    %c0_i32_0 = arith.constant 0 : i32
    return %c0_i32 : i32
  }
  func.func @transform_7(%arg0: i32) -> (i32, i32) {
    %c0_i32 = arith.constant 0 : i32
    %c0_i32_0 = arith.constant 0 : i32
    return %c0_i32, %arg0 : i32, i32
  }
}

</mosaic_0001>

<bundles_post_ra>
// kernel: tpu_custom_call.1
= control target key start
LH: loop header
LB: loop body
LE: loop exit
PB: predicated region body
PF: predicated region fallthrough
CT: control target
= control target key end

     0   :  { %v5176_v1 = vmov 0.0   ;;  %vm5177_vm0 = vmmov 0   ;;  %vm91_vm1 = vcmask 130048   ;;  %s7486_s0 = inlined_call_operand.vmem [shape: f32[200,16], index: 0, kind: input, shape index: {}]   ;;  %s7487_s1 = inlined_call_operand.vmem [shape: f32[200,4], index: 1, kind: input, shape index: {}]   ;;  %s7488_s2 = inlined_call_operand.vmem [shape: f32[16,32], index: 2, kind: input, shape index: {}]   ;;  %s7489_s3 = inlined_call_operand.vmem [shape: f32[32,32], index: 3, kind: input, shape index: {}]   ;;  %s7490_s4 = inlined_call_operand.vmem [shape: f32[4,32], index: 4, kind: input, shape index: {}]   ;;  %s7491_s5 = inlined_call_operand.vmem [shape: f32[8,32], index: 5, kind: input, shape index: {}]   ;;  %s7492_s6 = inlined_call_operand.<no memory space> [shape: f32[1], index: 6, kind: input, shape index: {}]   ;;  %s7493_s7 = inlined_call_operand.hbm [shape: f32[1,200], index: 7, kind: output, shape index: {}]  }
   0x1   :  { %v86_v0 = vld [vmem:[%s7488_s2 + $0x8] sm:$0xff]  ;;  %4706 = vmatprep.subr.mxu0 %v5176_v1  ;;  %v85_v2 = vld [vmem:[%s7488_s2] sm:$0xff]  ;;  %4710 = vmatprep.mubr.msk.f32.mxu0 %vm5177_vm0, %v5176_v1 }
   0x2   :  { %4707 = vmatpush3.msra.mxu0 %v86_v0  ;;  %v28_v3 = vld [vmem:[%s7486_s0] sm:$0xff]  ;;  %4945 = vmatprep.subr.mxu1 %v5176_v1  ;;  %v29_v4 = vld [vmem:[%s7486_s0 + $0x8] sm:$0xff] }
   0x3   :  { %4708 = vmatprep.subr.mxu0 %v5176_v1  ;;  %4823 = vmatprep.mubr.msk.f32.mxu1 %vm5177_vm0, %v5176_v1 }
   0x4   :  { %4709 = vmatpush3.msra.mxu0 %v85_v2 }
   0x5   :  { %4711 = vmatmul.mubr.msk.f32.vlgmr.msra.gmra.mxu0 %vm91_vm1, %v28_v3  ;;  %4785 = vmatprep.subr.mxu0 %v5176_v1 }
   0x6   :  { %4713 = vmatprep.mubr.msk.f32.mxu0 %vm5177_vm0, %v5176_v1 }
   0x9   :  { %4714 = vmatmul.mubr.msk.f32.gmra.mxu0 %vm91_vm1, %v29_v4 }
   0xa   :  { %13 = vsyncpa [#allocation4], 0  ;;  %4716 = vmatprep.mubr.msk.f32.mxu0 %vm5177_vm0, %v5176_v1  ;;  %v30_v5 = vld [vmem:[%s7486_s0 + $0x10] sm:$0xff]  ;;  %v31_v6 = vld [vmem:[%s7486_s0 + $0x18] sm:$0xff]  ;;  %vm357_vm2 = vcmask 261120   ;;  %vm1024_vm3 = vcmask 1043456  }
   0xb   :  { %v32_v7 = vld [vmem:[%s7486_s0 + $0x20] sm:$0xff]  ;;  %v33_v8 = vld [vmem:[%s7486_s0 + $0x28] sm:$0xff]  ;;  %v34_v9 = vld [vmem:[%s7486_s0 + $0x30] sm:$0xff]  ;;  %vm948_vm4 = vcmask 31744  }
   0xc   :  { %v35_v10 = vld [vmem:[%s7486_s0 + $0x38] sm:$0xff]  ;;  %v36_v11 = vld [vmem:[%s7486_s0 + $0x40] sm:$0xff]  ;;  %v37_v12 = vld [vmem:[%s7486_s0 + $0x48] sm:$0xff] }
   0xd   :  { %4717 = vmatmul.mubr.msk.f32.gmra.mxu0 %vm91_vm1, %v30_v5  ;;  %v38_v13 = vld [vmem:[%s7486_s0 + $0x50] sm:$0xff]  ;;  %v39_v14 = vld [vmem:[%s7486_s0 + $0x58] sm:$0xff]  ;;  %v40_v15 = vld [vmem:[%s7486_s0 + $0x60] sm:$0xff] }
   0xe   :  { %4719 = vmatprep.mubr.msk.f32.mxu0 %vm5177_vm0, %v5176_v1  ;;  %v41_v16 = vld [vmem:[%s7486_s0 + $0x68] sm:$0xff]  ;;  %v42_v17 = vld [vmem:[%s7486_s0 + $0x70] sm:$0xff]  ;;  %v43_v18 = vld [vmem:[%s7486_s0 + $0x78] sm:$0xff] }
   0xf   :  { %v44_v19 = vld [vmem:[%s7486_s0 + $0x80] sm:$0xff]  ;;  %v45_v20 = vld [vmem:[%s7486_s0 + $0x88] sm:$0xff]  ;;  %v46_v21 = vld [vmem:[%s7486_s0 + $0x90] sm:$0xff] }
  0x10   :  { %v47_v22 = vld [vmem:[%s7486_s0 + $0x98] sm:$0xff]  ;;  %v48_v23 = vld [vmem:[%s7486_s0 + $0xa0] sm:$0xff]  ;;  %v49_v24 = vld [vmem:[%s7486_s0 + $0xa8] sm:$0xff] }
  0x11   :  { %4720 = vmatmul.mubr.msk.f32.gmra.mxu0 %vm91_vm1, %v31_v6  ;;  %v50_v25 = vld [vmem:[%s7486_s0 + $0xb0] sm:$0xff]  ;;  %v51_v26 = vld [vmem:[%s7486_s0 + $0xb8] sm:$0xff]  ;;  %v52_v27 = vld [vmem:[%s7486_s0 + $0xc0] sm:$0xff] }
  0x12   :  { %4722 = vmatprep.mubr.msk.f32.mxu0 %vm5177_vm0, %v5176_v1  ;;  %v5388_v28 = vld [vmem:[%s7491_s5] ss:$0 sm:$0xff] }
  0x15   :  { %4723 = vmatmul.mubr.msk.f32.gmra.mxu0 %vm91_vm1, %v32_v7 }
  0x16   :  { %4725 = vmatprep.mubr.msk.f32.mxu0 %vm5177_vm0, %v5176_v1 }
  0x19   :  { %4726 = vmatmul.mubr.msk.f32.gmra.mxu0 %vm91_vm1, %v33_v8 }
  0x1a   :  { %4728 = vmatprep.mubr.msk.f32.mxu0 %vm5177_vm0, %v5176_v1 }
  0x1d   :  { %4729 = vmatmul.mubr.msk.f32.gmra.mxu0 %vm91_vm1, %v34_v9 }
  0x1e   :  { %4731 = vmatprep.mubr.msk.f32.mxu0 %vm5177_vm0, %v5176_v1 }
  0x21   :  { %4732 = vmatmul.mubr.msk.f32.gmra.mxu0 %vm91_vm1, %v35_v10 }
  0x22   :  { %4734 = vmatprep.mubr.msk.f32.mxu0 %vm5177_vm0, %v5176_v1 }
  0x25   :  { %4735 = vmatmul.mubr.msk.f32.gmra.mxu0 %vm91_vm1, %v36_v11 }
  0x26   :  { %4737 = vmatprep.mubr.msk.f32.mxu0 %vm5177_vm0, %v5176_v1 }
  0x29   :  { %4738 = vmatmul.mubr.msk.f32.gmra.mxu0 %vm91_vm1, %v37_v12 }
  0x2a   :  { %4740 = vmatprep.mubr.msk.f32.mxu0 %vm5177_vm0, %v5176_v1 }
  0x2d   :  { %4741 = vmatmul.mubr.msk.f32.gmra.mxu0 %vm91_vm1, %v38_v13 }
  0x2e   :  { %4743 = vmatprep.mubr.msk.f32.mxu0 %vm5177_vm0, %v5176_v1 }
  0x31   :  { %4744 = vmatmul.mubr.msk.f32.gmra.mxu0 %vm91_vm1, %v39_v14 }
  0x32   :  { %4746 = vmatprep.mubr.msk.f32.mxu0 %vm5177_vm0, %v5176_v1 }
  0x35   :  { %4747 = vmatmul.mubr.msk.f32.gmra.mxu0 %vm91_vm1, %v40_v15 }
  0x36   :  { %4749 = vmatprep.mubr.msk.f32.mxu0 %vm5177_vm0, %v5176_v1 }
  0x39   :  { %4750 = vmatmul.mubr.msk.f32.gmra.mxu0 %vm91_vm1, %v41_v16 }
  0x3a   :  { %4752 = vmatprep.mubr.msk.f32.mxu0 %vm5177_vm0, %v5176_v1 }
  0x3d   :  { %4753 = vmatmul.mubr.msk.f32.gmra.mxu0 %vm91_vm1, %v42_v17 }
  0x3e   :  { %4755 = vmatprep.mubr.msk.f32.mxu0 %vm5177_vm0, %v5176_v1 }
  0x41   :  { %4756 = vmatmul.mubr.msk.f32.gmra.mxu0 %vm91_vm1, %v43_v18 }
  0x42   :  { %4758 = vmatprep.mubr.msk.f32.mxu0 %vm5177_vm0, %v5176_v1 }
  0x45   :  { %4759 = vmatmul.mubr.msk.f32.gmra.mxu0 %vm91_vm1, %v44_v19 }
  0x46   :  { %4761 = vmatprep.mubr.msk.f32.mxu0 %vm5177_vm0, %v5176_v1 }
  0x49   :  { %4762 = vmatmul.mubr.msk.f32.gmra.mxu0 %vm91_vm1, %v45_v20 }
  0x4a   :  { %4764 = vmatprep.mubr.msk.f32.mxu0 %vm5177_vm0, %v5176_v1 }
  0x4d   :  { %4765 = vmatmul.mubr.msk.f32.gmra.mxu0 %vm91_vm1, %v46_v21 }
  0x4e   :  { %4767 = vmatprep.mubr.msk.f32.mxu0 %vm5177_vm0, %v5176_v1 }
  0x51   :  { %4768 = vmatmul.mubr.msk.f32.gmra.mxu0 %vm91_vm1, %v47_v22 }
  0x52   :  { %4770 = vmatprep.mubr.msk.f32.mxu0 %vm5177_vm0, %v5176_v1 }
  0x55   :  { %4771 = vmatmul.mubr.msk.f32.gmra.mxu0 %vm91_vm1, %v48_v23 }
  0x56   :  { %4773 = vmatprep.mubr.msk.f32.mxu0 %vm5177_vm0, %v5176_v1 }
  0x59   :  { %4774 = vmatmul.mubr.msk.f32.gmra.mxu0 %vm91_vm1, %v49_v24 }
  0x5a   :  { %4776 = vmatprep.mubr.msk.f32.mxu0 %vm5177_vm0, %v5176_v1 }
  0x5d   :  { %4777 = vmatmul.mubr.msk.f32.gmra.mxu0 %vm91_vm1, %v50_v25 }
  0x5e   :  { %4779 = vmatprep.mubr.msk.f32.mxu0 %vm5177_vm0, %v5176_v1 }
  0x61   :  { %4780 = vmatmul.mubr.msk.f32.gmra.mxu0 %vm91_vm1, %v51_v26 }
  0x62   :  { %4782 = vmatprep.mubr.msk.f32.mxu0 %vm5177_vm0, %v5176_v1 }
  0x65   :  { %4783 = vmatmul.mubr.msk.f32.gmra.mxu0 %vm91_vm1, %v52_v27 }
  0x66   :  { %4787 = vmatprep.mubr.msk.f32.mxu0 %vm5177_vm0, %v5176_v1 }
  0xc5   :  { %v233_v29 = vpop.f32.mrf.mxu0 }
  0xc6   :  { %v5391_v30 = vadd.f32 %v5388_v28, %v233_v29 }
  0xc7   :  { %v4712_v31 = vpop.f32.mrf.mxu0 }
  0xc8   :  { %v358_v32 = vsel %vm357_vm2, %v5391_v30, 0.0 }
  0xc9   :  { %359 = vadd.xlane.f32.xlu0 %v358_v32  ;;  %v238_v33 = vpop.f32.mrf.mxu0 }
  0xca   :  { %v5396_v34 = vadd.f32 %v5388_v28, %v238_v33 }
  0xcb   :  { %v4715_v35 = vpop.f32.mrf.mxu0 }
  0xcc   :  { %v361_v36 = vsel %vm357_vm2, %v5396_v34, 0.0 }
  0xcd   :  { %362 = vadd.xlane.f32.xlu0 %v361_v36  ;;  %v243_v37 = vpop.f32.mrf.mxu0 }
  0xce   :  { %v5401_v38 = vadd.f32 %v5388_v28, %v243_v37 }
  0xcf   :  { %v4718_v39 = vpop.f32.mrf.mxu0 }
  0xd0   :  { %v364_v40 = vsel %vm357_vm2, %v5401_v38, 0.0 }
  0xd1   :  { %365 = vadd.xlane.f32.xlu1 %v364_v40  ;;  %v248_v41 = vpop.f32.mrf.mxu0 }
  0xd2   :  { %v5406_v42 = vadd.f32 %v5388_v28, %v248_v41 }
  0xd3   :  { %v4721_v43 = vpop.f32.mrf.mxu0 }
  0xd4   :  { %v367_v44 = vsel %vm357_vm2, %v5406_v42, 0.0 }
  0xd5   :  { %368 = vadd.xlane.f32.xlu1 %v367_v44  ;;  %v253_v45 = vpop.f32.mrf.mxu0 }
  0xd6   :  { %v5411_v46 = vadd.f32 %v5388_v28, %v253_v45 }
  0xd7   :  { %v4724_v47 = vpop.f32.mrf.mxu0 }
  0xd8   :  { %v370_v48 = vsel %vm357_vm2, %v5411_v46, 0.0 }
  0xd9   :  { %371 = vadd.xlane.f32.xlu0 %v370_v48  ;;  %v258_v49 = vpop.f32.mrf.mxu0 }
  0xda   :  { %v5416_v50 = vadd.f32 %v5388_v28, %v258_v49 }
  0xdb   :  { %v4727_v51 = vpop.f32.mrf.mxu0 }
  0xdc   :  { %v373_v52 = vsel %vm357_vm2, %v5416_v50, 0.0 }
  0xdd   :  { %374 = vadd.xlane.f32.xlu1 %v373_v52  ;;  %v263_v53 = vpop.f32.mrf.mxu0 }
  0xde   :  { %v5421_v54 = vadd.f32 %v5388_v28, %v263_v53 }
  0xdf   :  { %v4730_v55 = vpop.f32.mrf.mxu0 }
  0xe0   :  { %v376_v56 = vsel %vm357_vm2, %v5421_v54, 0.0 }
  0xe1   :  { %377 = vadd.xlane.f32.xlu0 %v376_v56  ;;  %v268_v57 = vpop.f32.mrf.mxu0 }
  0xe2   :  { %v5426_v58 = vadd.f32 %v5388_v28, %v268_v57 }
  0xe3   :  { %v4733_v59 = vpop.f32.mrf.mxu0 }
  0xe4   :  { %v379_v60 = vsel %vm357_vm2, %v5426_v58, 0.0 }
  0xe5   :  { %380 = vadd.xlane.f32.xlu1 %v379_v60  ;;  %v273_v61 = vpop.f32.mrf.mxu0 }
  0xe6   :  { %v5431_v62 = vadd.f32 %v5388_v28, %v273_v61 }
  0xe7   :  { %v4736_v63 = vpop.f32.mrf.mxu0 }
  0xe8   :  { %v382_v0 = vsel %vm357_vm2, %v5431_v62, 0.0 }
  0xe9   :  { %383 = vadd.xlane.f32.xlu0 %v382_v0  ;;  %v278_v2 = vpop.f32.mrf.mxu0 }
  0xea   :  { %v5436_v3 = vadd.f32 %v5388_v28, %v278_v2 }
  0xeb   :  { %v4739_v4 = vpop.f32.mrf.mxu0 }
  0xec   :  { %v385_v5 = vsel %vm357_vm2, %v5436_v3, 0.0 }
  0xed   :  { %386 = vadd.xlane.f32.xlu1 %v385_v5  ;;  %v283_v6 = vpop.f32.mrf.mxu0 }
  0xee   :  { %v5441_v7 = vadd.f32 %v5388_v28, %v283_v6 }
  0xef   :  { %v4742_v8 = vpop.f32.mrf.mxu0 }
  0xf0   :  { %v388_v9 = vsel %vm357_vm2, %v5441_v7, 0.0 }
  0xf1   :  { %389 = vadd.xlane.f32.xlu0 %v388_v9  ;;  %v288_v10 = vpop.f32.mrf.mxu0 }
  0xf2   :  { %v5446_v11 = vadd.f32 %v5388_v28, %v288_v10 }
  0xf3   :  { %v4745_v12 = vpop.f32.mrf.mxu0 }
  0xf4   :  { %v391_v13 = vsel %vm357_vm2, %v5446_v11, 0.0 }
  0xf5   :  { %392 = vadd.xlane.f32.xlu1 %v391_v13  ;;  %v293_v14 = vpop.f32.mrf.mxu0 }
  0xf6   :  { %v5451_v15 = vadd.f32 %v5388_v28, %v293_v14 }
  0xf7   :  { %v4748_v16 = vpop.f32.mrf.mxu0 }
  0xf8   :  { %v394_v17 = vsel %vm357_vm2, %v5451_v15, 0.0 }
  0xf9   :  { %395 = vadd.xlane.f32.xlu0 %v394_v17  ;;  %v298_v18 = vpop.f32.mrf.mxu0  ;;  %v947_v17 = vld [vmem:[%s7490_s4] sm:$0xf] }
  0xfa   :  { %v5456_v19 = vadd.f32 %v5388_v28, %v298_v18  ;;  %v65_v18 = vld [vmem:[%s7487_s1 + $0x60] sm:$0xff]  ;;  %4786 = vmatpush3.msk.msra.mxu0 %vm1024_vm3, %v947_v17  ;;  %4946 = vmatpush3.msk.msra.mxu1 %vm1024_vm3, %v947_v17 }
  0xfb   :  { %v4751_v20 = vpop.f32.mrf.mxu0  ;;  %4824 = vmatmul.mubr.msk.f32.vlgmr.msra.gmra.mxu1 %vm948_vm4, %v65_v18  ;;  %4862 = vmatprep.subr.mxu1 %v5176_v1  ;;  %v71_v18 = vld [vmem:[%s7487_s1 + $0x90] sm:$0xff] }
  0xfc   :  { %v397_v21 = vsel %vm357_vm2, %v5456_v19, 0.0  ;;  %4826 = vmatprep.mubr.msk.f32.mxu1 %vm5177_vm0, %v5176_v1  ;;  %v66_v20 = vld [vmem:[%s7487_s1 + $0x68] sm:$0xff] }
  0xfd   :  { %398 = vadd.xlane.f32.xlu1 %v397_v21  ;;  %v303_v22 = vpop.f32.mrf.mxu0  ;;  %v67_v21 = vld [vmem:[%s7487_s1 + $0x70] sm:$0xff] }
  0xfe   :  { %v5461_v23 = vadd.f32 %v5388_v28, %v303_v22 }
  0xff   :  { %v4754_v24 = vpop.f32.mrf.mxu0  ;;  %4827 = vmatmul.mubr.msk.f32.gmra.mxu1 %vm948_vm4, %v66_v20 }
 0x100   :  { %v400_v25 = vsel %vm357_vm2, %v5461_v23, 0.0  ;;  %4829 = vmatprep.mubr.msk.f32.mxu1 %vm5177_vm0, %v5176_v1 }
 0x101   :  { %401 = vadd.xlane.f32.xlu0 %v400_v25  ;;  %v308_v26 = vpop.f32.mrf.mxu0 }
 0x102   :  { %v5466_v27 = vadd.f32 %v5388_v28, %v308_v26 }
 0x103   :  { %v4757_v29 = vpop.f32.mrf.mxu0  ;;  %4830 = vmatmul.mubr.msk.f32.gmra.mxu1 %vm948_vm4, %v67_v21 }
 0x104   :  { %v403_v31 = vsel %vm357_vm2, %v5466_v27, 0.0  ;;  %4832 = vmatprep.mubr.msk.f32.mxu1 %vm5177_vm0, %v5176_v1 }
 0x105   :  { %404 = vadd.xlane.f32.xlu1 %v403_v31  ;;  %v313_v32 = vpop.f32.mrf.mxu0 }
 0x106   :  { %v5471_v33 = vadd.f32 %v5388_v28, %v313_v32 }
 0x107   :  { %v4760_v35 = vpop.f32.mrf.mxu0 }
 0x108   :  { %v406_v36 = vsel %vm357_vm2, %v5471_v33, 0.0 }
 0x109   :  { %407 = vadd.xlane.f32.xlu0 %v406_v36  ;;  %v318_v37 = vpop.f32.mrf.mxu0 }
 0x10a   :  { %v5476_v39 = vadd.f32 %v5388_v28, %v318_v37 }
 0x10b   :  { %v4763_v40 = vpop.f32.mrf.mxu0 }
 0x10c   :  { %v409_v41 = vsel %vm357_vm2, %v5476_v39, 0.0 }
 0x10d   :  { %410 = vadd.xlane.f32.xlu1 %v409_v41  ;;  %v323_v43 = vpop.f32.mrf.mxu0 }
 0x10e   :  { %v5481_v44 = vadd.f32 %v5388_v28, %v323_v43 }
 0x10f   :  { %v4766_v45 = vpop.f32.mrf.mxu0 }
 0x110   :  { %v412_v47 = vsel %vm357_vm2, %v5481_v44, 0.0 }
 0x111   :  { %413 = vadd.xlane.f32.xlu0 %v412_v47  ;;  %v328_v48 = vpop.f32.mrf.mxu0 }
 0x112   :  { %v5486_v49 = vadd.f32 %v5388_v28, %v328_v48 }
 0x113   :  { %v4769_v51 = vpop.f32.mrf.mxu0 }
 0x114   :  { %v415_v52 = vsel %vm357_vm2, %v5486_v49, 0.0 }
 0x115   :  { %416 = vadd.xlane.f32.xlu1 %v415_v52  ;;  %v333_v53 = vpop.f32.mrf.mxu0 }
 0x116   :  { %v5491_v55 = vadd.f32 %v5388_v28, %v333_v53 }
 0x117   :  { %v4772_v56 = vpop.f32.mrf.mxu0 }
 0x118   :  { %v418_v57 = vsel %vm357_vm2, %v5491_v55, 0.0 }
 0x119   :  { %419 = vadd.xlane.f32.xlu1 %v418_v57  ;;  %v338_v59 = vpop.f32.mrf.mxu0  ;;  %v68_v57 = vld [vmem:[%s7487_s1 + $0x78] sm:$0xff] }
 0x11a   :  { %v5496_v60 = vadd.f32 %v5388_v28, %v338_v59  ;;  %4833 = vmatmul.mubr.msk.f32.gmra.mxu1 %vm948_vm4, %v68_v57  ;;  %v75_v57 = vld [vmem:[%s7487_s1 + $0xb0] sm:$0xff] }
 0x11b   :  { %v4775_v61 = vpop.f32.mrf.mxu0  ;;  %4835 = vmatprep.mubr.msk.f32.mxu1 %vm5177_vm0, %v5176_v1 }
 0x11c   :  { %v421_v63 = vsel %vm357_vm2, %v5496_v60, 0.0 }
 0x11d   :  { %422 = vadd.xlane.f32.xlu1 %v421_v63  ;;  %v343_v0 = vpop.f32.mrf.mxu0 }
 0x11e   :  { %v5501_v2 = vadd.f32 %v5388_v28, %v343_v0  ;;  %v69_v0 = vld [vmem:[%s7487_s1 + $0x80] sm:$0xff] }
 0x11f   :  { %v4778_v4 = vpop.f32.mrf.mxu0  ;;  %4836 = vmatmul.mubr.msk.f32.gmra.mxu1 %vm948_vm4, %v69_v0  ;;  %v76_v0 = vld [vmem:[%s7487_s1 + $0xb8] sm:$0xff] }
 0x120   :  { %v424_v5 = vsel %vm357_vm2, %v5501_v2, 0.0  ;;  %4838 = vmatprep.mubr.msk.f32.mxu1 %vm5177_vm0, %v5176_v1 }
 0x121   :  { %425 = vadd.xlane.f32.xlu1 %v424_v5  ;;  %v348_v6 = vpop.f32.mrf.mxu0 }
 0x122   :  { %v5506_v8 = vadd.f32 %v5388_v28, %v348_v6 }
 0x123   :  { %v4781_v9 = vpop.f32.mrf.mxu0 }
 0x124   :  { %v427_v10 = vsel %vm357_vm2, %v5506_v8, 0.0 }
 0x125   :  { %428 = vadd.xlane.f32.xlu1 %v427_v10  ;;  %v353_v12 = vpop.f32.mrf.mxu0  ;;  %v70_v10 = vld [vmem:[%s7487_s1 + $0x88] sm:$0xff] }
 0x126   :  { %v5511_v13 = vadd.f32 %v5388_v28, %v353_v12  ;;  %v946_v28 = vld [vmem:[%s7489_s3 + $0x18] sm:$0xff]  ;;  %4839 = vmatmul.mubr.msk.f32.gmra.mxu1 %vm948_vm4, %v70_v10  ;;  %v944_v10 = vld [vmem:[%s7489_s3 + $0x8] sm:$0xff] }
 0x127   :  { %v4784_v14 = vpop.f32.mrf.mxu0  ;;  %4863 = vmatpush3.msra.mxu1 %v946_v28  ;;  %4841 = vmatprep.mubr.msk.f32.mxu1 %vm5177_vm0, %v5176_v1 }
 0x128   :  { %v430_v16 = vsel %vm357_vm2, %v5511_v13, 0.0  ;;  %4864 = vmatprep.subr.mxu1 %v5176_v1 }
 0x129   :  { %431 = vadd.xlane.f32.xlu1 %v430_v16 }
 0x12a   :  { %4842 = vmatmul.mubr.msk.f32.gmra.mxu1 %vm948_vm4, %v71_v18 }
 0x12b   :  { %4844 = vmatprep.mubr.msk.f32.mxu1 %vm5177_vm0, %v5176_v1 }
 0x152   :  { %v360_v22 = vpop.xlane.xlu0 %359 }
 0x153   :  { %v434_v24 = vmul.f32 0.03125, %v360_v22 }
 0x155   :  { %v5542_v25 = vsub.f32 %v5391_v30, %v434_v24 }
 0x156   :  { %v363_v26 = vpop.xlane.xlu0 %362 }
 0x157   :  { %v435_v29 = vmul.f32 0.03125, %v363_v26  ;;  %v484_v31 = vmul.f32 %v5542_v25, %v5542_v25  ;;  %v72_v26 = vld [vmem:[%s7487_s1 + $0x98] sm:$0xff] }
 0x158   :  { %4845 = vmatmul.mubr.msk.f32.gmra.mxu1 %vm948_vm4, %v72_v26 }
 0x159   :  { %v5547_v32 = vsub.f32 %v5396_v34, %v435_v29  ;;  %v509_v35 = vsel %vm357_vm2, %v484_v31, 0.0  ;;  %4847 = vmatprep.mubr.msk.f32.mxu1 %vm5177_vm0, %v5176_v1 }
 0x15a   :  { %v366_v36 = vpop.xlane.xlu1 %365  ;;  %510 = vadd.xlane.f32.xlu0 %v509_v35 }
 0x15b   :  { %v436_v37 = vmul.f32 0.03125, %v366_v36  ;;  %v485_v40 = vmul.f32 %v5547_v32, %v5547_v32 }
 0x15d   :  { %v5553_v41 = vsub.f32 %v5401_v38, %v436_v37  ;;  %v512_v30 = vsel %vm357_vm2, %v485_v40, 0.0  ;;  %v73_v37 = vld [vmem:[%s7487_s1 + $0xa0] sm:$0xff] }
 0x15e   :  { %v369_v43 = vpop.xlane.xlu1 %368  ;;  %513 = vadd.xlane.f32.xlu0 %v512_v30  ;;  %4848 = vmatmul.mubr.msk.f32.gmra.mxu1 %vm948_vm4, %v73_v37 }
 0x15f   :  { %v437_v45 = vmul.f32 0.03125, %v369_v43  ;;  %v486_v34 = vmul.f32 %v5553_v41, %v5553_v41  ;;  %4850 = vmatprep.mubr.msk.f32.mxu1 %vm5177_vm0, %v5176_v1 }
 0x161   :  { %v5559_v47 = vsub.f32 %v5406_v42, %v437_v45  ;;  %v515_v48 = vsel %vm357_vm2, %v486_v34, 0.0  ;;  %v945_v34 = vld [vmem:[%s7489_s3 + $0x10] sm:$0xff] }
 0x162   :  { %v372_v51 = vpop.xlane.xlu0 %371  ;;  %516 = vadd.xlane.f32.xlu0 %v515_v48  ;;  %v74_v48 = vld [vmem:[%s7487_s1 + $0xa8] sm:$0xff]  ;;  %4865 = vmatpush3.msra.mxu1 %v945_v34 }
 0x163   :  { %v438_v52 = vmul.f32 0.03125, %v372_v51  ;;  %v487_v38 = vmul.f32 %v5559_v47, %v5559_v47  ;;  %4866 = vmatprep.subr.mxu1 %v5176_v1  ;;  %4851 = vmatmul.mubr.msk.f32.gmra.mxu1 %vm948_vm4, %v74_v48 }
 0x164   :  { %4853 = vmatprep.mubr.msk.f32.mxu1 %vm5177_vm0, %v5176_v1  ;;  %4867 = vmatpush3.msra.mxu1 %v944_v10 }
 0x165   :  { %v5565_v53 = vsub.f32 %v5411_v46, %v438_v52  ;;  %v518_v56 = vsel %vm357_vm2, %v487_v38, 0.0  ;;  %4868 = vmatprep.subr.mxu1 %v5176_v1 }
 0x166   :  { %v375_v59 = vpop.xlane.xlu1 %374  ;;  %519 = vadd.xlane.f32.xlu0 %v518_v56 }
 0x167   :  { %v439_v42 = vmul.f32 0.03125, %v375_v59  ;;  %v488_v61 = vmul.f32 %v5565_v53, %v5565_v53  ;;  %4854 = vmatmul.mubr.msk.f32.gmra.mxu1 %vm948_vm4, %v75_v57 }
 0x168   :  { %4856 = vmatprep.mubr.msk.f32.mxu1 %vm5177_vm0, %v5176_v1 }
 0x169   :  { %v5577_v46 = vsub.f32 %v5416_v50, %v439_v42  ;;  %v521_v63 = vsel %vm357_vm2, %v488_v61, 0.0 }
 0x16a   :  { %v378_v4 = vpop.xlane.xlu0 %377  ;;  %522 = vadd.xlane.f32.xlu0 %v521_v63 }
 0x16b   :  { %v440_v5 = vmul.f32 0.03125, %v378_v4  ;;  %v489_v6 = vmul.f32 %v5577_v46, %v5577_v46  ;;  %4857 = vmatmul.mubr.msk.f32.gmra.mxu1 %vm948_vm4, %v76_v0 }
 0x16c   :  { %4859 = vmatprep.mubr.msk.f32.mxu1 %vm5177_vm0, %v5176_v1 }
 0x16d   :  { %v5589_v50 = vsub.f32 %v5421_v54, %v440_v5  ;;  %v524_v9 = vsel %vm357_vm2, %v489_v6, 0.0 }
 0x16e   :  { %v381_v12 = vpop.xlane.xlu1 %380  ;;  %525 = vadd.xlane.f32.xlu0 %v524_v9 }
 0x16f   :  { %v441_v14 = vmul.f32 0.03125, %v381_v12  ;;  %v490_v16 = vmul.f32 %v5589_v50, %v5589_v50  ;;  %v77_v12 = vld [vmem:[%s7487_s1 + $0xc0] sm:$0xff] }
 0x170   :  { %4860 = vmatmul.mubr.msk.f32.gmra.mxu1 %vm948_vm4, %v77_v12 }
 0x171   :  { %v5601_v54 = vsub.f32 %v5426_v58, %v441_v14  ;;  %v527_v17 = vsel %vm357_vm2, %v490_v16, 0.0  ;;  %4870 = vmatprep.mubr.msk.f32.mxu1 %vm5177_vm0, %v5176_v1 }
 0x172   :  { %v384_v28 = vpop.xlane.xlu0 %383  ;;  %528 = vadd.xlane.f32.xlu1 %v527_v17 }
 0x173   :  { %v442_v20 = vmul.f32 0.03125, %v384_v28  ;;  %v491_v21 = vmul.f32 %v5601_v54, %v5601_v54 }
 0x175   :  { %v5613_v58 = vsub.f32 %v5431_v62, %v442_v20  ;;  %v530_v22 = vsel %vm357_vm2, %v491_v21, 0.0  ;;  %v943_v21 = vld [vmem:[%s7489_s3] sm:$0xff] }
 0x176   :  { %v387_v24 = vpop.xlane.xlu1 %386  ;;  %531 = vadd.xlane.f32.xlu0 %v530_v22  ;;  %4869 = vmatpush3.msra.mxu1 %v943_v21 }
 0x177   :  { %v443_v29 = vmul.f32 0.03125, %v387_v24  ;;  %v492_v31 = vmul.f32 %v5613_v58, %v5613_v58 }
 0x179   :  { %v5625_v62 = vsub.f32 %v5436_v3, %v443_v29  ;;  %v533_v35 = vsel %vm357_vm2, %v492_v31, 0.0 }
 0x17a   :  { %v390_v36 = vpop.xlane.xlu0 %389  ;;  %534 = vadd.xlane.f32.xlu1 %v533_v35  ;;  %v54_v35 = vld [vmem:[%s7487_s1 + $0x8] sm:$0xff] }
 0x17b   :  { %v444_v40 = vmul.f32 0.03125, %v390_v36  ;;  %v493_v30 = vmul.f32 %v5625_v62, %v5625_v62 }
 0x17d   :  { %v5637_v3 = vsub.f32 %v5441_v7, %v444_v40  ;;  %v536_v43 = vsel %vm357_vm2, %v493_v30, 0.0 }
 0x17e   :  { %v393_v45 = vpop.xlane.xlu1 %392  ;;  %537 = vadd.xlane.f32.xlu0 %v536_v43  ;;  %v55_v43 = vld [vmem:[%s7487_s1 + $0x10] sm:$0xff] }
 0x17f   :  { %v445_v51 = vmul.f32 0.03125, %v393_v45  ;;  %v494_v52 = vmul.f32 %v5637_v3, %v5637_v3 }
 0x181   :  { %v5651_v7 = vsub.f32 %v5446_v11, %v445_v51  ;;  %v539_v38 = vsel %vm357_vm2, %v494_v52, 0.0  ;;  %v56_v52 = vld [vmem:[%s7487_s1 + $0x18] sm:$0xff] }
 0x182   :  { %v396_v56 = vpop.xlane.xlu0 %395  ;;  %540 = vadd.xlane.f32.xlu1 %v539_v38 }
 0x183   :  { %v446_v59 = vmul.f32 0.03125, %v396_v56  ;;  %v495_v42 = vmul.f32 %v5651_v7, %v5651_v7 }
 0x185   :  { %v5663_v11 = vsub.f32 %v5451_v15, %v446_v59  ;;  %v542_v61 = vsel %vm357_vm2, %v495_v42, 0.0  ;;  %v57_v42 = vld [vmem:[%s7487_s1 + $0x20] sm:$0xff] }
 0x186   :  { %v399_v63 = vpop.xlane.xlu1 %398  ;;  %543 = vadd.xlane.f32.xlu0 %v542_v61 }
 0x187   :  { %v447_v4 = vmul.f32 0.03125, %v399_v63  ;;  %v496_v5 = vmul.f32 %v5663_v11, %v5663_v11 }
 0x189   :  { %v5675_v15 = vsub.f32 %v5456_v19, %v447_v4  ;;  %v545_v6 = vsel %vm357_vm2, %v496_v5, 0.0  ;;  %v58_v5 = vld [vmem:[%s7487_s1 + $0x28] sm:$0xff] }
 0x18a   :  { %v402_v9 = vpop.xlane.xlu0 %401  ;;  %546 = vadd.xlane.f32.xlu1 %v545_v6 }
 0x18b   :  { %v448_v14 = vmul.f32 0.03125, %v402_v9  ;;  %v497_v19 = vmul.f32 %v5675_v15, %v5675_v15 }
 0x18d   :  { %v5691_v16 = vsub.f32 %v5461_v23, %v448_v14  ;;  %v548_v17 = vsel %vm357_vm2, %v497_v19, 0.0  ;;  %v53_v23 = vld [vmem:[%s7487_s1] sm:$0xff] }
 0x18e   :  { %v405_v18 = vpop.xlane.xlu1 %404  ;;  %549 = vadd.xlane.f32.xlu0 %v548_v17  ;;  %4788 = vmatmul.mubr.msk.f32.vlgmr.msra.gmra.mxu0 %vm948_vm4, %v53_v23  ;;  %v59_v17 = vld [vmem:[%s7487_s1 + $0x30] sm:$0xff]  ;;  %v60_v23 = vld [vmem:[%s7487_s1 + $0x38] sm:$0xff] }
 0x18f   :  { %v449_v28 = vmul.f32 0.03125, %v405_v18  ;;  %v498_v20 = vmul.f32 %v5691_v16, %v5691_v16  ;;  %4790 = vmatprep.mubr.msk.f32.mxu0 %vm5177_vm0, %v5176_v1 }
 0x191   :  { %v5705_v22 = vsub.f32 %v5466_v27, %v449_v28  ;;  %v551_v24 = vsel %vm357_vm2, %v498_v20, 0.0 }
 0x192   :  { %v408_v26 = vpop.xlane.xlu0 %407  ;;  %552 = vadd.xlane.f32.xlu1 %v551_v24  ;;  %4791 = vmatmul.mubr.msk.f32.gmra.mxu0 %vm948_vm4, %v54_v35  ;;  %v61_v35 = vld [vmem:[%s7487_s1 + $0x40] sm:$0xff] }
 0x193   :  { %v450_v29 = vmul.f32 0.03125, %v408_v26  ;;  %v499_v31 = vmul.f32 %v5705_v22, %v5705_v22  ;;  %4793 = vmatprep.mubr.msk.f32.mxu0 %vm5177_vm0, %v5176_v1 }
 0x195   :  { %v5717_v27 = vsub.f32 %v5471_v33, %v450_v29  ;;  %v554_v36 = vsel %vm357_vm2, %v499_v31, 0.0 }
 0x196   :  { %v411_v37 = vpop.xlane.xlu1 %410  ;;  %555 = vadd.xlane.f32.xlu0 %v554_v36  ;;  %4794 = vmatmul.mubr.msk.f32.gmra.mxu0 %vm948_vm4, %v55_v43 }
 0x197   :  { %v451_v40 = vmul.f32 0.03125, %v411_v37  ;;  %v500_v30 = vmul.f32 %v5717_v27, %v5717_v27  ;;  %4796 = vmatprep.mubr.msk.f32.mxu0 %vm5177_vm0, %v5176_v1 }
 0x199   :  { %v5729_v33 = vsub.f32 %v5476_v39, %v451_v40  ;;  %v557_v45 = vsel %vm357_vm2, %v500_v30, 0.0  ;;  %v62_v30 = vld [vmem:[%s7487_s1 + $0x48] sm:$0xff] }
 0x19a   :  { %v414_v34 = vpop.xlane.xlu0 %413  ;;  %558 = vadd.xlane.f32.xlu1 %v557_v45  ;;  %4797 = vmatmul.mubr.msk.f32.gmra.mxu0 %vm948_vm4, %v56_v52 }
 0x19b   :  { %v452_v48 = vmul.f32 0.03125, %v414_v34  ;;  %v501_v51 = vmul.f32 %v5729_v33, %v5729_v33  ;;  %4799 = vmatprep.mubr.msk.f32.mxu0 %vm5177_vm0, %v5176_v1  ;;  %v64_v34 = vld [vmem:[%s7487_s1 + $0x58] sm:$0xff] }
 0x19d   :  { %v5741_v39 = vsub.f32 %v5481_v44, %v452_v48  ;;  %v560_v38 = vsel %vm357_vm2, %v501_v51, 0.0 }
 0x19e   :  { %561 = vadd.xlane.f32.xlu0 %v560_v38  ;;  %v417_v56 = vpop.xlane.xlu1 %416  ;;  %4800 = vmatmul.mubr.msk.f32.gmra.mxu0 %vm948_vm4, %v57_v42 }
 0x19f   :  { %v453_v57 = vmul.f32 0.03125, %v417_v56  ;;  %v502_v59 = vmul.f32 %v5741_v39, %v5741_v39  ;;  %4802 = vmatprep.mubr.msk.f32.mxu0 %vm5177_vm0, %v5176_v1 }
 0x1a1   :  { %v5753_v44 = vsub.f32 %v5486_v49, %v453_v57  ;;  %v563_v61 = vsel %vm357_vm2, %v502_v59, 0.0 }
 0x1a2   :  { %v420_v63 = vpop.xlane.xlu1 %419  ;;  %564 = vadd.xlane.f32.xlu1 %v563_v61  ;;  %4803 = vmatmul.mubr.msk.f32.gmra.mxu0 %vm948_vm4, %v58_v5 }
 0x1a3   :  { %v454_v0 = vmul.f32 0.03125, %v420_v63  ;;  %v503_v4 = vmul.f32 %v5753_v44, %v5753_v44  ;;  %4805 = vmatprep.mubr.msk.f32.mxu0 %vm5177_vm0, %v5176_v1 }
 0x1a5   :  { %v5765_v49 = vsub.f32 %v5491_v55, %v454_v0  ;;  %v566_v6 = vsel %vm357_vm2, %v503_v4, 0.0 }
 0x1a6   :  { %567 = vadd.xlane.f32.xlu0 %v566_v6  ;;  %v423_v9 = vpop.xlane.xlu1 %422  ;;  %4806 = vmatmul.mubr.msk.f32.gmra.mxu0 %vm948_vm4, %v59_v17 }
 0x1a7   :  { %v455_v10 = vmul.f32 0.03125, %v423_v9  ;;  %v504_v12 = vmul.f32 %v5765_v49, %v5765_v49  ;;  %4808 = vmatprep.mubr.msk.f32.mxu0 %vm5177_vm0, %v5176_v1 }
 0x1a9   :  { %v5774_v14 = vsub.f32 %v5496_v60, %v455_v10  ;;  %v569_v19 = vsel %vm357_vm2, %v504_v12, 0.0 }
 0x1aa   :  { %v426_v55 = vpop.xlane.xlu1 %425  ;;  %570 = vadd.xlane.f32.xlu1 %v569_v19  ;;  %4809 = vmatmul.mubr.msk.f32.gmra.mxu0 %vm948_vm4, %v60_v23 }
 0x1ab   :  { %v456_v18 = vmul.f32 0.03125, %v426_v55  ;;  %v505_v28 = vmul.f32 %v5774_v14, %v5774_v14  ;;  %4811 = vmatprep.mubr.msk.f32.mxu0 %vm5177_vm0, %v5176_v1 }
 0x1ad   :  { %v5786_v60 = vsub.f32 %v5501_v2, %v456_v18  ;;  %v572_v20 = vsel %vm357_vm2, %v505_v28, 0.0 }
 0x1ae   :  { %573 = vadd.xlane.f32.xlu0 %v572_v20  ;;  %v429_v21 = vpop.xlane.xlu1 %428  ;;  %4812 = vmatmul.mubr.msk.f32.gmra.mxu0 %vm948_vm4, %v61_v35 }
 0x1af   :  { %v457_v24 = vmul.f32 0.03125, %v429_v21  ;;  %v506_v26 = vmul.f32 %v5786_v60, %v5786_v60  ;;  %4814 = vmatprep.mubr.msk.f32.mxu0 %vm5177_vm0, %v5176_v1 }
 0x1b1   :  { %v5798_v2 = vsub.f32 %v5506_v8, %v457_v24  ;;  %v575_v29 = vsel %vm357_vm2, %v506_v26, 0.0 }
 0x1b2   :  { %576 = vadd.xlane.f32.xlu1 %v575_v29  ;;  %v432_v31 = vpop.xlane.xlu1 %431  ;;  %4815 = vmatmul.mubr.msk.f32.gmra.mxu0 %vm948_vm4, %v62_v30 }
 0x1b3   :  { %v458_v36 = vmul.f32 0.03125, %v432_v31  ;;  %v507_v37 = vmul.f32 %v5798_v2, %v5798_v2  ;;  %4817 = vmatprep.mubr.msk.f32.mxu0 %vm5177_vm0, %v5176_v1 }
 0x1b5   :  { %v5810_v8 = vsub.f32 %v5511_v13, %v458_v36  ;;  %v578_v40 = vsel %vm357_vm2, %v507_v37, 0.0  ;;  %v63_v13 = vld [vmem:[%s7487_s1 + $0x50] sm:$0xff] }
 0x1b6   :  { %579 = vadd.xlane.f32.xlu0 %v578_v40  ;;  %4818 = vmatmul.mubr.msk.f32.gmra.mxu0 %vm948_vm4, %v63_v13 }
 0x1b7   :  { %v508_v43 = vmul.f32 %v5810_v8, %v5810_v8  ;;  %4820 = vmatprep.mubr.msk.f32.mxu0 %vm5177_vm0, %v5176_v1 }
 0x1b9   :  { %v581_v45 = vsel %vm357_vm2, %v508_v43, 0.0 }
 0x1ba   :  { %582 = vadd.xlane.f32.xlu1 %v581_v45  ;;  %4821 = vmatmul.mubr.msk.f32.gmra.mxu0 %vm948_vm4, %v64_v34 }
 0x1bb   :  { %v5837_v31 = vpop.f32.mrf.mxu1 }
 0x1bd   :  { %v4825_v37 = vpop.f32.mrf.mxu1 }
 0x1e3   :  { %v511_v48 = vpop.xlane.xlu0 %510 }
 0x1e4   :  { %v585_v51 = vmul.f32 0.032258064, %v511_v48  ;;  %v5842_v48 = vpop.f32.mrf.mxu1 }
 0x1e6   :  { %4954 = vrsqrt.f32 %v585_v51  ;;  %vm612_vm5 = vcmp.eq.f32.partialorder %v585_v51, inf  ;;  %v615_v5 = vand.u32 2147483648, %v585_v51  ;;  %vm614_vm6 = vcmp.eq.f32.partialorder %v585_v51, 0.0 }
 0x1e7   :  { %v514_v52 = vpop.xlane.xlu0 %513 }
 0x1e8   :  { %v586_v38 = vmul.f32 0.032258064, %v514_v52 }
 0x1ea   :  { %4956 = vrsqrt.f32 %v586_v38  ;;  %vm619_vm7 = vcmp.eq.f32.partialorder %v586_v38, inf  ;;  %v622_v18 = vand.u32 2147483648, %v586_v38  ;;  %vm621_vm8 = vcmp.eq.f32.partialorder %v586_v38, 0.0 }
 0x1eb   :  { %v517_v56 = vpop.xlane.xlu0 %516 }
 0x1ec   :  { %v587_v57 = vmul.f32 0.032258064, %v517_v56 }
 0x1ee   :  { %4958 = vrsqrt.f32 %v587_v57  ;;  %vm626_vm9 = vcmp.eq.f32.partialorder %v587_v57, inf  ;;  %v629_v35 = vand.u32 2147483648, %v587_v57  ;;  %vm628_vm10 = vcmp.eq.f32.partialorder %v587_v57, 0.0 }
 0x1ef   :  { %v520_v59 = vpop.xlane.xlu0 %519 }
 0x1f0   :  { %v588_v42 = vmul.f32 0.032258064, %v520_v59 }
 0x1f2   :  { %4960 = vrsqrt.f32 %v588_v42  ;;  %vm633_vm11 = vcmp.eq.f32.partialorder %v588_v42, inf  ;;  %vm635_vm12 = vcmp.eq.f32.partialorder %v588_v42, 0.0 }
 0x1f3   :  { %v4955_v61 = vpop.eup %4954  ;;  %v523_v63 = vpop.xlane.xlu0 %522 }
 0x1f4   :  { %v611_v0 = vmul.f32 %v4955_v61, %v585_v51  ;;  %v589_v4 = vmul.f32 0.032258064, %v523_v63 }
 0x1f6   :  { %v613_v6 = vsel %vm612_vm5, %v585_v51, %v611_v0  ;;  %4962 = vrsqrt.f32 %v589_v4  ;;  %v636_v51 = vand.u32 2147483648, %v588_v42  ;;  %vm640_vm13 = vcmp.eq.f32.partialorder %v589_v4, inf }
 0x1f7   :  { %v4957_v9 = vpop.eup %4956  ;;  %v616_v10 = vsel %vm614_vm6, %v615_v5, %v613_v6  ;;  %v526_v12 = vpop.xlane.xlu0 %525  ;;  %v643_v6 = vand.u32 2147483648, %v589_v4  ;;  %vm642_vm14 = vcmp.eq.f32.partialorder %v589_v4, 0.0 }
 0x1f8   :  { %v785_v19 = vadd.f32 1e-05, %v616_v10  ;;  %v618_v55 = vmul.f32 %v4957_v9, %v586_v38  ;;  %v5832_v17 = vmul.f32 0.032258064, %v526_v12 }
 0x1fa   :  { %4964 = vrcp.f32 %v785_v19  ;;  %v620_v28 = vsel %vm619_vm7, %v586_v38, %v618_v55  ;;  %v4828_v38 = vpop.f32.mrf.mxu1  ;;  %vm647_vm15 = vcmp.eq.f32.partialorder %v5832_v17, inf  ;;  %vm649_vm1 = vcmp.eq.f32.partialorder %v5832_v17, 0.0 }
 0x1fb   :  { %v4959_v20 = vpop.eup %4958  ;;  %v623_v21 = vsel %vm621_vm8, %v622_v18, %v620_v28  ;;  %4966 = vrsqrt.f32 %v5832_v17  ;;  %v529_v23 = vpop.xlane.xlu1 %528 }
 0x1fc   :  { %v786_v24 = vadd.f32 1e-05, %v623_v21  ;;  %v625_v26 = vmul.f32 %v4959_v20, %v587_v57  ;;  %v5835_v29 = vmul.f32 0.032258064, %v529_v23  ;;  %v5847_v5 = vpop.f32.mrf.mxu1  ;;  %v5855_v20 = vld [vmem:[%s7491_s5 + $0x1] ss:$0 sm:$0xff] }
 0x1fe   :  { %4968 = vrcp.f32 %v786_v24  ;;  %v627_v36 = vsel %vm626_vm9, %v587_v57, %v625_v26  ;;  %v4831_v10 = vpop.f32.mrf.mxu1  ;;  %v5864_v24 = vld [vmem:[%s7491_s5 + $0x2] ss:$0 sm:$0xff]  ;;  %vm654_vm3 = vcmp.eq.f32.partialorder %v5835_v29, inf  ;;  %vm656_vm4 = vcmp.eq.f32.partialorder %v5835_v29, 0.0 }
 0x1ff   :  { %v4961_v40 = vpop.eup %4960  ;;  %v630_v30 = vsel %vm628_vm10, %v629_v35, %v627_v36  ;;  %4970 = vrsqrt.f32 %v5835_v29  ;;  %v532_v43 = vpop.xlane.xlu0 %531 }
 0x200   :  { %v787_v45 = vadd.f32 1e-05, %v630_v30  ;;  %v632_v13 = vmul.f32 %v4961_v40, %v588_v42  ;;  %v5840_v34 = vmul.f32 0.032258064, %v532_v43 }
 0x202   :  { %4972 = vrcp.f32 %v787_v45  ;;  %v634_v52 = vsel %vm633_vm11, %v588_v42, %v632_v13  ;;  %vm661_vm5 = vcmp.eq.f32.partialorder %v5840_v34, inf  ;;  %vm663_vm6 = vcmp.eq.f32.partialorder %v5840_v34, 0.0 }
 0x203   :  { %v4963_v56 = vpop.eup %4962  ;;  %v637_v57 = vsel %vm635_vm12, %v636_v51, %v634_v52  ;;  %4974 = vrsqrt.f32 %v5840_v34  ;;  %v535_v59 = vpop.xlane.xlu1 %534 }
 0x204   :  { %v788_v61 = vadd.f32 1e-05, %v637_v57  ;;  %v639_v63 = vmul.f32 %v4963_v56, %v589_v4  ;;  %v5845_v0 = vmul.f32 0.032258064, %v535_v59 }
 0x206   :  { %4976 = vrcp.f32 %v788_v61  ;;  %v641_v9 = vsel %vm640_vm13, %v589_v4, %v639_v63  ;;  %v650_v4 = vand.u32 2147483648, %v5832_v17  ;;  %vm668_vm7 = vcmp.eq.f32.partialorder %v5845_v0, inf }
 0x207   :  { %v4965_v12 = vpop.eup %4964  ;;  %v644_v42 = vsel %vm642_vm14, %v643_v6, %v641_v9  ;;  %4978 = vrsqrt.f32 %v5845_v0  ;;  %v538_v19 = vpop.xlane.xlu0 %537  ;;  %vm670_vm8 = vcmp.eq.f32.partialorder %v5845_v0, 0.0 }
 0x208   :  { %v4967_v55 = vpop.eup %4966  ;;  %v789_v18 = vadd.f32 1e-05, %v644_v42  ;;  %v5850_v28 = vmul.f32 0.032258064, %v538_v19  ;;  %v835_v21 = vmul.f32 %v4965_v12, %v5542_v25 }
 0x209   :  { %v646_v23 = vmul.f32 %v4967_v55, %v5832_v17 }
 0x20a   :  { %4980 = vrcp.f32 %v789_v18  ;;  %v864_v36 = vmul.f32 %v5855_v20, %v835_v21  ;;  %vm675_vm9 = vcmp.eq.f32.partialorder %v5850_v28, inf  ;;  %vm677_vm10 = vcmp.eq.f32.partialorder %v5850_v28, 0.0 }
 0x20b   :  { %v4969_v26 = vpop.eup %4968  ;;  %v648_v35 = vsel %vm647_vm15, %v5832_v17, %v646_v23  ;;  %4982 = vrsqrt.f32 %v5850_v28  ;;  %v541_v25 = vpop.xlane.xlu1 %540  ;;  %v657_v17 = vand.u32 2147483648, %v5835_v29 }
 0x20c   :  { %v4971_v37 = vpop.eup %4970  ;;  %v651_v40 = vsel %vm649_vm1, %v650_v4, %v648_v35  ;;  %v5870_v30 = vmul.f32 0.032258064, %v541_v25  ;;  %v836_v43 = vmul.f32 %v4969_v26, %v5547_v32  ;;  %v893_v51 = vadd.f32 %v5864_v24, %v864_v36 }
 0x20d   :  { %v790_v45 = vadd.f32 1e-05, %v651_v40  ;;  %v653_v13 = vmul.f32 %v4971_v37, %v5835_v29 }
 0x20e   :  { %4984 = vrsqrt.f32 %v5870_v30  ;;  %v918_v57 = vmax.f32 %v893_v51, 0.0  ;;  %v865_v32 = vmul.f32 %v5855_v20, %v836_v43  ;;  %vm682_vm11 = vcmp.eq.f32.partialorder %v5870_v30, inf }
 0x20f   :  { %v4973_v52 = vpop.eup %4972  ;;  %4986 = vrcp.f32 %v790_v45  ;;  %v655_v38 = vsel %vm654_vm3, %v5835_v29, %v653_v13  ;;  %v544_v56 = vpop.xlane.xlu0 %543  ;;  %v664_v29 = vand.u32 2147483648, %v5840_v34  ;;  %vm684_vm12 = vcmp.eq.f32.partialorder %v5870_v30, 0.0 }
 0x210   :  { %v4975_v59 = vpop.eup %4974  ;;  %v658_v61 = vsel %vm656_vm4, %v657_v17, %v655_v38  ;;  %v5881_v63 = vmul.f32 0.032258064, %v544_v56  ;;  %v837_v6 = vmul.f32 %v4973_v52, %v5553_v41  ;;  %4871 = vmatmul.mubr.msk.f32.vlgmr.msra.gmra.mxu1 %vm357_vm2, %v918_v57  ;;  %v894_v12 = vadd.f32 %v5864_v24, %v865_v32 }
 0x211   :  { %v791_v9 = vadd.f32 1e-05, %v658_v61  ;;  %v660_v10 = vmul.f32 %v4975_v59, %v5840_v34  ;;  %4873 = vmatprep.mubr.msk.f32.mxu1 %vm5177_vm0, %v5176_v1 }
 0x212   :  { %4988 = vrsqrt.f32 %v5881_v63  ;;  %v919_v55 = vmax.f32 %v894_v12, 0.0  ;;  %v866_v18 = vmul.f32 %v5855_v20, %v837_v6  ;;  %vm689_vm13 = vcmp.eq.f32.partialorder %v5881_v63, inf }
 0x213   :  { %v4977_v42 = vpop.eup %4976  ;;  %4990 = vrcp.f32 %v791_v9  ;;  %v662_v41 = vsel %vm661_vm5, %v5840_v34, %v660_v10  ;;  %v547_v19 = vpop.xlane.xlu1 %546  ;;  %v671_v34 = vand.u32 2147483648, %v5845_v0  ;;  %vm691_vm14 = vcmp.eq.f32.partialorder %v5881_v63, 0.0 }
 0x214   :  { %v4979_v21 = vpop.eup %4978  ;;  %v665_v23 = vsel %vm663_vm6, %v664_v29, %v662_v41  ;;  %v5895_v4 = vmul.f32 0.032258064, %v547_v19  ;;  %v838_v26 = vmul.f32 %v4977_v42, %v5559_v47  ;;  %4874 = vmatmul.mubr.msk.f32.gmra.mxu1 %vm357_vm2, %v919_v55  ;;  %v895_v36 = vadd.f32 %v5864_v24, %v866_v18 }
 0x215   :  { %v792_v35 = vadd.f32 1e-05, %v665_v23  ;;  %v667_v25 = vmul.f32 %v4979_v21, %v5845_v0  ;;  %4876 = vmatprep.mubr.msk.f32.mxu1 %vm5177_vm0, %v5176_v1  ;;  %v685_v41 = vand.u32 2147483648, %v5870_v30 }
 0x216   :  { %4992 = vrsqrt.f32 %v5895_v4  ;;  %v920_v43 = vmax.f32 %v895_v36, 0.0  ;;  %v867_v45 = vmul.f32 %v5855_v20, %v838_v26  ;;  %vm696_vm15 = vcmp.eq.f32.partialorder %v5895_v4, inf }
 0x217   :  { %v4981_v37 = vpop.eup %4980  ;;  %4994 = vrcp.f32 %v792_v35  ;;  %v669_v47 = vsel %vm668_vm7, %v5845_v0, %v667_v25  ;;  %v550_v40 = vpop.xlane.xlu0 %549  ;;  %v678_v0 = vand.u32 2147483648, %v5850_v28  ;;  %vm698_vm1 = vcmp.eq.f32.partialorder %v5895_v4, 0.0 }
 0x218   :  { %v4983_v13 = vpop.eup %4982  ;;  %v672_v51 = vsel %vm670_vm8, %v671_v34, %v669_v47  ;;  %v5909_v17 = vmul.f32 0.032258064, %v550_v40  ;;  %v839_v52 = vmul.f32 %v4981_v37, %v5565_v53  ;;  %4877 = vmatmul.mubr.msk.f32.gmra.mxu1 %vm357_vm2, %v920_v43  ;;  %v896_v57 = vadd.f32 %v5864_v24, %v867_v45 }
 0x219   :  { %v793_v38 = vadd.f32 1e-05, %v672_v51  ;;  %v674_v56 = vmul.f32 %v4983_v13, %v5850_v28  ;;  %4879 = vmatprep.mubr.msk.f32.mxu1 %vm5177_vm0, %v5176_v1 }
 0x21a   :  { %4996 = vrsqrt.f32 %v5909_v17  ;;  %v921_v61 = vmax.f32 %v896_v57, 0.0  ;;  %v868_v6 = vmul.f32 %v5855_v20, %v839_v52  ;;  %vm703_vm3 = vcmp.eq.f32.partialorder %v5909_v17, inf }
 0x21b   :  { %v4985_v32 = vpop.eup %4984  ;;  %4998 = vrcp.f32 %v793_v38  ;;  %v676_v53 = vsel %vm675_vm9, %v5850_v28, %v674_v56  ;;  %v553_v59 = vpop.xlane.xlu1 %552  ;;  %vm705_vm4 = vcmp.eq.f32.partialorder %v5909_v17, 0.0 }
 0x21c   :  { %v4987_v9 = vpop.eup %4986  ;;  %v679_v10 = vsel %vm677_vm10, %v678_v0, %v676_v53  ;;  %v681_v12 = vmul.f32 %v4985_v32, %v5870_v30  ;;  %v5925_v29 = vmul.f32 0.032258064, %v553_v59  ;;  %4880 = vmatmul.mubr.msk.f32.gmra.mxu1 %vm357_vm2, %v921_v61  ;;  %v897_v19 = vadd.f32 %v5864_v24, %v868_v6  ;;  %v5959_v53 = vpop.f32.mrf.mxu1 }
 0x21d   :  { %v794_v42 = vadd.f32 1e-05, %v679_v10  ;;  %v840_v28 = vmul.f32 %v4987_v9, %v5577_v46  ;;  %4882 = vmatprep.mubr.msk.f32.mxu1 %vm5177_vm0, %v5176_v1 }
 0x21e   :  { %v683_v55 = vsel %vm682_vm11, %v5870_v30, %v681_v12  ;;  %5000 = vrsqrt.f32 %v5925_v29  ;;  %v922_v26 = vmax.f32 %v897_v19, 0.0  ;;  %v692_v30 = vand.u32 2147483648, %v5881_v63 }
 0x21f   :  { %v4989_v18 = vpop.eup %4988  ;;  %5002 = vrcp.f32 %v794_v42  ;;  %v686_v21 = vsel %vm684_vm12, %v685_v41, %v683_v55  ;;  %v556_v23 = vpop.xlane.xlu0 %555  ;;  %v869_v46 = vmul.f32 %v5855_v20, %v840_v28  ;;  %v706_v19 = vand.u32 2147483648, %v5909_v17 }
 0x220   :  { %v4991_v35 = vpop.eup %4990  ;;  %v795_v25 = vadd.f32 1e-05, %v686_v21  ;;  %v688_v36 = vmul.f32 %v4989_v18, %v5881_v63  ;;  %v5937_v34 = vmul.f32 0.032258064, %v556_v23  ;;  %4883 = vmatmul.mubr.msk.f32.gmra.mxu1 %vm357_vm2, %v922_v26  ;;  %v4834_v41 = vpop.f32.mrf.mxu1  ;;  %vm710_vm5 = vcmp.eq.f32.partialorder %v5925_v29, inf }
 0x221   :  { %v841_v37 = vmul.f32 %v4991_v35, %v5589_v50  ;;  %4885 = vmatprep.mubr.msk.f32.mxu1 %vm5177_vm0, %v5176_v1  ;;  %v898_v13 = vadd.f32 %v5864_v24, %v869_v46  ;;  %vm712_vm6 = vcmp.eq.f32.partialorder %v5925_v29, 0.0 }
 0x222   :  { %5004 = vrcp.f32 %v795_v25  ;;  %v690_v47 = vsel %vm689_vm13, %v5881_v63, %v688_v36  ;;  %v699_v63 = vand.u32 2147483648, %v5895_v4  ;;  %v5975_v21 = vpop.f32.mrf.mxu1  ;;  %vm717_vm7 = vcmp.eq.f32.partialorder %v5937_v34, inf }
 0x223   :  { %v4993_v40 = vpop.eup %4992  ;;  %v693_v43 = vsel %vm691_vm14, %v692_v30, %v690_v47  ;;  %5006 = vrsqrt.f32 %v5937_v34  ;;  %v559_v45 = vpop.xlane.xlu1 %558  ;;  %v870_v56 = vmul.f32 %v5855_v20, %v841_v37  ;;  %v923_v57 = vmax.f32 %v898_v13, 0.0 }
 0x224   :  { %v4995_v51 = vpop.eup %4994  ;;  %v796_v52 = vadd.f32 1e-05, %v693_v43  ;;  %v695_v38 = vmul.f32 %v4993_v40, %v5895_v4  ;;  %v5951_v50 = vmul.f32 0.032258064, %v559_v45  ;;  %v4837_v37 = vpop.f32.mrf.mxu1  ;;  %v713_v47 = vand.u32 2147483648, %v5925_v29 }
 0x225   :  { %v842_v0 = vmul.f32 %v4995_v51, %v5601_v54  ;;  %4886 = vmatmul.mubr.msk.f32.gmra.mxu1 %vm357_vm2, %v923_v57  ;;  %v899_v9 = vadd.f32 %v5864_v24, %v870_v56  ;;  %vm719_vm8 = vcmp.eq.f32.partialorder %v5937_v34, 0.0 }
 0x226   :  { %5008 = vrcp.f32 %v796_v52  ;;  %v697_v32 = vsel %vm696_vm15, %v5895_v4, %v695_v38  ;;  %4888 = vmatprep.mubr.msk.f32.mxu1 %vm5177_vm0, %v5176_v1  ;;  %v5991_v13 = vpop.f32.mrf.mxu1  ;;  %vm724_vm9 = vcmp.eq.f32.partialorder %v5951_v50, inf  ;;  %vm726_vm10 = vcmp.eq.f32.partialorder %v5951_v50, 0.0 }
 0x227   :  { %v4997_v59 = vpop.eup %4996  ;;  %v700_v61 = vsel %vm698_vm1, %v699_v63, %v697_v32  ;;  %5010 = vrsqrt.f32 %v5951_v50  ;;  %v562_v6 = vpop.xlane.xlu0 %561  ;;  %v871_v4 = vmul.f32 %v5855_v20, %v842_v0  ;;  %v924_v28 = vmax.f32 %v899_v9, 0.0 }
 0x228   :  { %v4999_v10 = vpop.eup %4998  ;;  %v797_v12 = vadd.f32 1e-05, %v700_v61  ;;  %v702_v54 = vmul.f32 %v4997_v59, %v5909_v17  ;;  %v5967_v42 = vmul.f32 0.032258064, %v562_v6  ;;  %v4840_v32 = vpop.f32.mrf.mxu1  ;;  %v720_v6 = vand.u32 2147483648, %v5937_v34 }
 0x229   :  { %v843_v55 = vmul.f32 %v4999_v10, %v5613_v58  ;;  %4889 = vmatmul.mubr.msk.f32.gmra.mxu1 %vm357_vm2, %v924_v28  ;;  %v900_v25 = vadd.f32 %v5864_v24, %v871_v4 }
 0x22a   :  { %5012 = vrcp.f32 %v797_v12  ;;  %v704_v18 = vsel %vm703_vm3, %v5909_v17, %v702_v54  ;;  %4891 = vmatprep.mubr.msk.f32.mxu1 %vm5177_vm0, %v5176_v1  ;;  %v6006_v9 = vpop.f32.mrf.mxu1  ;;  %vm731_vm11 = vcmp.eq.f32.partialorder %v5967_v42, inf  ;;  %vm733_vm12 = vcmp.eq.f32.partialorder %v5967_v42, 0.0 }
 0x22b   :  { %v5001_v23 = vpop.eup %5000  ;;  %v707_v26 = vsel %vm705_vm4, %v706_v19, %v704_v18  ;;  %5014 = vrsqrt.f32 %v5967_v42  ;;  %v565_v35 = vpop.xlane.xlu1 %564  ;;  %v872_v17 = vmul.f32 %v5855_v20, %v843_v55  ;;  %v925_v40 = vmax.f32 %v900_v25, 0.0 }
 0x22c   :  { %v5003_v36 = vpop.eup %5002  ;;  %v798_v46 = vadd.f32 1e-05, %v707_v26  ;;  %v709_v58 = vmul.f32 %v5001_v23, %v5925_v29  ;;  %v5983_v30 = vmul.f32 0.032258064, %v565_v35  ;;  %v4843_v18 = vpop.f32.mrf.mxu1  ;;  %v727_v25 = vand.u32 2147483648, %v5951_v50 }
 0x22d   :  { %v844_v43 = vmul.f32 %v5003_v36, %v5625_v62  ;;  %4892 = vmatmul.mubr.msk.f32.gmra.mxu1 %vm357_vm2, %v925_v40  ;;  %v901_v56 = vadd.f32 %v5864_v24, %v872_v17 }
 0x22e   :  { %5016 = vrcp.f32 %v798_v46  ;;  %v711_v45 = vsel %vm710_vm5, %v5925_v29, %v709_v58  ;;  %4894 = vmatprep.mubr.msk.f32.mxu1 %vm5177_vm0, %v5176_v1  ;;  %v6027_v37 = vpop.f32.mrf.mxu1  ;;  %vm738_vm13 = vcmp.eq.f32.partialorder %v5983_v30, inf  ;;  %vm740_vm14 = vcmp.eq.f32.partialorder %v5983_v30, 0.0 }
 0x22f   :  { %v5005_v51 = vpop.eup %5004  ;;  %v714_v52 = vsel %vm712_vm6, %v713_v47, %v711_v45  ;;  %5018 = vrsqrt.f32 %v5983_v30  ;;  %v568_v38 = vpop.xlane.xlu0 %567  ;;  %v873_v62 = vmul.f32 %v5855_v20, %v844_v43  ;;  %v926_v61 = vmax.f32 %v901_v56, 0.0 }
 0x230   :  { %v5007_v63 = vpop.eup %5006  ;;  %v799_v57 = vadd.f32 1e-05, %v714_v52  ;;  %v5996_v0 = vmul.f32 0.032258064, %v568_v38  ;;  %v845_v29 = vmul.f32 %v5005_v51, %v5637_v3  ;;  %v4846_v38 = vpop.f32.mrf.mxu1  ;;  %v734_v56 = vand.u32 2147483648, %v5967_v42 }
 0x231   :  { %v716_v59 = vmul.f32 %v5007_v63, %v5937_v34  ;;  %4895 = vmatmul.mubr.msk.f32.gmra.mxu1 %vm357_vm2, %v926_v61  ;;  %v902_v54 = vadd.f32 %v5864_v24, %v873_v62 }
 0x232   :  { %5020 = vrcp.f32 %v799_v57  ;;  %v874_v4 = vmul.f32 %v5855_v20, %v845_v29  ;;  %4897 = vmatprep.mubr.msk.f32.mxu1 %vm5177_vm0, %v5176_v1  ;;  %v6043_v32 = vpop.f32.mrf.mxu1  ;;  %vm745_vm15 = vcmp.eq.f32.partialorder %v5996_v0, inf  ;;  %vm747_vm1 = vcmp.eq.f32.partialorder %v5996_v0, 0.0 }
 0x233   :  { %v5009_v10 = vpop.eup %5008  ;;  %v718_v12 = vsel %vm717_vm7, %v5937_v34, %v716_v59  ;;  %5022 = vrsqrt.f32 %v5996_v0  ;;  %v571_v3 = vpop.xlane.xlu1 %570  ;;  %v927_v26 = vmax.f32 %v902_v54, 0.0 }
 0x234   :  { %v5011_v41 = vpop.eup %5010  ;;  %v721_v19 = vsel %vm719_vm8, %v720_v6, %v718_v12  ;;  %v6015_v28 = vmul.f32 0.032258064, %v571_v3  ;;  %v846_v55 = vmul.f32 %v5009_v10, %v5651_v7  ;;  %v903_v35 = vadd.f32 %v5864_v24, %v874_v4  ;;  %v4849_v54 = vpop.f32.mrf.mxu1 }
 0x235   :  { %v800_v34 = vadd.f32 1e-05, %v721_v19  ;;  %v723_v23 = vmul.f32 %v5011_v41, %v5951_v50  ;;  %4898 = vmatmul.mubr.msk.f32.gmra.mxu1 %vm357_vm2, %v927_v26  ;;  %v741_v4 = vand.u32 2147483648, %v5983_v30 }
 0x236   :  { %5024 = vrsqrt.f32 %v6015_v28  ;;  %v928_v58 = vmax.f32 %v903_v35, 0.0  ;;  %v875_v17 = vmul.f32 %v5855_v20, %v846_v55  ;;  %4900 = vmatprep.mubr.msk.f32.mxu1 %vm5177_vm0, %v5176_v1  ;;  %vm752_vm3 = vcmp.eq.f32.partialorder %v6015_v28, inf }
 0x237   :  { %v5013_v36 = vpop.eup %5012  ;;  %5026 = vrcp.f32 %v800_v34  ;;  %v725_v46 = vsel %vm724_vm9, %v5951_v50, %v723_v23  ;;  %v574_v7 = vpop.xlane.xlu0 %573  ;;  %vm754_vm4 = vcmp.eq.f32.partialorder %v6015_v28, 0.0 }
 0x238   :  { %v5015_v47 = vpop.eup %5014  ;;  %v728_v40 = vsel %vm726_vm10, %v727_v25, %v725_v46  ;;  %v6029_v43 = vmul.f32 0.032258064, %v574_v7  ;;  %v847_v45 = vmul.f32 %v5013_v36, %v5663_v11  ;;  %v904_v52 = vadd.f32 %v5864_v24, %v875_v17  ;;  %v6064_v25 = vpop.f32.mrf.mxu1 }
 0x239   :  { %v801_v51 = vadd.f32 1e-05, %v728_v40  ;;  %v730_v50 = vmul.f32 %v5015_v47, %v5967_v42  ;;  %4901 = vmatmul.mubr.msk.f32.gmra.mxu1 %vm357_vm2, %v928_v58  ;;  %v748_v7 = vand.u32 2147483648, %v5996_v0 }
 0x23a   :  { %5028 = vrsqrt.f32 %v6029_v43  ;;  %v929_v62 = vmax.f32 %v904_v52, 0.0  ;;  %v876_v29 = vmul.f32 %v5855_v20, %v847_v45  ;;  %4903 = vmatprep.mubr.msk.f32.mxu1 %vm5177_vm0, %v5176_v1  ;;  %v4852_v58 = vpop.f32.mrf.mxu1  ;;  %vm759_vm5 = vcmp.eq.f32.partialorder %v6029_v43, inf }
 0x23b   :  { %v5017_v63 = vpop.eup %5016  ;;  %5030 = vrcp.f32 %v801_v51  ;;  %v732_v57 = vsel %vm731_vm11, %v5967_v42, %v730_v50  ;;  %v577_v11 = vpop.xlane.xlu1 %576  ;;  %vm761_vm6 = vcmp.eq.f32.partialorder %v6029_v43, 0.0 }
 0x23c   :  { %v5019_v59 = vpop.eup %5018  ;;  %v735_v61 = vsel %vm733_vm12, %v734_v56, %v732_v57  ;;  %v6047_v6 = vmul.f32 0.032258064, %v577_v11  ;;  %v848_v10 = vmul.f32 %v5017_v63, %v5675_v15  ;;  %v905_v3 = vadd.f32 %v5864_v24, %v876_v29  ;;  %v6081_v56 = vpop.f32.mrf.mxu1 }
 0x23d   :  { %v802_v12 = vadd.f32 1e-05, %v735_v61  ;;  %v737_v42 = vmul.f32 %v5019_v59, %v5983_v30  ;;  %4904 = vmatmul.mubr.msk.f32.gmra.mxu1 %vm357_vm2, %v929_v62  ;;  %v755_v63 = vand.u32 2147483648, %v6015_v28 }
 0x23e   :  { %5032 = vrsqrt.f32 %v6047_v6  ;;  %v930_v55 = vmax.f32 %v905_v3, 0.0  ;;  %v877_v18 = vmul.f32 %v5855_v20, %v848_v10  ;;  %4906 = vmatprep.mubr.msk.f32.mxu1 %vm5177_vm0, %v5176_v1  ;;  %v4855_v29 = vpop.f32.mrf.mxu1  ;;  %vm766_vm7 = vcmp.eq.f32.partialorder %v6047_v6, inf }
 0x23f   :  { %v5021_v41 = vpop.eup %5020  ;;  %5034 = vrcp.f32 %v802_v12  ;;  %v739_v19 = vsel %vm738_vm13, %v5983_v30, %v737_v42  ;;  %v580_v15 = vpop.xlane.xlu0 %579  ;;  %vm768_vm8 = vcmp.eq.f32.partialorder %v6047_v6, 0.0 }
 0x240   :  { %v5023_v34 = vpop.eup %5022  ;;  %v742_v23 = vsel %vm740_vm14, %v741_v4, %v739_v19  ;;  %v6059_v26 = vmul.f32 0.032258064, %v580_v15  ;;  %v849_v35 = vmul.f32 %v5021_v41, %v5691_v16  ;;  %v906_v46 = vadd.f32 %v5864_v24, %v877_v18  ;;  %v6094_v54 = vpop.f32.mrf.mxu1 }
 0x241   :  { %v803_v36 = vadd.f32 1e-05, %v742_v23  ;;  %v744_v30 = vmul.f32 %v5023_v34, %v5996_v0  ;;  %4907 = vmatmul.mubr.msk.f32.gmra.mxu1 %vm357_vm2, %v930_v55 }
 0x242   :  { %5036 = vrsqrt.f32 %v6059_v26  ;;  %v931_v40 = vmax.f32 %v906_v46, 0.0  ;;  %v878_v45 = vmul.f32 %v5855_v20, %v849_v35  ;;  %4909 = vmatprep.mubr.msk.f32.mxu1 %vm5177_vm0, %v5176_v1  ;;  %v4858_v15 = vpop.f32.mrf.mxu1  ;;  %vm773_vm9 = vcmp.eq.f32.partialorder %v6059_v26, inf }
 0x243   :  { %v5025_v17 = vpop.eup %5024  ;;  %5038 = vrcp.f32 %v803_v36  ;;  %v746_v16 = vsel %vm745_vm15, %v5996_v0, %v744_v30  ;;  %v583_v47 = vpop.xlane.xlu1 %582  ;;  %vm775_vm10 = vcmp.eq.f32.partialorder %v6059_v26, 0.0 }
 0x244   :  { %v5027_v51 = vpop.eup %5026  ;;  %v749_v50 = vsel %vm747_vm1, %v748_v7, %v746_v16  ;;  %v751_v52 = vmul.f32 %v5025_v17, %v6015_v28  ;;  %v6079_v38 = vmul.f32 0.032258064, %v583_v47  ;;  %v907_v57 = vadd.f32 %v5864_v24, %v878_v45  ;;  %v6107_v30 = vpop.f32.mrf.mxu1 }
 0x245   :  { %v804_v0 = vadd.f32 1e-05, %v749_v50  ;;  %v850_v11 = vmul.f32 %v5027_v51, %v5705_v22  ;;  %4910 = vmatmul.mubr.msk.f32.gmra.mxu1 %vm357_vm2, %v931_v40 }
 0x246   :  { %v753_v62 = vsel %vm752_vm3, %v6015_v28, %v751_v52  ;;  %5040 = vrsqrt.f32 %v6079_v38  ;;  %v932_v10 = vmax.f32 %v907_v57, 0.0  ;;  %4912 = vmatprep.mubr.msk.f32.mxu1 %vm5177_vm0, %v5176_v1  ;;  %v762_v28 = vand.u32 2147483648, %v6029_v43  ;;  %v4861_v17 = vpop.f32.mrf.mxu1 }
 0x247   :  { %v5029_v59 = vpop.eup %5028  ;;  %5042 = vrcp.f32 %v804_v0  ;;  %v756_v61 = vsel %vm754_vm4, %v755_v63, %v753_v62  ;;  %v879_v22 = vmul.f32 %v5855_v20, %v850_v11  ;;  %vm780_vm11 = vcmp.eq.f32.partialorder %v6079_v38, inf }
 0x248   :  { %v5031_v12 = vpop.eup %5030  ;;  %v805_v42 = vadd.f32 1e-05, %v756_v61  ;;  %v758_v3 = vmul.f32 %v5029_v59, %v6029_v43  ;;  %vm782_vm12 = vcmp.eq.f32.partialorder %v6079_v38, 0.0 }
 0x249   :  { %v851_v4 = vmul.f32 %v5031_v12, %v5717_v27  ;;  %v908_v19 = vadd.f32 %v5864_v24, %v879_v22  ;;  %4913 = vmatmul.mubr.msk.f32.gmra.mxu1 %vm357_vm2, %v932_v10 }
 0x24a   :  { %5044 = vrcp.f32 %v805_v42  ;;  %v760_v41 = vsel %vm759_vm5, %v6029_v43, %v758_v3  ;;  %4915 = vmatprep.mubr.msk.f32.mxu1 %vm5177_vm0, %v5176_v1  ;;  %v769_v43 = vand.u32 2147483648, %v6047_v6 }
 0x24b   :  { %v5033_v55 = vpop.eup %5032  ;;  %v763_v18 = vsel %vm761_vm6, %v762_v28, %v760_v41  ;;  %v880_v34 = vmul.f32 %v5855_v20, %v851_v4  ;;  %v933_v27 = vmax.f32 %v908_v19, 0.0 }
 0x24c   :  { %v5035_v23 = vpop.eup %5034  ;;  %v806_v35 = vadd.f32 1e-05, %v763_v18  ;;  %v765_v36 = vmul.f32 %v5033_v55, %v6047_v6 }
 0x24d   :  { %v909_v46 = vadd.f32 %v5864_v24, %v880_v34  ;;  %v852_v7 = vmul.f32 %v5035_v23, %v5729_v33  ;;  %4916 = vmatmul.mubr.msk.f32.gmra.mxu1 %vm357_vm2, %v933_v27  ;;  %v776_v33 = vand.u32 2147483648, %v6059_v26 }
 0x24e   :  { %5046 = vrcp.f32 %v806_v35  ;;  %v767_v58 = vsel %vm766_vm7, %v6047_v6, %v765_v36  ;;  %4918 = vmatprep.mubr.msk.f32.mxu1 %vm5177_vm0, %v5176_v1  ;;  %v6124_v63 = vpop.f32.mrf.mxu0 }
 0x24f   :  { %v5037_v16 = vpop.eup %5036  ;;  %v770_v47 = vsel %vm768_vm8, %v769_v43, %v767_v58  ;;  %v934_v40 = vmax.f32 %v909_v46, 0.0  ;;  %v881_v45 = vmul.f32 %v5855_v20, %v852_v7 }
 0x250   :  { %v5039_v51 = vpop.eup %5038  ;;  %v807_v50 = vadd.f32 1e-05, %v770_v47  ;;  %v772_v52 = vmul.f32 %v5037_v16, %v6059_v26  ;;  %v4789_v61 = vpop.f32.mrf.mxu0 }
 0x251   :  { %v910_v6 = vadd.f32 %v5864_v24, %v881_v45  ;;  %v853_v0 = vmul.f32 %v5039_v51, %v5741_v39  ;;  %4919 = vmatmul.mubr.msk.f32.gmra.mxu1 %vm357_vm2, %v934_v40  ;;  %v783_v39 = vand.u32 2147483648, %v6079_v38 }
 0x252   :  { %5048 = vrcp.f32 %v807_v50  ;;  %v774_v57 = vsel %vm773_vm9, %v6059_v26, %v772_v52  ;;  %4921 = vmatprep.mubr.msk.f32.mxu1 %vm5177_vm0, %v5176_v1  ;;  %v6137_v22 = vpop.f32.mrf.mxu0 }
 0x253   :  { %v5041_v11 = vpop.eup %5040  ;;  %v777_v62 = vsel %vm775_vm10, %v776_v33, %v774_v57  ;;  %v935_v29 = vmax.f32 %v910_v6, 0.0  ;;  %v882_v59 = vmul.f32 %v5855_v20, %v853_v0 }
 0x254   :  { %v5043_v10 = vpop.eup %5042  ;;  %v808_v12 = vadd.f32 1e-05, %v777_v62  ;;  %v779_v42 = vmul.f32 %v5041_v11, %v6079_v38  ;;  %v4792_v55 = vpop.f32.mrf.mxu0 }
 0x255   :  { %v911_v26 = vadd.f32 %v5864_v24, %v882_v59  ;;  %v854_v3 = vmul.f32 %v5043_v10, %v5753_v44  ;;  %4922 = vmatmul.mubr.msk.f32.gmra.mxu1 %vm357_vm2, %v935_v29 }
 0x256   :  { %5050 = vrcp.f32 %v808_v12  ;;  %v781_v28 = vsel %vm780_vm11, %v6079_v38, %v779_v42  ;;  %4924 = vmatprep.mubr.msk.f32.mxu1 %vm5177_vm0, %v5176_v1  ;;  %v6147_v23 = vpop.f32.mrf.mxu0 }
 0x257   :  { %v5045_v4 = vpop.eup %5044  ;;  %v784_v41 = vsel %vm782_vm12, %v783_v39, %v781_v28  ;;  %v936_v19 = vmax.f32 %v911_v26, 0.0  ;;  %v883_v15 = vmul.f32 %v5855_v20, %v854_v3 }
 0x258   :  { %v809_v18 = vadd.f32 1e-05, %v784_v41  ;;  %v855_v44 = vmul.f32 %v5045_v4, %v5765_v49  ;;  %v4795_v27 = vpop.f32.mrf.mxu0 }
 0x259   :  { %v912_v34 = vadd.f32 %v5864_v24, %v883_v15  ;;  %4925 = vmatmul.mubr.msk.f32.gmra.mxu1 %vm357_vm2, %v936_v19 }
 0x25a   :  { %5052 = vrcp.f32 %v809_v18  ;;  %v884_v38 = vmul.f32 %v5855_v20, %v855_v44  ;;  %4927 = vmatprep.mubr.msk.f32.mxu1 %vm5177_vm0, %v5176_v1  ;;  %v6155_v49 = vpop.f32.mrf.mxu0  ;;  %v6193_v18 = vld [vmem:[%s7491_s5 + $0x3] ss:$0 sm:$0xff] }
 0x25b   :  { %v5047_v35 = vpop.eup %5046  ;;  %v937_v36 = vmax.f32 %v912_v34, 0.0 }
 0x25c   :  { %v913_v43 = vadd.f32 %v5864_v24, %v884_v38  ;;  %v856_v46 = vmul.f32 %v5047_v35, %v5774_v14  ;;  %v4798_v16 = vpop.f32.mrf.mxu0 }
 0x25d   :  { %4928 = vmatmul.mubr.msk.f32.gmra.mxu1 %vm357_vm2, %v937_v36 }
 0x25e   :  { %v885_v7 = vmul.f32 %v5855_v20, %v856_v46  ;;  %v938_v17 = vmax.f32 %v913_v43, 0.0  ;;  %4930 = vmatprep.mubr.msk.f32.mxu1 %vm5177_vm0, %v5176_v1  ;;  %v6163_v45 = vpop.f32.mrf.mxu0 }
 0x25f   :  { %v5049_v58 = vpop.eup %5048 }
 0x260   :  { %v914_v47 = vadd.f32 %v5864_v24, %v885_v7  ;;  %v857_v40 = vmul.f32 %v5049_v58, %v5786_v60  ;;  %v4801_v52 = vpop.f32.mrf.mxu0 }
 0x261   :  { %4931 = vmatmul.mubr.msk.f32.gmra.mxu1 %vm357_vm2, %v938_v17 }
 0x262   :  { %v886_v14 = vmul.f32 %v5855_v20, %v857_v40  ;;  %v939_v50 = vmax.f32 %v914_v47, 0.0  ;;  %4933 = vmatprep.mubr.msk.f32.mxu1 %vm5177_vm0, %v5176_v1  ;;  %v1119_v0 = vpop.f32.mrf.mxu0 }
 0x263   :  { %v5051_v51 = vpop.eup %5050 }
 0x264   :  { %v915_v33 = vadd.f32 %v5864_v24, %v886_v14  ;;  %v858_v6 = vmul.f32 %v5051_v51, %v5798_v2  ;;  %v4804_v62 = vpop.f32.mrf.mxu0 }
 0x265   :  { %4934 = vmatmul.mubr.msk.f32.gmra.mxu1 %vm357_vm2, %v939_v50 }
 0x266   :  { %v887_v57 = vmul.f32 %v5855_v20, %v858_v6  ;;  %v940_v11 = vmax.f32 %v915_v33, 0.0  ;;  %4936 = vmatprep.mubr.msk.f32.mxu1 %vm5177_vm0, %v5176_v1  ;;  %v1124_v10 = vpop.f32.mrf.mxu0 }
 0x267   :  { %v5053_v60 = vpop.eup %5052 }
 0x268   :  { %v916_v29 = vadd.f32 %v5864_v24, %v887_v57  ;;  %v859_v59 = vmul.f32 %v5053_v60, %v5810_v8  ;;  %v4807_v42 = vpop.f32.mrf.mxu0 }
 0x269   :  { %4937 = vmatmul.mubr.msk.f32.gmra.mxu1 %vm357_vm2, %v940_v11 }
 0x26a   :  { %v888_v61 = vmul.f32 %v5855_v20, %v859_v59  ;;  %v941_v2 = vmax.f32 %v916_v29, 0.0  ;;  %4939 = vmatprep.mubr.msk.f32.mxu1 %vm5177_vm0, %v5176_v1  ;;  %v1129_v26 = vpop.f32.mrf.mxu0 }
 0x26c   :  { %v917_v12 = vadd.f32 %v5864_v24, %v888_v61  ;;  %v4810_v8 = vpop.f32.mrf.mxu0 }
 0x26d   :  { %4940 = vmatmul.mubr.msk.f32.gmra.mxu1 %vm357_vm2, %v941_v2 }
 0x26e   :  { %v942_v39 = vmax.f32 %v917_v12, 0.0  ;;  %4942 = vmatprep.mubr.msk.f32.mxu1 %vm5177_vm0, %v5176_v1  ;;  %v1134_v20 = vpop.f32.mrf.mxu0 }
 0x270   :  { %v4813_v3 = vpop.f32.mrf.mxu0 }
 0x271   :  { %4943 = vmatmul.mubr.msk.f32.gmra.mxu1 %vm357_vm2, %v942_v39 }
 0x272   :  { %v1139_v28 = vpop.f32.mrf.mxu0 }
 0x274   :  { %v4816_v4 = vpop.f32.mrf.mxu0 }
 0x276   :  { %v6186_v41 = vpop.f32.mrf.mxu0 }
 0x278   :  { %v4819_v19 = vpop.f32.mrf.mxu0 }
 0x27a   :  { %v6188_v15 = vpop.f32.mrf.mxu0 }
 0x27c   :  { %v4822_v24 = vpop.f32.mrf.mxu0 }
 0x2d0   :  { %v1359_v55 = vpop.f32.mrf.mxu1 }
 0x2d1   :  { %v1360_v1 = vadd.f32 %v1359_v55, %v6124_v63 }
 0x2d2   :  { %v4872_v44 = vpop.f32.mrf.mxu1 }
 0x2d3   :  { %v6197_v34 = vadd.f32 %v6193_v18, %v1360_v1 }
 0x2d4   :  { %v1364_v38 = vpop.f32.mrf.mxu1 }
 0x2d5   :  { %v1365_v35 = vadd.f32 %v1364_v38, %v6137_v22  ;;  %v1512_v36 = vsel %vm357_vm2, %v6197_v34, 0.0 }
 0x2d6   :  { %v4875_v27 = vpop.f32.mrf.mxu1  ;;  %1513 = vadd.xlane.f32.xlu0 %v1512_v36 }
 0x2d7   :  { %v6203_v43 = vadd.f32 %v6193_v18, %v1365_v35 }
 0x2d8   :  { %v1369_v46 = vpop.f32.mrf.mxu1 }
 0x2d9   :  { %v1370_v7 = vadd.f32 %v1369_v46, %v6147_v23  ;;  %v1515_v63 = vsel %vm357_vm2, %v6203_v43, 0.0 }
 0x2da   :  { %v4878_v58 = vpop.f32.mrf.mxu1  ;;  %1516 = vadd.xlane.f32.xlu1 %v1515_v63 }
 0x2db   :  { %v6209_v17 = vadd.f32 %v6193_v18, %v1370_v7 }
 0x2dc   :  { %v1374_v22 = vpop.f32.mrf.mxu1 }
 0x2dd   :  { %v1375_v16 = vadd.f32 %v1374_v22, %v6155_v49  ;;  %v1518_v47 = vsel %vm357_vm2, %v6209_v17, 0.0 }
 0x2de   :  { %v4881_v40 = vpop.f32.mrf.mxu1  ;;  %1519 = vadd.xlane.f32.xlu0 %v1518_v47 }
 0x2df   :  { %v6215_v14 = vadd.f32 %v6193_v18, %v1375_v16 }
 0x2e0   :  { %v1379_v23 = vpop.f32.mrf.mxu1 }
 0x2e1   :  { %v1380_v51 = vadd.f32 %v1379_v23, %v6163_v45  ;;  %v1521_v50 = vsel %vm357_vm2, %v6215_v14, 0.0 }
 0x2e2   :  { %v4884_v52 = vpop.f32.mrf.mxu1  ;;  %1522 = vadd.xlane.f32.xlu1 %v1521_v50 }
 0x2e3   :  { %v6221_v33 = vadd.f32 %v6193_v18, %v1380_v51 }
 0x2e5   :  { %v1524_v49 = vsel %vm357_vm2, %v6221_v33, 0.0  ;;  %v1384_v6 = vpop.f32.mrf.mxu1 }
 0x2e6   :  { %1525 = vadd.xlane.f32.xlu0 %v1524_v49  ;;  %v1385_v57 = vadd.f32 %v1384_v6, %v1119_v0 }
 0x2e7   :  { %v4887_v60 = vpop.f32.mrf.mxu1 }
 0x2e8   :  { %v6226_v11 = vadd.f32 %v6193_v18, %v1385_v57 }
 0x2e9   :  { %v1389_v62 = vpop.f32.mrf.mxu1 }
 0x2ea   :  { %v1390_v45 = vadd.f32 %v1389_v62, %v1124_v10  ;;  %v1527_v29 = vsel %vm357_vm2, %v6226_v11, 0.0 }
 0x2eb   :  { %v4890_v59 = vpop.f32.mrf.mxu1  ;;  %1528 = vadd.xlane.f32.xlu1 %v1527_v29 }
 0x2ec   :  { %v6231_v61 = vadd.f32 %v6193_v18, %v1390_v45 }
 0x2ed   :  { %v1394_v2 = vpop.f32.mrf.mxu1 }
 0x2ee   :  { %v1395_v12 = vadd.f32 %v1394_v2, %v1129_v26  ;;  %v1530_v42 = vsel %vm357_vm2, %v6231_v61, 0.0 }
 0x2ef   :  { %v4893_v0 = vpop.f32.mrf.mxu1  ;;  %1531 = vadd.xlane.f32.xlu0 %v1530_v42 }
 0x2f0   :  { %v6236_v39 = vadd.f32 %v6193_v18, %v1395_v12 }
 0x2f1   :  { %v1399_v8 = vpop.f32.mrf.mxu1 }
 0x2f2   :  { %v1400_v10 = vadd.f32 %v1399_v8, %v1134_v20  ;;  %v1533_v3 = vsel %vm357_vm2, %v6236_v39, 0.0 }
 0x2f3   :  { %v4896_v4 = vpop.f32.mrf.mxu1  ;;  %1534 = vadd.xlane.f32.xlu1 %v1533_v3 }
 0x2f4   :  { %v6241_v19 = vadd.f32 %v6193_v18, %v1400_v10 }
 0x2f5   :  { %v1404_v24 = vpop.f32.mrf.mxu1 }
 0x2f6   :  { %v1405_v26 = vadd.f32 %v1404_v24, %v1139_v28  ;;  %v1536_v55 = vsel %vm357_vm2, %v6241_v19, 0.0 }
 0x2f7   :  { %v4899_v1 = vpop.f32.mrf.mxu1  ;;  %1537 = vadd.xlane.f32.xlu0 %v1536_v55 }
 0x2f8   :  { %v6246_v44 = vadd.f32 %v6193_v18, %v1405_v26 }
 0x2f9   :  { %v1409_v38 = vpop.f32.mrf.mxu1 }
 0x2fa   :  { %v1410_v20 = vadd.f32 %v1409_v38, %v6186_v41  ;;  %v1539_v35 = vsel %vm357_vm2, %v6246_v44, 0.0 }
 0x2fb   :  { %v4902_v36 = vpop.f32.mrf.mxu1  ;;  %1540 = vadd.xlane.f32.xlu1 %v1539_v35 }
 0x2fc   :  { %v6252_v27 = vadd.f32 %v6193_v18, %v1410_v20 }
 0x2fd   :  { %v1414_v28 = vpop.f32.mrf.mxu1 }
 0x2fe   :  { %v1415_v46 = vadd.f32 %v1414_v28, %v6188_v15  ;;  %v1542_v7 = vsel %vm357_vm2, %v6252_v27, 0.0 }
 0x2ff   :  { %v4905_v63 = vpop.f32.mrf.mxu1  ;;  %1543 = vadd.xlane.f32.xlu1 %v1542_v7 }
 0x300   :  { %v6258_v58 = vadd.f32 %v6193_v18, %v1415_v46 }
 0x301   :  { %v1419_v41 = vpop.f32.mrf.mxu1 }
 0x302   :  { %v1420_v22 = vadd.f32 %v1419_v41, %v5837_v31  ;;  %v1545_v16 = vsel %vm357_vm2, %v6258_v58, 0.0 }
 0x303   :  { %v4908_v47 = vpop.f32.mrf.mxu1  ;;  %1546 = vadd.xlane.f32.xlu1 %v1545_v16 }
 0x304   :  { %v6264_v40 = vadd.f32 %v6193_v18, %v1420_v22 }
 0x305   :  { %v1424_v15 = vpop.f32.mrf.mxu1 }
 0x306   :  { %v1425_v23 = vadd.f32 %v1424_v15, %v5842_v48  ;;  %v1548_v51 = vsel %vm357_vm2, %v6264_v40, 0.0 }
 0x307   :  { %v4911_v50 = vpop.f32.mrf.mxu1  ;;  %1549 = vadd.xlane.f32.xlu1 %v1548_v51 }
 0x308   :  { %v6270_v52 = vadd.f32 %v6193_v18, %v1425_v23 }
 0x309   :  { %v1429_v31 = vpop.f32.mrf.mxu1 }
 0x30a   :  { %v1551_v49 = vsel %vm357_vm2, %v6270_v52, 0.0  ;;  %v1430_v45 = vadd.f32 %v1429_v31, %v5847_v5 }
 0x30b   :  { %v4914_v6 = vpop.f32.mrf.mxu1  ;;  %1552 = vadd.xlane.f32.xlu1 %v1551_v49 }
 0x30c   :  { %v6284_v8 = vadd.f32 %v6193_v18, %v1430_v45 }
 0x30d   :  { %v1434_v57 = vpop.f32.mrf.mxu1 }
 0x30e   :  { %v1435_v12 = vadd.f32 %v1434_v57, %v5959_v53  ;;  %v1554_v53 = vsel %vm357_vm2, %v6284_v8, 0.0 }
 0x30f   :  { %v4917_v60 = vpop.f32.mrf.mxu1 }
 0x311   :  { %v1439_v62 = vpop.f32.mrf.mxu1 }
 0x312   :  { %v1440_v48 = vadd.f32 %v1439_v62, %v5975_v21 }
 0x313   :  { %v4920_v29 = vpop.f32.mrf.mxu1 }
 0x314   :  { %v6277_v59 = vadd.f32 %v6193_v18, %v1440_v48 }
 0x315   :  { %v1444_v2 = vpop.f32.mrf.mxu1 }
 0x316   :  { %v1445_v42 = vadd.f32 %v1444_v2, %v5991_v13  ;;  %v1560_v0 = vsel %vm357_vm2, %v6277_v59, 0.0  ;;  %v6295_v13 = vadd.f32 %v6193_v18, %v1435_v12 }
 0x317   :  { %v4923_v10 = vpop.f32.mrf.mxu1  ;;  %1561 = vadd.xlane.f32.xlu1 %v1560_v0 }
 0x318   :  { %v6287_v5 = vadd.f32 %v6193_v18, %v1445_v42  ;;  %v1557_v38 = vsel %vm357_vm2, %v6295_v13, 0.0 }
 0x319   :  { %v1449_v21 = vpop.f32.mrf.mxu1 }
 0x31a   :  { %v1450_v3 = vadd.f32 %v1449_v21, %v6006_v9  ;;  %v1563_v4 = vsel %vm357_vm2, %v6287_v5, 0.0 }
 0x31b   :  { %v4926_v24 = vpop.f32.mrf.mxu1  ;;  %1564 = vadd.xlane.f32.xlu0 %v1563_v4  ;;  %1555 = vadd.xlane.f32.xlu1 %v1554_v53 }
 0x31c   :  { %v6298_v26 = vadd.f32 %v6193_v18, %v1450_v3 }
 0x31d   :  { %v1454_v55 = vpop.f32.mrf.mxu1 }
 0x31e   :  { %v1455_v1 = vadd.f32 %v1454_v55, %v6027_v37  ;;  %v1566_v9 = vsel %vm357_vm2, %v6298_v26, 0.0 }
 0x31f   :  { %v4929_v20 = vpop.f32.mrf.mxu1  ;;  %1567 = vadd.xlane.f32.xlu0 %v1566_v9  ;;  %1558 = vadd.xlane.f32.xlu1 %v1557_v38 }
 0x320   :  { %v6306_v35 = vadd.f32 %v6193_v18, %v1455_v1 }
 0x321   :  { %v1459_v36 = vpop.f32.mrf.mxu1 }
 0x322   :  { %v1460_v28 = vadd.f32 %v1459_v36, %v6043_v32  ;;  %v1569_v46 = vsel %vm357_vm2, %v6306_v35, 0.0 }
 0x323   :  { %v4932_v7 = vpop.f32.mrf.mxu1  ;;  %1570 = vadd.xlane.f32.xlu0 %v1569_v46 }
 0x324   :  { %v6312_v37 = vadd.f32 %v6193_v18, %v1460_v28 }
 0x325   :  { %v1464_v63 = vpop.f32.mrf.mxu1 }
 0x326   :  { %v1465_v41 = vadd.f32 %v1464_v63, %v6064_v25  ;;  %v1572_v22 = vsel %vm357_vm2, %v6312_v37, 0.0 }
 0x327   :  { %v4935_v16 = vpop.f32.mrf.mxu1  ;;  %1573 = vadd.xlane.f32.xlu0 %v1572_v22 }
 0x328   :  { %v6318_v47 = vadd.f32 %v6193_v18, %v1465_v41 }
 0x329   :  { %v1469_v32 = vpop.f32.mrf.mxu1 }
 0x32a   :  { %v1470_v15 = vadd.f32 %v1469_v32, %v6081_v56  ;;  %v1575_v23 = vsel %vm357_vm2, %v6318_v47, 0.0 }
 0x32b   :  { %v4938_v51 = vpop.f32.mrf.mxu1  ;;  %1576 = vadd.xlane.f32.xlu0 %v1575_v23 }
 0x32c   :  { %v6324_v50 = vadd.f32 %v6193_v18, %v1470_v15 }
 0x32d   :  { %v1474_v25 = vpop.f32.mrf.mxu1 }
 0x32e   :  { %v1475_v31 = vadd.f32 %v1474_v25, %v6094_v54  ;;  %v1578_v49 = vsel %vm357_vm2, %v6324_v50, 0.0 }
 0x32f   :  { %v4941_v6 = vpop.f32.mrf.mxu1  ;;  %1579 = vadd.xlane.f32.xlu0 %v1578_v49 }
 0x330   :  { %v6330_v57 = vadd.f32 %v6193_v18, %v1475_v31 }
 0x331   :  { %v1479_v56 = vpop.f32.mrf.mxu1 }
 0x332   :  { %v1480_v60 = vadd.f32 %v1479_v56, %v6107_v30  ;;  %v1581_v62 = vsel %vm357_vm2, %v6330_v57, 0.0 }
 0x333   :  { %v4944_v45 = vpop.f32.mrf.mxu1  ;;  %1582 = vadd.xlane.f32.xlu0 %v1581_v62 }
 0x334   :  { %v6336_v48 = vadd.f32 %v6193_v18, %v1480_v60 }
 0x336   :  { %v1584_v54 = vsel %vm357_vm2, %v6336_v48, 0.0 }
 0x337   :  { %1585 = vadd.xlane.f32.xlu0 %v1584_v54 }
 0x35f   :  { %v1514_v29 = vpop.xlane.xlu0 %1513 }
 0x360   :  { %v1587_v2 = vmul.f32 0.03125, %v1514_v29 }
 0x362   :  { %v6341_v12 = vsub.f32 %v6197_v34, %v1587_v2 }
 0x363   :  { %v1517_v42 = vpop.xlane.xlu1 %1516 }
 0x364   :  { %v1588_v0 = vmul.f32 0.03125, %v1517_v42  ;;  %v1637_v30 = vmul.f32 %v6341_v12, %v6341_v12 }
 0x366   :  { %v6346_v10 = vsub.f32 %v6203_v43, %v1588_v0  ;;  %v1662_v18 = vsel %vm357_vm2, %v1637_v30, 0.0 }
 0x367   :  { %v1520_v21 = vpop.xlane.xlu0 %1519  ;;  %1663 = vadd.xlane.f32.xlu1 %v1662_v18 }
 0x368   :  { %v1589_v3 = vmul.f32 0.03125, %v1520_v21  ;;  %v1638_v4 = vmul.f32 %v6346_v10, %v6346_v10 }
 0x36a   :  { %v6352_v53 = vsub.f32 %v6209_v17, %v1589_v3  ;;  %v1665_v34 = vsel %vm357_vm2, %v1638_v4, 0.0 }
 0x36b   :  { %v1523_v24 = vpop.xlane.xlu1 %1522  ;;  %1666 = vadd.xlane.f32.xlu0 %v1665_v34 }
 0x36c   :  { %v1590_v55 = vmul.f32 0.03125, %v1523_v24  ;;  %v1639_v43 = vmul.f32 %v6352_v53, %v6352_v53 }
 0x36e   :  { %v6358_v1 = vsub.f32 %v6215_v14, %v1590_v55  ;;  %v1668_v9 = vsel %vm357_vm2, %v1639_v43, 0.0 }
 0x36f   :  { %v1526_v38 = vpop.xlane.xlu0 %1525  ;;  %1669 = vadd.xlane.f32.xlu1 %v1668_v9 }
 0x370   :  { %v1591_v20 = vmul.f32 0.03125, %v1526_v38  ;;  %v1640_v17 = vmul.f32 %v6358_v1, %v6358_v1 }
 0x372   :  { %v6364_v36 = vsub.f32 %v6221_v33, %v1591_v20  ;;  %v1671_v28 = vsel %vm357_vm2, %v1640_v17, 0.0 }
 0x373   :  { %1672 = vadd.xlane.f32.xlu0 %v1671_v28 }
 0x374   :  { %v1641_v46 = vmul.f32 %v6364_v36, %v6364_v36  ;;  %v1529_v7 = vpop.xlane.xlu1 %1528 }
 0x375   :  { %v1592_v14 = vmul.f32 0.03125, %v1529_v7 }
 0x376   :  { %v1674_v63 = vsel %vm357_vm2, %v1641_v46, 0.0 }
 0x377   :  { %1675 = vadd.xlane.f32.xlu1 %v1674_v63  ;;  %v6371_v41 = vsub.f32 %v6226_v11, %v1592_v14 }
 0x378   :  { %v1532_v22 = vpop.xlane.xlu0 %1531 }
 0x379   :  { %v1593_v16 = vmul.f32 0.03125, %v1532_v22  ;;  %v1642_v33 = vmul.f32 %v6371_v41, %v6371_v41 }
 0x37b   :  { %v6376_v32 = vsub.f32 %v6231_v61, %v1593_v16  ;;  %v1677_v15 = vsel %vm357_vm2, %v1642_v33, 0.0 }
 0x37c   :  { %v1535_v23 = vpop.xlane.xlu1 %1534  ;;  %1678 = vadd.xlane.f32.xlu0 %v1677_v15 }
 0x37d   :  { %v1594_v51 = vmul.f32 0.03125, %v1535_v23  ;;  %v1643_v25 = vmul.f32 %v6376_v32, %v6376_v32 }
 0x37f   :  { %v6382_v31 = vsub.f32 %v6236_v39, %v1594_v51  ;;  %v1680_v11 = vsel %vm357_vm2, %v1643_v25, 0.0 }
 0x380   :  { %v1538_v49 = vpop.xlane.xlu0 %1537  ;;  %1681 = vadd.xlane.f32.xlu1 %v1680_v11 }
 0x381   :  { %v1595_v6 = vmul.f32 0.03125, %v1538_v49  ;;  %v1644_v61 = vmul.f32 %v6382_v31, %v6382_v31 }
 0x383   :  { %v6388_v56 = vsub.f32 %v6241_v19, %v1595_v6  ;;  %v1683_v60 = vsel %vm357_vm2, %v1644_v61, 0.0 }
 0x384   :  { %1684 = vadd.xlane.f32.xlu0 %v1683_v60  ;;  %v1541_v62 = vpop.xlane.xlu1 %1540 }
 0x385   :  { %v1596_v45 = vmul.f32 0.03125, %v1541_v62  ;;  %v1645_v39 = vmul.f32 %v6388_v56, %v6388_v56 }
 0x387   :  { %v6394_v54 = vsub.f32 %v6246_v44, %v1596_v45  ;;  %v1686_v29 = vsel %vm357_vm2, %v1645_v39, 0.0 }
 0x388   :  { %v1544_v2 = vpop.xlane.xlu1 %1543  ;;  %1687 = vadd.xlane.f32.xlu1 %v1686_v29 }
 0x389   :  { %v1597_v42 = vmul.f32 0.03125, %v1544_v2  ;;  %v1646_v19 = vmul.f32 %v6394_v54, %v6394_v54 }
 0x38b   :  { %v6400_v0 = vsub.f32 %v6252_v27, %v1597_v42  ;;  %v1689_v30 = vsel %vm357_vm2, %v1646_v19, 0.0 }
 0x38c   :  { %1690 = vadd.xlane.f32.xlu0 %v1689_v30  ;;  %v1547_v18 = vpop.xlane.xlu1 %1546 }
 0x38d   :  { %v1598_v21 = vmul.f32 0.03125, %v1547_v18  ;;  %v1647_v44 = vmul.f32 %v6400_v0, %v6400_v0 }
 0x38f   :  { %v6406_v3 = vsub.f32 %v6258_v58, %v1598_v21  ;;  %v1692_v4 = vsel %vm357_vm2, %v1647_v44, 0.0 }
 0x390   :  { %1693 = vadd.xlane.f32.xlu0 %v1692_v4  ;;  %v1550_v34 = vpop.xlane.xlu1 %1549 }
 0x391   :  { %v1599_v24 = vmul.f32 0.03125, %v1550_v34  ;;  %v1648_v27 = vmul.f32 %v6406_v3, %v6406_v3 }
 0x393   :  { %v6412_v55 = vsub.f32 %v6264_v40, %v1599_v24  ;;  %v1695_v43 = vsel %vm357_vm2, %v1648_v27, 0.0 }
 0x394   :  { %1696 = vadd.xlane.f32.xlu0 %v1695_v43  ;;  %v1553_v9 = vpop.xlane.xlu1 %1552 }
 0x395   :  { %v1600_v38 = vmul.f32 0.03125, %v1553_v9  ;;  %v1649_v58 = vmul.f32 %v6412_v55, %v6412_v55 }
 0x397   :  { %v6418_v20 = vsub.f32 %v6270_v52, %v1600_v38  ;;  %v1698_v17 = vsel %vm357_vm2, %v1649_v58, 0.0 }
 0x398   :  { %1699 = vadd.xlane.f32.xlu0 %v1698_v17 }
 0x399   :  { %v1650_v28 = vmul.f32 %v6418_v20, %v6418_v20 }
 0x39b   :  { %v1701_v40 = vsel %vm357_vm2, %v1650_v28, 0.0 }
 0x39c   :  { %1702 = vadd.xlane.f32.xlu0 %v1701_v40 }
 0x3a0   :  { %v1562_v46 = vpop.xlane.xlu1 %1561 }
 0x3a1   :  { %v1603_v7 = vmul.f32 0.03125, %v1562_v46 }
 0x3a3   :  { %v6425_v14 = vsub.f32 %v6277_v59, %v1603_v7 }
 0x3a4   :  { %v1565_v63 = vpop.xlane.xlu0 %1564  ;;  %v1556_v22 = vpop.xlane.xlu1 %1555 }
 0x3a5   :  { %v1604_v16 = vmul.f32 0.03125, %v1565_v63  ;;  %v1601_v33 = vmul.f32 0.03125, %v1556_v22  ;;  %v1653_v52 = vmul.f32 %v6425_v14, %v6425_v14 }
 0x3a7   :  { %v6430_v15 = vsub.f32 %v6287_v5, %v1604_v16  ;;  %v6433_v23 = vsub.f32 %v6284_v8, %v1601_v33  ;;  %v1710_v51 = vsel %vm357_vm2, %v1653_v52, 0.0 }
 0x3a8   :  { %v1568_v25 = vpop.xlane.xlu0 %1567  ;;  %1711 = vadd.xlane.f32.xlu0 %v1710_v51  ;;  %v1559_v11 = vpop.xlane.xlu1 %1558 }
 0x3a9   :  { %v1605_v59 = vmul.f32 0.03125, %v1568_v25  ;;  %v1602_v49 = vmul.f32 0.03125, %v1559_v11  ;;  %v1654_v6 = vmul.f32 %v6430_v15, %v6430_v15  ;;  %v1651_v61 = vmul.f32 %v6433_v23, %v6433_v23 }
 0x3ab   :  { %v6441_v60 = vsub.f32 %v6298_v26, %v1605_v59  ;;  %v6444_v5 = vsub.f32 %v6295_v13, %v1602_v49  ;;  %v1713_v8 = vsel %vm357_vm2, %v1654_v6, 0.0  ;;  %v1704_v62 = vsel %vm357_vm2, %v1651_v61, 0.0 }
 0x3ac   :  { %v1571_v45 = vpop.xlane.xlu0 %1570  ;;  %1714 = vadd.xlane.f32.xlu1 %v1713_v8  ;;  %1705 = vadd.xlane.f32.xlu0 %v1704_v62 }
 0x3ad   :  { %v1606_v39 = vmul.f32 0.03125, %v1571_v45  ;;  %v1655_v29 = vmul.f32 %v6441_v60, %v6441_v60  ;;  %v1652_v2 = vmul.f32 %v6444_v5, %v6444_v5 }
 0x3af   :  { %v6453_v26 = vsub.f32 %v6306_v35, %v1606_v39  ;;  %v1716_v13 = vsel %vm357_vm2, %v1655_v29, 0.0  ;;  %v1707_v42 = vsel %vm357_vm2, %v1652_v2, 0.0 }
 0x3b0   :  { %v1574_v19 = vpop.xlane.xlu0 %1573  ;;  %1717 = vadd.xlane.f32.xlu1 %v1716_v13  ;;  %1708 = vadd.xlane.f32.xlu0 %v1707_v42 }
 0x3b1   :  { %v1607_v30 = vmul.f32 0.03125, %v1574_v19  ;;  %v1656_v18 = vmul.f32 %v6453_v26, %v6453_v26 }
 0x3b3   :  { %v6460_v21 = vsub.f32 %v6312_v37, %v1607_v30  ;;  %v1719_v44 = vsel %vm357_vm2, %v1656_v18, 0.0 }
 0x3b4   :  { %v1577_v4 = vpop.xlane.xlu0 %1576  ;;  %1720 = vadd.xlane.f32.xlu1 %v1719_v44 }
 0x3b5   :  { %v1608_v35 = vmul.f32 0.03125, %v1577_v4  ;;  %v1657_v34 = vmul.f32 %v6460_v21, %v6460_v21 }
 0x3b7   :  { %v6466_v24 = vsub.f32 %v6318_v47, %v1608_v35  ;;  %v1722_v27 = vsel %vm357_vm2, %v1657_v34, 0.0 }
 0x3b8   :  { %v1580_v43 = vpop.xlane.xlu0 %1579  ;;  %1723 = vadd.xlane.f32.xlu1 %v1722_v27 }
 0x3b9   :  { %v1609_v9 = vmul.f32 0.03125, %v1580_v43  ;;  %v1658_v37 = vmul.f32 %v6466_v24, %v6466_v24 }
 0x3bb   :  { %v6472_v38 = vsub.f32 %v6324_v50, %v1609_v9  ;;  %v1725_v58 = vsel %vm357_vm2, %v1658_v37, 0.0 }
 0x3bc   :  { %v1583_v17 = vpop.xlane.xlu0 %1582  ;;  %1726 = vadd.xlane.f32.xlu1 %v1725_v58 }
 0x3bd   :  { %v1610_v28 = vmul.f32 0.03125, %v1583_v17  ;;  %v1659_v47 = vmul.f32 %v6472_v38, %v6472_v38 }
 0x3bf   :  { %v6478_v40 = vsub.f32 %v6330_v57, %v1610_v28  ;;  %v1728_v46 = vsel %vm357_vm2, %v1659_v47, 0.0 }
 0x3c0   :  { %v1586_v7 = vpop.xlane.xlu0 %1585  ;;  %1729 = vadd.xlane.f32.xlu1 %v1728_v46 }
 0x3c1   :  { %v1611_v63 = vmul.f32 0.03125, %v1586_v7  ;;  %v1660_v50 = vmul.f32 %v6478_v40, %v6478_v40 }
 0x3c3   :  { %v6484_v22 = vsub.f32 %v6336_v48, %v1611_v63  ;;  %v1731_v16 = vsel %vm357_vm2, %v1660_v50, 0.0 }
 0x3c4   :  { %1732 = vadd.xlane.f32.xlu1 %v1731_v16 }
 0x3c5   :  { %v1661_v33 = vmul.f32 %v6484_v22, %v6484_v22 }
 0x3c7   :  { %v1734_v57 = vsel %vm357_vm2, %v1661_v33, 0.0 }
 0x3c8   :  { %1735 = vadd.xlane.f32.xlu1 %v1734_v57 }
 0x3f0   :  { %v1664_v52 = vpop.xlane.xlu1 %1663 }
 0x3f1   :  { %v1737_v51 = vmul.f32 0.032258064, %v1664_v52 }
 0x3f3   :  { %5054 = vrsqrt.f32 %v1737_v51  ;;  %vm1764_vm0 = vcmp.eq.f32.partialorder %v1737_v51, inf  ;;  %v1767_v39 = vand.u32 2147483648, %v1737_v51  ;;  %vm1766_vm13 = vcmp.eq.f32.partialorder %v1737_v51, 0.0 }
 0x3f4   :  { %v1667_v25 = vpop.xlane.xlu0 %1666 }
 0x3f5   :  { %v1738_v11 = vmul.f32 0.032258064, %v1667_v25 }
 0x3f7   :  { %5056 = vrsqrt.f32 %v1738_v11  ;;  %vm1771_vm14 = vcmp.eq.f32.partialorder %v1738_v11, inf  ;;  %v1774_v30 = vand.u32 2147483648, %v1738_v11  ;;  %vm1773_vm15 = vcmp.eq.f32.partialorder %v1738_v11, 0.0 }
 0x3f8   :  { %v1670_v59 = vpop.xlane.xlu1 %1669 }
 0x3f9   :  { %v1739_v49 = vmul.f32 0.032258064, %v1670_v59 }
 0x3fb   :  { %5058 = vrsqrt.f32 %v1739_v49  ;;  %vm1778_vm1 = vcmp.eq.f32.partialorder %v1739_v49, inf  ;;  %v1781_v9 = vand.u32 2147483648, %v1739_v49  ;;  %vm1780_vm3 = vcmp.eq.f32.partialorder %v1739_v49, 0.0 }
 0x3fc   :  { %v1673_v48 = vpop.xlane.xlu0 %1672 }
 0x3fd   :  { %v1740_v6 = vmul.f32 0.032258064, %v1673_v48 }
 0x3ff   :  { %5060 = vrsqrt.f32 %v1740_v6  ;;  %vm1785_vm4 = vcmp.eq.f32.partialorder %v1740_v6, inf  ;;  %v1788_v63 = vand.u32 2147483648, %v1740_v6  ;;  %vm1787_vm5 = vcmp.eq.f32.partialorder %v1740_v6, 0.0 }
 0x400   :  { %v5055_v61 = vpop.eup %5054  ;;  %v1676_v8 = vpop.xlane.xlu1 %1675 }
 0x401   :  { %v1763_v62 = vmul.f32 %v5055_v61, %v1737_v51  ;;  %v1741_v45 = vmul.f32 0.032258064, %v1676_v8 }
 0x403   :  { %v1765_v29 = vsel %vm1764_vm0, %v1737_v51, %v1763_v62  ;;  %5062 = vrsqrt.f32 %v1741_v45  ;;  %vm1792_vm6 = vcmp.eq.f32.partialorder %v1741_v45, inf  ;;  %vm1794_vm7 = vcmp.eq.f32.partialorder %v1741_v45, 0.0  ;;  %v6502_v62 = vld [vmem:[%s7491_s5 + $0x4] ss:$0 sm:$0xff] }
 0x404   :  { %v5057_v2 = vpop.eup %5056  ;;  %v1768_v13 = vsel %vm1766_vm13, %v1767_v39, %v1765_v29 }
 0x405   :  { %v1937_v42 = vadd.f32 1e-05, %v1768_v13  ;;  %v1770_v19 = vmul.f32 %v5057_v2, %v1738_v11  ;;  %v1679_v18 = vpop.xlane.xlu0 %1678 }
 0x406   :  { %v1742_v4 = vmul.f32 0.032258064, %v1679_v18 }
 0x407   :  { %5064 = vrcp.f32 %v1937_v42  ;;  %v1772_v44 = vsel %vm1771_vm14, %v1738_v11, %v1770_v19  ;;  %v1795_v11 = vand.u32 2147483648, %v1741_v45 }
 0x408   :  { %v5059_v35 = vpop.eup %5058  ;;  %v1775_v34 = vsel %vm1773_vm15, %v1774_v30, %v1772_v44  ;;  %5066 = vrsqrt.f32 %v1742_v4  ;;  %vm1799_vm8 = vcmp.eq.f32.partialorder %v1742_v4, inf  ;;  %v1802_v30 = vand.u32 2147483648, %v1742_v4 }
 0x409   :  { %v1938_v27 = vadd.f32 1e-05, %v1775_v34  ;;  %v1777_v43 = vmul.f32 %v5059_v35, %v1739_v49  ;;  %v1682_v37 = vpop.xlane.xlu1 %1681  ;;  %vm1801_vm9 = vcmp.eq.f32.partialorder %v1742_v4, 0.0 }
 0x40a   :  { %v6490_v17 = vmul.f32 0.032258064, %v1682_v37 }
 0x40b   :  { %5068 = vrcp.f32 %v1938_v27  ;;  %v1779_v58 = vsel %vm1778_vm1, %v1739_v49, %v1777_v43 }
 0x40c   :  { %v5061_v28 = vpop.eup %5060  ;;  %v1782_v47 = vsel %vm1780_vm3, %v1781_v9, %v1779_v58  ;;  %5070 = vrsqrt.f32 %v6490_v17  ;;  %vm1806_vm10 = vcmp.eq.f32.partialorder %v6490_v17, inf  ;;  %vm1808_vm11 = vcmp.eq.f32.partialorder %v6490_v17, 0.0 }
 0x40d   :  { %v1939_v46 = vadd.f32 1e-05, %v1782_v47  ;;  %v1784_v7 = vmul.f32 %v5061_v28, %v1740_v6  ;;  %v1685_v50 = vpop.xlane.xlu0 %1684  ;;  %v6522_v28 = vld [vmem:[%s7491_s5 + $0x6] ss:$0 sm:$0xff] }
 0x40e   :  { %v6493_v33 = vmul.f32 0.032258064, %v1685_v50 }
 0x40f   :  { %v1786_v16 = vsel %vm1785_vm4, %v1740_v6, %v1784_v7  ;;  %5072 = vrcp.f32 %v1939_v46 }
 0x410   :  { %v5063_v57 = vpop.eup %5062  ;;  %v1789_v52 = vsel %vm1787_vm5, %v1788_v63, %v1786_v16  ;;  %5074 = vrsqrt.f32 %v6493_v33  ;;  %vm1813_vm12 = vcmp.eq.f32.partialorder %v6493_v33, inf  ;;  %vm1815_vm0 = vcmp.eq.f32.partialorder %v6493_v33, 0.0 }
 0x411   :  { %v1940_v51 = vadd.f32 1e-05, %v1789_v52  ;;  %v1791_v25 = vmul.f32 %v5063_v57, %v1741_v45  ;;  %v1688_v59 = vpop.xlane.xlu1 %1687 }
 0x412   :  { %v6496_v48 = vmul.f32 0.032258064, %v1688_v59  ;;  %v1816_v59 = vand.u32 2147483648, %v6493_v33 }
 0x413   :  { %v1793_v49 = vsel %vm1792_vm6, %v1741_v45, %v1791_v25  ;;  %5076 = vrcp.f32 %v1940_v51  ;;  %v6510_v45 = vld [vmem:[%s7491_s5 + $0x5] ss:$0 sm:$0xff] }
 0x414   :  { %v5065_v61 = vpop.eup %5064  ;;  %v1796_v8 = vsel %vm1794_vm7, %v1795_v11, %v1793_v49  ;;  %5078 = vrsqrt.f32 %v6496_v48  ;;  %vm1820_vm13 = vcmp.eq.f32.partialorder %v6496_v48, inf  ;;  %vm1822_vm14 = vcmp.eq.f32.partialorder %v6496_v48, 0.0 }
 0x415   :  { %v1941_v6 = vadd.f32 1e-05, %v1796_v8  ;;  %v5067_v39 = vpop.eup %5066  ;;  %v1691_v29 = vpop.xlane.xlu0 %1690  ;;  %v1987_v2 = vmul.f32 %v5065_v61, %v6341_v12 }
 0x416   :  { %v1798_v13 = vmul.f32 %v5067_v39, %v1742_v4  ;;  %v6505_v42 = vmul.f32 0.032258064, %v1691_v29 }
 0x417   :  { %5080 = vrcp.f32 %v1941_v6  ;;  %v2016_v18 = vmul.f32 %v6502_v62, %v1987_v2 }
 0x418   :  { %v5069_v19 = vpop.eup %5068  ;;  %v1800_v44 = vsel %vm1799_vm8, %v1742_v4, %v1798_v13  ;;  %5082 = vrsqrt.f32 %v6505_v42  ;;  %v1809_v4 = vand.u32 2147483648, %v6490_v17  ;;  %vm1827_vm15 = vcmp.eq.f32.partialorder %v6505_v42, inf }
 0x419   :  { %v5071_v35 = vpop.eup %5070  ;;  %v1803_v12 = vsel %vm1801_vm9, %v1802_v30, %v1800_v44  ;;  %v1694_v34 = vpop.xlane.xlu0 %1693  ;;  %v2045_v27 = vadd.f32 %v6510_v45, %v2016_v18  ;;  %v1988_v43 = vmul.f32 %v5069_v19, %v6346_v10  ;;  %v1823_v18 = vand.u32 2147483648, %v6496_v48 }
 0x41a   :  { %v1942_v9 = vadd.f32 1e-05, %v1803_v12  ;;  %v1805_v37 = vmul.f32 %v5071_v35, %v6490_v17  ;;  %v6517_v58 = vmul.f32 0.032258064, %v1694_v34  ;;  %vm1829_vm1 = vcmp.eq.f32.partialorder %v6505_v42, 0.0 }
 0x41b   :  { %v2070_v47 = vmax.f32 %v2045_v27, 0.0  ;;  %v2017_v46 = vmul.f32 %v6502_v62, %v1988_v43 }
 0x41c   :  { %v5073_v7 = vpop.eup %5072  ;;  %5084 = vrcp.f32 %v1942_v9  ;;  %v1807_v10 = vsel %vm1806_vm10, %v6490_v17, %v1805_v37  ;;  %vm1834_vm3 = vcmp.eq.f32.partialorder %v6517_v58, inf  ;;  %vm1836_vm4 = vcmp.eq.f32.partialorder %v6517_v58, 0.0 }
 0x41d   :  { %v5075_v63 = vpop.eup %5074  ;;  %v1810_v50 = vsel %vm1808_vm11, %v1809_v4, %v1807_v10  ;;  %5086 = vrsqrt.f32 %v6517_v58  ;;  %v1697_v16 = vpop.xlane.xlu0 %1696  ;;  %v2099_v57 = vmul.f32 %v6522_v28, %v2070_v47  ;;  %v2046_v11 = vadd.f32 %v6510_v45, %v2017_v46 }
 0x41e   :  { %v1943_v52 = vadd.f32 1e-05, %v1810_v50  ;;  %v1812_v51 = vmul.f32 %v5075_v63, %v6493_v33  ;;  %v6532_v25 = vmul.f32 0.032258064, %v1697_v16  ;;  %v1989_v49 = vmul.f32 %v5073_v7, %v6352_v53 }
 0x41f   :  { %v2124_v17 = vsel %vm357_vm2, %v2099_v57, 0.0  ;;  %v2071_v2 = vmax.f32 %v2046_v11, 0.0  ;;  %v1830_v46 = vand.u32 2147483648, %v6505_v42 }
 0x420   :  { %v5077_v61 = vpop.eup %5076  ;;  %5088 = vrcp.f32 %v1943_v52  ;;  %v1814_v8 = vsel %vm1813_vm12, %v6493_v33, %v1812_v51  ;;  %2125 = vadd.xlane.f32.xlu0 %v2124_v17  ;;  %v2018_v53 = vmul.f32 %v6502_v62, %v1989_v49  ;;  %v1837_v17 = vand.u32 2147483648, %v6517_v58 }
 0x421   :  { %v5079_v6 = vpop.eup %5078  ;;  %v1817_v39 = vsel %vm1815_vm0, %v1816_v59, %v1814_v8  ;;  %5090 = vrsqrt.f32 %v6532_v25  ;;  %v1700_v29 = vpop.xlane.xlu0 %1699  ;;  %v2100_v33 = vmul.f32 %v6522_v28, %v2071_v2  ;;  %v1990_v44 = vmul.f32 %v5077_v61, %v6358_v1 }
 0x422   :  { %v1944_v13 = vadd.f32 1e-05, %v1817_v39  ;;  %v1819_v19 = vmul.f32 %v5079_v6, %v6496_v48  ;;  %v6543_v30 = vmul.f32 0.032258064, %v1700_v29  ;;  %v2047_v1 = vadd.f32 %v6510_v45, %v2018_v53 }
 0x423   :  { %v2127_v43 = vsel %vm357_vm2, %v2100_v33, 0.0  ;;  %vm1841_vm5 = vcmp.eq.f32.partialorder %v6532_v25, inf  ;;  %vm1843_vm6 = vcmp.eq.f32.partialorder %v6532_v25, 0.0 }
 0x424   :  { %v5081_v35 = vpop.eup %5080  ;;  %5092 = vrcp.f32 %v1944_v13  ;;  %v1821_v12 = vsel %vm1820_vm13, %v6496_v48, %v1819_v19  ;;  %2128 = vadd.xlane.f32.xlu1 %v2127_v43  ;;  %v2019_v48 = vmul.f32 %v6502_v62, %v1990_v44  ;;  %v2072_v16 = vmax.f32 %v2047_v1, 0.0 }
 0x425   :  { %v5083_v34 = vpop.eup %5082  ;;  %v1824_v27 = vsel %vm1822_vm14, %v1823_v18, %v1821_v12  ;;  %5094 = vrsqrt.f32 %v6543_v30  ;;  %v1703_v9 = vpop.xlane.xlu0 %1702  ;;  %v1991_v7 = vmul.f32 %v5081_v35, %v6364_v36  ;;  %vm1848_vm7 = vcmp.eq.f32.partialorder %v6543_v30, inf }
 0x426   :  { %v1945_v37 = vadd.f32 1e-05, %v1824_v27  ;;  %v1826_v4 = vmul.f32 %v5083_v34, %v6505_v42  ;;  %v6555_v47 = vmul.f32 0.032258064, %v1703_v9  ;;  %v2048_v52 = vadd.f32 %v6510_v45, %v2019_v48 }
 0x427   :  { %v2020_v51 = vmul.f32 %v6502_v62, %v1991_v7  ;;  %vm1850_vm8 = vcmp.eq.f32.partialorder %v6543_v30, 0.0 }
 0x428   :  { %v1828_v10 = vsel %vm1827_vm15, %v6505_v42, %v1826_v4  ;;  %5096 = vrsqrt.f32 %v6555_v47  ;;  %v2101_v42 = vmul.f32 %v6522_v28, %v2072_v16  ;;  %v2073_v49 = vmax.f32 %v2048_v52, 0.0 }
 0x429   :  { %v5085_v63 = vpop.eup %5084  ;;  %v1831_v50 = vsel %vm1829_vm1, %v1830_v46, %v1828_v10  ;;  %5098 = vrcp.f32 %v1945_v37  ;;  %v2049_v61 = vadd.f32 %v6510_v45, %v2020_v51  ;;  %vm1855_vm9 = vcmp.eq.f32.partialorder %v6555_v47, inf }
 0x42a   :  { %v5087_v57 = vpop.eup %5086  ;;  %v1992_v11 = vmul.f32 %v5085_v63, %v6371_v41  ;;  %v1946_v59 = vadd.f32 1e-05, %v1831_v50  ;;  %v2130_v41 = vsel %vm357_vm2, %v2101_v42, 0.0  ;;  %v2102_v13 = vmul.f32 %v6522_v28, %v2073_v49 }
 0x42b   :  { %v1833_v36 = vmul.f32 %v5087_v57, %v6517_v58  ;;  %2131 = vadd.xlane.f32.xlu0 %v2130_v41  ;;  %v2074_v19 = vmax.f32 %v2049_v61, 0.0  ;;  %v1851_v50 = vand.u32 2147483648, %v6543_v30  ;;  %vm1857_vm10 = vcmp.eq.f32.partialorder %v6555_v47, 0.0 }
 0x42c   :  { %v2021_v8 = vmul.f32 %v6502_v62, %v1992_v11  ;;  %5100 = vrcp.f32 %v1946_v59  ;;  %v2133_v35 = vsel %vm357_vm2, %v2102_v13, 0.0 }
 0x42d   :  { %v5089_v6 = vpop.eup %5088  ;;  %v1835_v39 = vsel %vm1834_vm3, %v6517_v58, %v1833_v36  ;;  %v1844_v58 = vand.u32 2147483648, %v6532_v25  ;;  %v2103_v12 = vmul.f32 %v6522_v28, %v2074_v19  ;;  %2134 = vadd.xlane.f32.xlu1 %v2133_v35 }
 0x42e   :  { %v5091_v29 = vpop.eup %5090  ;;  %v1838_v2 = vsel %vm1836_vm4, %v1837_v17, %v1835_v39  ;;  %v2050_v53 = vadd.f32 %v6510_v45, %v2021_v8  ;;  %v1993_v44 = vmul.f32 %v5089_v6, %v6376_v32 }
 0x42f   :  { %v1947_v18 = vadd.f32 1e-05, %v1838_v2  ;;  %v1840_v33 = vmul.f32 %v5091_v29, %v6532_v25  ;;  %v2136_v46 = vsel %vm357_vm2, %v2103_v12, 0.0 }
 0x430   :  { %v2075_v34 = vmax.f32 %v2050_v53, 0.0  ;;  %v2022_v37 = vmul.f32 %v6502_v62, %v1993_v44  ;;  %2137 = vadd.xlane.f32.xlu0 %v2136_v46 }
 0x431   :  { %v5093_v27 = vpop.eup %5092  ;;  %5102 = vrcp.f32 %v1947_v18  ;;  %v1842_v43 = vsel %vm1841_vm5, %v6532_v25, %v1840_v33  ;;  %v1712_v9 = vpop.xlane.xlu0 %1711 }
 0x432   :  { %v5095_v32 = vpop.eup %5094  ;;  %v1845_v4 = vsel %vm1843_vm6, %v1844_v58, %v1842_v43  ;;  %v6590_v1 = vmul.f32 0.032258064, %v1712_v9  ;;  %v2104_v48 = vmul.f32 %v6522_v28, %v2075_v34  ;;  %v2051_v63 = vadd.f32 %v6510_v45, %v2022_v37 }
 0x433   :  { %v1948_v7 = vadd.f32 1e-05, %v1845_v4  ;;  %v1847_v10 = vmul.f32 %v5095_v32, %v6543_v30  ;;  %v1994_v25 = vmul.f32 %v5093_v27, %v6382_v31  ;;  %v5178_v4 = vmov 0  }
 0x434   :  { %5104 = vrsqrt.f32 %v6590_v1  ;;  %v2139_v57 = vsel %vm357_vm2, %v2104_v48, 0.0  ;;  %v2076_v11 = vmax.f32 %v2051_v63, 0.0  ;;  %vm1876_vm11 = vcmp.eq.f32.partialorder %v6590_v1, inf  ;;  %4952 = vset.pattern.permute.xlu1 %v5178_v4  ;;  %4953 = vset.pattern.permute.xlu0 %v5178_v4 }
 0x435   :  { %5106 = vrcp.f32 %v1948_v7  ;;  %v1849_v16 = vsel %vm1848_vm7, %v6543_v30, %v1847_v10  ;;  %v1706_v52 = vpop.xlane.xlu0 %1705  ;;  %v1715_v51 = vpop.xlane.xlu1 %1714  ;;  %2140 = vadd.xlane.f32.xlu1 %v2139_v57  ;;  %v2023_v8 = vmul.f32 %v6502_v62, %v1994_v25  ;;  %v1858_v30 = vand.u32 2147483648, %v6555_v47 }
 0x436   :  { %v5097_v59 = vpop.eup %5096  ;;  %v1852_v36 = vsel %vm1850_vm8, %v1851_v50, %v1849_v16  ;;  %v6603_v31 = vmul.f32 0.032258064, %v1706_v52  ;;  %v6605_v42 = vmul.f32 0.032258064, %v1715_v51  ;;  %v2105_v61 = vmul.f32 %v6522_v28, %v2076_v11 }
 0x437   :  { %v5099_v17 = vpop.eup %5098  ;;  %v1854_v49 = vmul.f32 %v5097_v59, %v6555_v47  ;;  %v1949_v6 = vadd.f32 1e-05, %v1852_v36  ;;  %v2052_v33 = vadd.f32 %v6510_v45, %v2023_v8  ;;  %vm1878_vm12 = vcmp.eq.f32.partialorder %v6590_v1, 0.0 }
 0x438   :  { %5108 = vrsqrt.f32 %v6603_v31  ;;  %v1995_v19 = vmul.f32 %v5099_v17, %v6388_v56  ;;  %v2142_v53 = vsel %vm357_vm2, %v2105_v61, 0.0  ;;  %v1879_v58 = vand.u32 2147483648, %v6590_v1 }
 0x439   :  { %v1856_v39 = vsel %vm1855_vm9, %v6555_v47, %v1854_v49  ;;  %v1709_v41 = vpop.xlane.xlu0 %1708  ;;  %v1718_v29 = vpop.xlane.xlu1 %1717  ;;  %5110 = vrsqrt.f32 %v6605_v42  ;;  %2143 = vadd.xlane.f32.xlu0 %v2142_v53  ;;  %v2077_v12 = vmax.f32 %v2052_v33, 0.0  ;;  %vm1862_vm0 = vcmp.eq.f32.partialorder %v6603_v31, inf }
 0x43a   :  { %v1859_v2 = vsel %vm1857_vm10, %v1858_v30, %v1856_v39  ;;  %v6616_v13 = vmul.f32 0.032258064, %v1709_v41  ;;  %v6620_v18 = vmul.f32 0.032258064, %v1718_v29  ;;  %v5101_v44 = vpop.eup %5100  ;;  %v2024_v27 = vmul.f32 %v6502_v62, %v1995_v19 }
 0x43b   :  { %v1950_v47 = vadd.f32 1e-05, %v1859_v2  ;;  %v1996_v43 = vmul.f32 %v5101_v44, %v6394_v54  ;;  %vm1864_vm13 = vcmp.eq.f32.partialorder %v6603_v31, 0.0  ;;  %v1865_v37 = vand.u32 2147483648, %v6603_v31 }
 0x43c   :  { %5112 = vrsqrt.f32 %v6616_v13  ;;  %v2106_v32 = vmul.f32 %v6522_v28, %v2077_v12  ;;  %vm1883_vm14 = vcmp.eq.f32.partialorder %v6605_v42, inf  ;;  %v2053_v48 = vadd.f32 %v6510_v45, %v2024_v27 }
 0x43d   :  { %5114 = vrcp.f32 %v1949_v6  ;;  %v1721_v35 = vpop.xlane.xlu1 %1720  ;;  %vm1885_vm15 = vcmp.eq.f32.partialorder %v6605_v42, 0.0  ;;  %v1886_v25 = vand.u32 2147483648, %v6605_v42  ;;  %vm1869_vm1 = vcmp.eq.f32.partialorder %v6616_v13, inf }
 0x43e   :  { %v5103_v56 = vpop.eup %5102  ;;  %5116 = vrsqrt.f32 %v6620_v18  ;;  %v6628_v34 = vmul.f32 0.032258064, %v1721_v35  ;;  %v2145_v50 = vsel %vm357_vm2, %v2106_v32, 0.0  ;;  %v2078_v57 = vmax.f32 %v2053_v48, 0.0 }
 0x43f   :  { %v1997_v9 = vmul.f32 %v5103_v56, %v6400_v0  ;;  %v2025_v0 = vmul.f32 %v6502_v62, %v1996_v43  ;;  %2146 = vadd.xlane.f32.xlu1 %v2145_v50  ;;  %vm1871_vm3 = vcmp.eq.f32.partialorder %v6616_v13, 0.0  ;;  %v1872_v49 = vand.u32 2147483648, %v6616_v13 }
 0x440   :  { %5118 = vrsqrt.f32 %v6628_v34  ;;  %v2107_v61 = vmul.f32 %v6522_v28, %v2078_v57  ;;  %vm1890_vm4 = vcmp.eq.f32.partialorder %v6620_v18, inf  ;;  %vm1892_vm5 = vcmp.eq.f32.partialorder %v6620_v18, 0.0 }
 0x441   :  { %v5105_v46 = vpop.eup %5104  ;;  %5120 = vrcp.f32 %v1950_v47  ;;  %v1724_v54 = vpop.xlane.xlu1 %1723  ;;  %v2026_v7 = vmul.f32 %v6502_v62, %v1997_v9  ;;  %v2054_v52 = vadd.f32 %v6510_v45, %v2025_v0  ;;  %vm1897_vm6 = vcmp.eq.f32.partialorder %v6628_v34, inf }
 0x442   :  { %v5107_v10 = vpop.eup %5106  ;;  %v1875_v63 = vmul.f32 %v5105_v46, %v6590_v1  ;;  %v6646_v16 = vmul.f32 0.032258064, %v1724_v54  ;;  %v2148_v29 = vsel %vm357_vm2, %v2107_v61, 0.0  ;;  %vm1899_vm7 = vcmp.eq.f32.partialorder %v6628_v34, 0.0 }
 0x443   :  { %v2055_v51 = vadd.f32 %v6510_v45, %v2026_v7  ;;  %v1998_v11 = vmul.f32 %v5107_v10, %v6406_v3  ;;  %v2079_v8 = vmax.f32 %v2054_v52, 0.0  ;;  %2149 = vadd.xlane.f32.xlu0 %v2148_v29 }
 0x444   :  { %v1877_v59 = vsel %vm1876_vm11, %v6590_v1, %v1875_v63  ;;  %5122 = vrsqrt.f32 %v6646_v16  ;;  %vm1904_vm8 = vcmp.eq.f32.partialorder %v6646_v16, inf  ;;  %vm1906_vm9 = vcmp.eq.f32.partialorder %v6646_v16, 0.0 }
 0x445   :  { %v5109_v36 = vpop.eup %5108  ;;  %v1880_v17 = vsel %vm1878_vm12, %v1879_v58, %v1877_v59  ;;  %v1727_v3 = vpop.xlane.xlu1 %1726  ;;  %v2108_v2 = vmul.f32 %v6522_v28, %v2079_v8  ;;  %v2080_v1 = vmax.f32 %v2055_v51, 0.0  ;;  %v2027_v19 = vmul.f32 %v6502_v62, %v1998_v11 }
 0x446   :  { %v1953_v30 = vadd.f32 1e-05, %v1880_v17  ;;  %v1861_v6 = vmul.f32 %v5109_v36, %v6603_v31  ;;  %v6663_v39 = vmul.f32 0.032258064, %v1727_v3  ;;  %v5111_v41 = vpop.eup %5110  ;;  %v1893_v58 = vand.u32 2147483648, %v6620_v18 }
 0x447   :  { %v1882_v33 = vmul.f32 %v5111_v41, %v6605_v42  ;;  %v2151_v35 = vsel %vm357_vm2, %v2108_v2, 0.0  ;;  %v2109_v32 = vmul.f32 %v6522_v28, %v2080_v1  ;;  %v2056_v46 = vadd.f32 %v6510_v45, %v2027_v19 }
 0x448   :  { %5124 = vrcp.f32 %v1953_v30  ;;  %v1863_v53 = vsel %vm1862_vm0, %v6603_v31, %v1861_v6  ;;  %2152 = vadd.xlane.f32.xlu1 %v2151_v35  ;;  %v1900_v11 = vand.u32 2147483648, %v6628_v34  ;;  %vm1911_vm10 = vcmp.eq.f32.partialorder %v6663_v39, inf }
 0x449   :  { %v5113_v44 = vpop.eup %5112  ;;  %v1866_v47 = vsel %vm1864_vm13, %v1865_v37, %v1863_v53  ;;  %5126 = vrsqrt.f32 %v6663_v39  ;;  %v1730_v56 = vpop.xlane.xlu1 %1729  ;;  %v1884_v43 = vsel %vm1883_vm14, %v6605_v42, %v1882_v33  ;;  %v2154_v42 = vsel %vm357_vm2, %v2109_v32, 0.0 }
 0x44a   :  { %v5115_v12 = vpop.eup %5114  ;;  %v1951_v27 = vadd.f32 1e-05, %v1866_v47  ;;  %v1868_v9 = vmul.f32 %v5113_v44, %v6616_v13  ;;  %v1887_v37 = vsel %vm1885_vm15, %v1886_v25, %v1884_v43  ;;  %v6686_v4 = vmul.f32 0.032258064, %v1730_v56 }
 0x44b   :  { %v5117_v31 = vpop.eup %5116  ;;  %v1954_v48 = vadd.f32 1e-05, %v1887_v37  ;;  %v1999_v25 = vmul.f32 %v5115_v12, %v6412_v55  ;;  %v2081_v59 = vmax.f32 %v2056_v46, 0.0  ;;  %v1914_v56 = vand.u32 2147483648, %v6663_v39 }
 0x44c   :  { %5128 = vrcp.f32 %v1951_v27  ;;  %v1870_v54 = vsel %vm1869_vm1, %v6616_v13, %v1868_v9  ;;  %v1889_v0 = vmul.f32 %v5117_v31, %v6620_v18  ;;  %2155 = vadd.xlane.f32.xlu1 %v2154_v42  ;;  %vm1913_vm11 = vcmp.eq.f32.partialorder %v6663_v39, 0.0 }
 0x44d   :  { %v5119_v7 = vpop.eup %5118  ;;  %v1873_v10 = vsel %vm1871_vm3, %v1872_v49, %v1870_v54  ;;  %5130 = vrsqrt.f32 %v6686_v4  ;;  %v1733_v63 = vpop.xlane.xlu1 %1732  ;;  %v2110_v8 = vmul.f32 %v6522_v28, %v2081_v59  ;;  %vm1918_vm12 = vcmp.eq.f32.partialorder %v6686_v4, inf }
 0x44e   :  { %v5121_v50 = vpop.eup %5120  ;;  %5132 = vrcp.f32 %v1954_v48  ;;  %v1952_v57 = vadd.f32 1e-05, %v1873_v10  ;;  %v1891_v52 = vsel %vm1890_vm4, %v6620_v18, %v1889_v0  ;;  %v1896_v51 = vmul.f32 %v5119_v7, %v6628_v34 }
 0x44f   :  { %v1894_v13 = vsel %vm1892_vm5, %v1893_v58, %v1891_v52  ;;  %v6709_v17 = vmul.f32 0.032258064, %v1733_v63  ;;  %v2028_v18 = vmul.f32 %v6502_v62, %v1999_v25  ;;  %v2000_v30 = vmul.f32 %v5121_v50, %v6418_v20 }
 0x450   :  { %5134 = vrcp.f32 %v1952_v57  ;;  %v1955_v55 = vadd.f32 1e-05, %v1894_v13  ;;  %v1898_v36 = vsel %vm1897_vm6, %v6628_v34, %v1896_v51  ;;  %v1907_v34 = vand.u32 2147483648, %v6646_v16 }
 0x451   :  { %v5123_v49 = vpop.eup %5122  ;;  %v1901_v61 = vsel %vm1899_vm7, %v1900_v11, %v1898_v36  ;;  %v1736_v3 = vpop.xlane.xlu1 %1735  ;;  %v2157_v29 = vsel %vm357_vm2, %v2110_v8, 0.0  ;;  %v2057_v20 = vadd.f32 %v6510_v45, %v2028_v18  ;;  %v2029_v33 = vmul.f32 %v6502_v62, %v2000_v30 }
 0x452   :  { %5136 = vrcp.f32 %v1955_v55  ;;  %v1956_v6 = vadd.f32 1e-05, %v1901_v61  ;;  %v1903_v41 = vmul.f32 %v5123_v49, %v6646_v16  ;;  %2158 = vadd.xlane.f32.xlu1 %v2157_v29  ;;  %v6722_v1 = vmul.f32 0.032258064, %v1736_v3 }
 0x453   :  { %5138 = vrsqrt.f32 %v6709_v17  ;;  %v2082_v58 = vmax.f32 %v2057_v20, 0.0  ;;  %vm1920_vm0 = vcmp.eq.f32.partialorder %v6686_v4, 0.0  ;;  %vm1925_vm13 = vcmp.eq.f32.partialorder %v6709_v17, inf }
 0x454   :  { %5140 = vrcp.f32 %v1956_v6  ;;  %v1905_v2 = vsel %vm1904_vm8, %v6646_v16, %v1903_v41  ;;  %v2058_v16 = vadd.f32 %v6510_v45, %v2029_v33  ;;  %vm1927_vm14 = vcmp.eq.f32.partialorder %v6709_v17, 0.0 }
 0x455   :  { %v5125_v19 = vpop.eup %5124  ;;  %v1908_v53 = vsel %vm1906_vm9, %v1907_v34, %v1905_v2  ;;  %5142 = vrsqrt.f32 %v6722_v1  ;;  %v2111_v12 = vmul.f32 %v6522_v28, %v2082_v58  ;;  %v1928_v18 = vand.u32 2147483648, %v6709_v17 }
 0x456   :  { %v5127_v44 = vpop.eup %5126  ;;  %v1957_v47 = vadd.f32 1e-05, %v1908_v53  ;;  %v2003_v27 = vmul.f32 %v5125_v19, %v6425_v14  ;;  %v2083_v31 = vmax.f32 %v2058_v16, 0.0  ;;  %vm1932_vm15 = vcmp.eq.f32.partialorder %v6722_v1, inf }
 0x457   :  { %v1910_v35 = vmul.f32 %v5127_v44, %v6663_v39  ;;  %v2160_v46 = vsel %vm357_vm2, %v2111_v12, 0.0  ;;  %v1935_v29 = vand.u32 2147483648, %v6722_v1  ;;  %vm1934_vm1 = vcmp.eq.f32.partialorder %v6722_v1, 0.0 }
 0x458   :  { %5144 = vrcp.f32 %v1957_v47  ;;  %2161 = vadd.xlane.f32.xlu1 %v2160_v46  ;;  %v2112_v10 = vmul.f32 %v6522_v28, %v2083_v31  ;;  %v2032_v14 = vmul.f32 %v6502_v62, %v2003_v27  ;;  %vm4369_vm3 = vcmask 195712  }
 0x459   :  { %v5129_v43 = vpop.eup %5128  ;;  %v1912_v9 = vsel %vm1911_vm10, %v6663_v39, %v1910_v35  ;;  %v1921_v39 = vand.u32 2147483648, %v6686_v4  ;;  %vm4376_vm4 = vcmask 261312   ;;  %vm4383_vm5 = vcmask 326912  }
 0x45a   :  { %v5131_v37 = vpop.eup %5130  ;;  %v1915_v32 = vsel %vm1913_vm11, %v1914_v56, %v1912_v9  ;;  %v2001_v48 = vmul.f32 %v5129_v43, %v6433_v23  ;;  %v2163_v50 = vsel %vm357_vm2, %v2112_v10, 0.0  ;;  %vm4390_vm6 = vcmask 392512  }
 0x45b   :  { %v5133_v54 = vpop.eup %5132  ;;  %v1958_v0 = vadd.f32 1e-05, %v1915_v32  ;;  %v1917_v7 = vmul.f32 %v5131_v37, %v6686_v4  ;;  %vm4397_vm7 = vcmask 458112   ;;  %vm4404_vm8 = vcmask 523712  }
 0x45c   :  { %v2030_v42 = vmul.f32 %v6502_v62, %v2001_v48  ;;  %v2004_v63 = vmul.f32 %v5133_v54, %v6430_v15  ;;  %2164 = vadd.xlane.f32.xlu1 %v2163_v50  ;;  %v2061_v15 = vadd.f32 %v6510_v45, %v2032_v14  ;;  %vm4411_vm9 = vcmask 589312  }
 0x45d   :  { %v5135_v25 = vpop.eup %5134  ;;  %5146 = vrcp.f32 %v1958_v0  ;;  %v1919_v23 = vsel %vm1918_vm12, %v6686_v4, %v1917_v7  ;;  %vm4418_vm10 = vcmask 654912   ;;  %vm4425_vm11 = vcmask 720512  }
 0x45e   :  { %v1922_v57 = vsel %vm1920_vm0, %v1921_v39, %v1919_v23  ;;  %v2059_v52 = vadd.f32 %v6510_v45, %v2030_v42  ;;  %v2033_v51 = vmul.f32 %v6502_v62, %v2004_v63  ;;  %v2002_v13 = vmul.f32 %v5135_v25, %v6444_v5 }
 0x45f   :  { %v5137_v11 = vpop.eup %5136  ;;  %v1959_v59 = vadd.f32 1e-05, %v1922_v57  ;;  %v2086_v2 = vmax.f32 %v2061_v15, 0.0  ;;  %vm4432_vm12 = vcmask 786112   ;;  %vm4439_vm0 = vcmask 851712  }
 0x460   :  { %v5139_v55 = vpop.eup %5138  ;;  %v2084_v4 = vmax.f32 %v2059_v52, 0.0  ;;  %v2062_v36 = vadd.f32 %v6510_v45, %v2033_v51  ;;  %v2031_v49 = vmul.f32 %v6502_v62, %v2002_v13  ;;  %v2005_v61 = vmul.f32 %v5137_v11, %v6441_v60 }
 0x461   :  { %v5141_v8 = vpop.eup %5140  ;;  %5148 = vrcp.f32 %v1959_v59  ;;  %v1924_v5 = vmul.f32 %v5139_v55, %v6709_v17 }
 0x462   :  { %v2113_v3 = vmul.f32 %v6522_v28, %v2084_v4  ;;  %v2087_v30 = vmax.f32 %v2062_v36, 0.0  ;;  %v2060_v6 = vadd.f32 %v6510_v45, %v2031_v49  ;;  %v2034_v41 = vmul.f32 %v6502_v62, %v2005_v61  ;;  %v5143_v34 = vpop.eup %5142 }
 0x463   :  { %v1926_v60 = vsel %vm1925_vm13, %v6709_v17, %v1924_v5  ;;  %v2006_v20 = vmul.f32 %v5141_v8, %v6453_v26  ;;  %v1931_v53 = vmul.f32 %v5143_v34, %v6722_v1  ;;  %vm4446_vm13 = vcmask 917312  }
 0x464   :  { %v1929_v19 = vsel %vm1927_vm14, %v1928_v18, %v1926_v60  ;;  %v2166_v33 = vsel %vm357_vm2, %v2113_v3, 0.0  ;;  %v2116_v44 = vmul.f32 %v6522_v28, %v2087_v30  ;;  %v2085_v35 = vmax.f32 %v2060_v6, 0.0 }
 0x465   :  { %v5145_v47 = vpop.eup %5144  ;;  %v1960_v58 = vadd.f32 1e-05, %v1929_v19  ;;  %2167 = vadd.xlane.f32.xlu1 %v2166_v33  ;;  %v2063_v16 = vadd.f32 %v6510_v45, %v2034_v41  ;;  %v2035_v56 = vmul.f32 %v6502_v62, %v2006_v20  ;;  %v1933_v26 = vsel %vm1932_vm15, %v6722_v1, %v1931_v53 }
 0x466   :  { %v2175_v17 = vsel %vm357_vm2, %v2116_v44, 0.0  ;;  %v2007_v12 = vmul.f32 %v5145_v47, %v6460_v21  ;;  %v1936_v27 = vsel %vm1934_vm1, %v1935_v29, %v1933_v26  ;;  %v2114_v43 = vmul.f32 %v6522_v28, %v2085_v35 }
 0x467   :  { %5150 = vrcp.f32 %v1960_v58  ;;  %2176 = vadd.xlane.f32.xlu0 %v2175_v17  ;;  %v2088_v9 = vmax.f32 %v2063_v16, 0.0  ;;  %v1961_v31 = vadd.f32 1e-05, %v1936_v27  ;;  %v2064_v37 = vadd.f32 %v6510_v45, %v2035_v56 }
 0x468   :  { %v2036_v32 = vmul.f32 %v6502_v62, %v2007_v12  ;;  %v2169_v46 = vsel %vm357_vm2, %v2114_v43, 0.0  ;;  %v2115_v1 = vmul.f32 %v6522_v28, %v2086_v2  ;;  %v2251_v29 = vlaneseq }
 0x469   :  { %v2117_v48 = vmul.f32 %v6522_v28, %v2088_v9  ;;  %5152 = vrcp.f32 %v1961_v31  ;;  %2170 = vadd.xlane.f32.xlu1 %v2169_v46  ;;  %v2089_v21 = vmax.f32 %v2064_v37, 0.0  ;;  %v5179_v2 = vmov 1966171168  }
 0x46a   :  { %v5147_v54 = vpop.eup %5146  ;;  %v2065_v0 = vadd.f32 %v6510_v45, %v2036_v32  ;;  %v2172_v42 = vsel %vm357_vm2, %v2115_v1, 0.0  ;;  %v3056_v20 = vunpack.c.l.s4 %v5179_v2  ;;  %vm4453_vm14 = vcmask 982912  }
 0x46b   :  { %v2178_v7 = vsel %vm357_vm2, %v2117_v48, 0.0  ;;  %v2008_v10 = vmul.f32 %v5147_v54, %v6466_v24  ;;  %v2118_v14 = vmul.f32 %v6522_v28, %v2089_v21  ;;  %vm4460_vm15 = vcmask 1048512  }
 0x46c   :  { %2179 = vadd.xlane.f32.xlu0 %v2178_v7  ;;  %v2090_v39 = vmax.f32 %v2065_v0, 0.0  ;;  %v3057_v19 = vunpack.c.0.s8 %v3056_v20  ;;  %vm4524_vm1 = vcmp.lt.s32.totalorder %v2251_v29, 200 }
 0x46d   :  { %v2037_v63 = vmul.f32 %v6502_v62, %v2008_v10  ;;  %2173 = vadd.xlane.f32.xlu1 %v2172_v42  ;;  %v2181_v23 = vsel %vm357_vm2, %v2118_v14, 0.0 }
 0x46e   :  { %v5149_v25 = vpop.eup %5148  ;;  %v2119_v50 = vmul.f32 %v6522_v28, %v2090_v39 }
 0x46f   :  { %v2066_v57 = vadd.f32 %v6510_v45, %v2037_v63  ;;  %v2009_v52 = vmul.f32 %v5149_v25, %v6472_v38 }
 0x470   :  { %2182 = vadd.xlane.f32.xlu0 %v2181_v23  ;;  %v2184_v24 = vsel %vm357_vm2, %v2119_v50, 0.0 }
 0x471   :  { %v2091_v51 = vmax.f32 %v2066_v57, 0.0  ;;  %v2038_v13 = vmul.f32 %v6502_v62, %v2009_v52 }
 0x473   :  { %v2120_v11 = vmul.f32 %v6522_v28, %v2091_v51  ;;  %v2067_v59 = vadd.f32 %v6510_v45, %v2038_v13 }
 0x474   :  { %v5151_v15 = vpop.eup %5150  ;;  %2185 = vadd.xlane.f32.xlu0 %v2184_v24 }
 0x475   :  { %v2187_v55 = vsel %vm357_vm2, %v2120_v11, 0.0  ;;  %v2092_v4 = vmax.f32 %v2067_v59, 0.0  ;;  %v2010_v36 = vmul.f32 %v5151_v15, %v6478_v40 }
 0x476   :  { %v5153_v49 = vpop.eup %5152 }
 0x477   :  { %v2121_v38 = vmul.f32 %v6522_v28, %v2092_v4  ;;  %v2039_v61 = vmul.f32 %v6502_v62, %v2010_v36  ;;  %v2011_v8 = vmul.f32 %v5153_v49, %v6484_v22 }
 0x478   :  { %2188 = vadd.xlane.f32.xlu0 %v2187_v55 }
 0x479   :  { %v2190_v5 = vsel %vm357_vm2, %v2121_v38, 0.0  ;;  %v2068_v18 = vadd.f32 %v6510_v45, %v2039_v61  ;;  %v2040_v3 = vmul.f32 %v6502_v62, %v2011_v8  ;;  %v6813_v62 = vshrl.u32 %v2251_v29, 7 }
 0x47b   :  { %v2093_v30 = vmax.f32 %v2068_v18, 0.0  ;;  %v2069_v6 = vadd.f32 %v6510_v45, %v2040_v3  ;;  %v6818_v45 = vstv %s7492_s6  ;;  %v6821_v53 = vsub.s32 0, %v6813_v62  ;;  %s5180_s6 = smov [#allocation3]  }
 0x47c   :  { %2191 = vadd.xlane.f32.xlu0 %v2190_v5  ;;  %v6827_v33 = vsub.s32 2, %v6813_v62  ;;  %v6830_v44 = vsub.s32 3, %v6813_v62  ;;  %v6833_v58 = vsub.s32 4, %v6813_v62  ;;  %v6836_v35 = vsub.s32 5, %v6813_v62  ;;  %s4533_s24 = sshll.u32 %s5180_s6, 4  ;;  %s4534_s24 = int_to_ptr.vmem [resolvable:$true] %s4533_s24 }
 0x47d   :  { %v2122_v40 = vmul.f32 %v6522_v28, %v2093_v30  ;;  %v2094_v41 = vmax.f32 %v2069_v6, 0.0  ;;  %v6839_v16 = vsub.s32 6, %v6813_v62  ;;  %v6842_v56 = vsub.s32 7, %v6813_v62  ;;  %s5154_s25 = scalar_lea.vmem %s4534_s24, 32  ;;  %p5159_p1 = scmp.lt.s32.totalorder %s4534_s24, %s4534_s24 }
 0x47e   :  { %v6846_v17 = vsub.s32 %v3057_v19, %v6813_v62  ;;  %p5155_p0 = scmp.ne.s32.totalorder %s4534_s24, %s5154_s25  ;;  %p5160_p2 = scmp.lt.s32.totalorder %s5154_s25, %s5154_s25 }
 0x47f   :  { %v2193_v34 = vsel %vm357_vm2, %v2122_v40, 0.0  ;;  %v2123_v60 = vmul.f32 %v6522_v28, %v2094_v41  ;;  %v6824_v28 = vsub.s32 1, %v6813_v62 }
 0x480   :  { %2194 = vadd.xlane.f32.xlu0 %v2193_v34  ;;  %p5161_p3 = por %p5160_p2, %p5159_p1 }
 0x481   :  { %v2196_v22 = vsel %vm357_vm2, %v2123_v60, 0.0  ;;  %vm4362_vm2 = vcmask 130112  }
 0x482   :  { %p5162_p4 = pnand %p5161_p3, %p5155_p0 }
 0x484   :  { %2197 = vadd.xlane.f32.xlu0 %v2196_v22 }
 0x4a9   :  { %v2126_v47 = vpop.xlane.xlu0 %2125 }
 0x4aa   :  { %v2201_v26 = vadd.f32 %v6818_v45, %v2126_v47 }
 0x4ac   :  { %v2254_v12 = vrot.slane %v2201_v26, %v6821_v53  ;;  %v2258_v27 = vrot.slane %v2201_v26, %v6824_v28  ;;  %v2262_v43 = vrot.slane %v2201_v26, %v6827_v33  ;;  %v2266_v9 = vrot.slane %v2201_v26, %v6830_v44 }
 0x4ad   :  { %v2270_v31 = vrot.slane %v2201_v26, %v6833_v58  ;;  %v2274_v37 = vrot.slane %v2201_v26, %v6836_v35  ;;  %v2278_v32 = vrot.slane %v2201_v26, %v6839_v16  ;;  %v2282_v46 = vrot.slane %v2201_v26, %v6842_v56  ;;  %v2129_v54 = vpop.xlane.xlu1 %2128 }
 0x4ae   :  { %v3051_v48 = vcombine.low %v2254_v12, %v2258_v27  ;;  %v3052_v1 = vcombine.low %v2262_v43, %v2266_v9  ;;  %v2202_v7 = vadd.f32 %v6818_v45, %v2129_v54 }
 0x4af   :  { %v3053_v21 = vcombine.low %v2270_v31, %v2274_v37  ;;  %v3054_v0 = vcombine.low %v2278_v32, %v2282_v46 }
 0x4b0   :  { %v3061_v10 = vrot.slane %v3051_v48, %v6846_v17  ;;  %v3068_v14 = vrot.slane %v3052_v1, %v6846_v17  ;;  %v2286_v25 = vrot.slane %v2202_v7, %v6821_v53  ;;  %v2290_v23 = vrot.slane %v2202_v7, %v6824_v28 }
 0x4b1   :  { %v3075_v39 = vrot.slane %v3053_v21, %v6846_v17  ;;  %v3082_v42 = vrot.slane %v3054_v0, %v6846_v17  ;;  %v2294_v50 = vrot.slane %v2202_v7, %v6827_v33  ;;  %v2298_v52 = vrot.slane %v2202_v7, %v6830_v44 }
 0x4b2   :  { %v3083_v63 = vcombine.low %v3061_v10, %v3068_v14  ;;  %v2302_v24 = vrot.slane %v2202_v7, %v6833_v58  ;;  %v2306_v51 = vrot.slane %v2202_v7, %v6836_v35  ;;  %v2310_v11 = vrot.slane %v2202_v7, %v6839_v16 }
 0x4b3   :  { %v3084_v57 = vcombine.low %v3075_v39, %v3082_v42  ;;  %v2314_v59 = vrot.slane %v2202_v7, %v6842_v56  ;;  %v3100_v15 = vcombine.low %v2286_v25, %v2290_v23  ;;  %v3101_v4 = vcombine.low %v2294_v50, %v2298_v52 }
 0x4b4   :  { %v3091_v13 = vrot.slane %v3083_v63, %v6846_v17  ;;  %v3102_v36 = vcombine.low %v2302_v24, %v2306_v51  ;;  %v2132_v61 = vpop.xlane.xlu0 %2131 }
 0x4b5   :  { %v3098_v55 = vrot.slane %v3084_v57, %v6846_v17  ;;  %v3103_v49 = vcombine.low %v2310_v11, %v2314_v59  ;;  %v3110_v38 = vrot.slane %v3100_v15, %v6846_v17  ;;  %v3117_v5 = vrot.slane %v3101_v4, %v6846_v17 }
 0x4b6   :  { %v3124_v18 = vrot.slane %v3102_v36, %v6846_v17  ;;  %v2203_v3 = vadd.f32 %v6818_v45, %v2132_v61  ;;  %v2135_v40 = vpop.xlane.xlu1 %2134 }
 0x4b7   :  { %v3099_v8 = vcombine.low %v3091_v13, %v3098_v55  ;;  %v3131_v30 = vrot.slane %v3103_v49, %v6846_v17  ;;  %v3132_v6 = vcombine.low %v3110_v38, %v3117_v5  ;;  %v2204_v2 = vadd.f32 %v6818_v45, %v2135_v40 }
 0x4b8   :  { %v2318_v34 = vrot.slane %v2203_v3, %v6821_v53  ;;  %v2322_v60 = vrot.slane %v2203_v3, %v6824_v28  ;;  %v2326_v22 = vrot.slane %v2203_v3, %v6827_v33  ;;  %v2330_v19 = vrot.slane %v2203_v3, %v6830_v44 }
 0x4b9   :  { %4277 = vperm.xlu1 %4952, %v3099_v8   ;;  %v3133_v41 = vcombine.low %v3124_v18, %v3131_v30  ;;  %v3140_v20 = vrot.slane %v3132_v6, %v6846_v17  ;;  %v2334_v47 = vrot.slane %v2203_v3, %v6833_v58  ;;  %v2138_v26 = vpop.xlane.xlu0 %2137  ;;  %v2338_v27 = vrot.slane %v2203_v3, %v6836_v35 }
 0x4ba   :  { %v2342_v43 = vrot.slane %v2203_v3, %v6839_v16  ;;  %v2346_v9 = vrot.slane %v2203_v3, %v6842_v56  ;;  %v2205_v31 = vadd.f32 %v6818_v45, %v2138_v26  ;;  %v3149_v37 = vcombine.low %v2318_v34, %v2322_v60 }
 0x4bb   :  { %v3147_v12 = vrot.slane %v3133_v41, %v6846_v17  ;;  %v3150_v32 = vcombine.low %v2326_v22, %v2330_v19  ;;  %v2350_v46 = vrot.slane %v2204_v2, %v6821_v53  ;;  %v3151_v1 = vcombine.low %v2334_v47, %v2338_v27 }
 0x4bc   :  { %v3152_v54 = vcombine.low %v2342_v43, %v2346_v9  ;;  %v2354_v21 = vrot.slane %v2204_v2, %v6824_v28  ;;  %v3159_v7 = vrot.slane %v3149_v37, %v6846_v17  ;;  %v2358_v14 = vrot.slane %v2204_v2, %v6827_v33 }
 0x4bd   :  { %v3148_v48 = vcombine.low %v3140_v20, %v3147_v12  ;;  %v3166_v10 = vrot.slane %v3150_v32, %v6846_v17  ;;  %v2362_v39 = vrot.slane %v2204_v2, %v6830_v44  ;;  %v3173_v63 = vrot.slane %v3151_v1, %v6846_v17 }
 0x4be   :  { %v2141_v0 = vpop.xlane.xlu1 %2140  ;;  %v3180_v25 = vrot.slane %v3152_v54, %v6846_v17  ;;  %v2366_v23 = vrot.slane %v2204_v2, %v6833_v58  ;;  %v2370_v57 = vrot.slane %v2204_v2, %v6836_v35  ;;  %v2374_v52 = vrot.slane %v2204_v2, %v6839_v16 }
 0x4bf   :  { %4280 = vperm.xlu0 %4953, %v3148_v48   ;;  %v2206_v42 = vadd.f32 %v6818_v45, %v2141_v0  ;;  %v3181_v50 = vcombine.low %v3159_v7, %v3166_v10  ;;  %v2378_v24 = vrot.slane %v2204_v2, %v6842_v56  ;;  %v3198_v13 = vcombine.low %v2350_v46, %v2354_v21 }
 0x4c0   :  { %v3182_v51 = vcombine.low %v3173_v63, %v3180_v25  ;;  %v3199_v11 = vcombine.low %v2358_v14, %v2362_v39  ;;  %v2382_v59 = vrot.slane %v2205_v31, %v6821_v53  ;;  %v3200_v55 = vcombine.low %v2366_v23, %v2370_v57 }
 0x4c1   :  { %v3189_v15 = vrot.slane %v3181_v50, %v6846_v17  ;;  %v3201_v4 = vcombine.low %v2374_v52, %v2378_v24  ;;  %v2386_v36 = vrot.slane %v2205_v31, %v6824_v28  ;;  %v3208_v38 = vrot.slane %v3198_v13, %v6846_v17 }
 0x4c2   :  { %v3196_v49 = vrot.slane %v3182_v51, %v6846_v17  ;;  %v3215_v61 = vrot.slane %v3199_v11, %v6846_v17  ;;  %v2390_v8 = vrot.slane %v2205_v31, %v6827_v33  ;;  %v2144_v5 = vpop.xlane.xlu0 %2143  ;;  %v3222_v18 = vrot.slane %v3200_v55, %v6846_v17 }
 0x4c3   :  { %v3229_v3 = vrot.slane %v3201_v4, %v6846_v17  ;;  %v2394_v30 = vrot.slane %v2205_v31, %v6830_v44  ;;  %v2398_v6 = vrot.slane %v2205_v31, %v6833_v58  ;;  %v6913_v41 = vadd.f32 %v6818_v45, %v2144_v5 }
 0x4c4   :  { %v3197_v40 = vcombine.low %v3189_v15, %v3196_v49  ;;  %v3230_v34 = vcombine.low %v3208_v38, %v3215_v61  ;;  %v2402_v60 = vrot.slane %v2205_v31, %v6836_v35  ;;  %v2406_v2 = vrot.slane %v2205_v31, %v6839_v16 }
 0x4c5   :  { %v3231_v22 = vcombine.low %v3222_v18, %v3229_v3  ;;  %v2410_v20 = vrot.slane %v2205_v31, %v6842_v56  ;;  %v3247_v19 = vcombine.low %v2382_v59, %v2386_v36  ;;  %v3248_v26 = vcombine.low %v2390_v8, %v2394_v30 }
 0x4c6   :  { %4283 = vperm.xlu1 %4952, %v3197_v40   ;;  %v3238_v47 = vrot.slane %v3230_v34, %v6846_v17  ;;  %v3249_v12 = vcombine.low %v2398_v6, %v2402_v60  ;;  %v2414_v27 = vrot.slane %v2206_v42, %v6821_v53  ;;  %v2418_v32 = vrot.slane %v2206_v42, %v6824_v28 }
 0x4c7   :  { %v3245_v43 = vrot.slane %v3231_v22, %v6846_v17  ;;  %v3250_v9 = vcombine.low %v2406_v2, %v2410_v20  ;;  %v3257_v37 = vrot.slane %v3247_v19, %v6846_v17  ;;  %v3264_v46 = vrot.slane %v3248_v26, %v6846_v17 }
 0x4c8   :  { %v3271_v48 = vrot.slane %v3249_v12, %v6846_v17  ;;  %v2422_v31 = vrot.slane %v2206_v42, %v6827_v33  ;;  %v2426_v1 = vrot.slane %v2206_v42, %v6830_v44  ;;  %v2430_v0 = vrot.slane %v2206_v42, %v6833_v58  ;;  %v2147_v10 = vpop.xlane.xlu1 %2146 }
 0x4c9   :  { %v3246_v54 = vcombine.low %v3238_v47, %v3245_v43  ;;  %v3278_v21 = vrot.slane %v3250_v9, %v6846_v17  ;;  %v2434_v7 = vrot.slane %v2206_v42, %v6836_v35  ;;  %v3279_v14 = vcombine.low %v3257_v37, %v3264_v46 }
 0x4ca   :  { %v2438_v39 = vrot.slane %v2206_v42, %v6839_v16  ;;  %v2442_v63 = vrot.slane %v2206_v42, %v6842_v56  ;;  %v3296_v25 = vcombine.low %v2414_v27, %v2418_v32  ;;  %v2208_v23 = vadd.f32 %v6818_v45, %v2147_v10 }
 0x4cb   :  { %4286 = vperm.xlu1 %4952, %v3246_v54   ;;  %v3280_v50 = vcombine.low %v3271_v48, %v3278_v21  ;;  %v3297_v57 = vcombine.low %v2422_v31, %v2426_v1  ;;  %v3298_v52 = vcombine.low %v2430_v0, %v2434_v7  ;;  %v3287_v24 = vrot.slane %v3279_v14, %v6846_v17 }
 0x4cc   :  { %v3299_v51 = vcombine.low %v2438_v39, %v2442_v63  ;;  %v3306_v13 = vrot.slane %v3296_v25, %v6846_v17  ;;  %v2446_v11 = vrot.slane %v6913_v41, %v6821_v53  ;;  %v2450_v55 = vrot.slane %v6913_v41, %v6824_v28  ;;  %v2150_v8 = vpop.xlane.xlu0 %2149 }
 0x4cd   :  { %v3294_v59 = vrot.slane %v3280_v50, %v6846_v17  ;;  %v3313_v15 = vrot.slane %v3297_v57, %v6846_v17  ;;  %v3320_v42 = vrot.slane %v3298_v52, %v6846_v17  ;;  %v2454_v36 = vrot.slane %v6913_v41, %v6827_v33 }
 0x4ce   :  { %v3327_v4 = vrot.slane %v3299_v51, %v6846_v17  ;;  %v2458_v49 = vrot.slane %v6913_v41, %v6830_v44  ;;  %v2462_v38 = vrot.slane %v6913_v41, %v6833_v58  ;;  %v2466_v18 = vrot.slane %v6913_v41, %v6836_v35 }
 0x4cf   :  { %v3295_v61 = vcombine.low %v3287_v24, %v3294_v59  ;;  %v3328_v5 = vcombine.low %v3306_v13, %v3313_v15  ;;  %v2470_v3 = vrot.slane %v6913_v41, %v6839_v16  ;;  %v2209_v30 = vadd.f32 %v6818_v45, %v2150_v8 }
 0x4d0   :  { %v3329_v6 = vcombine.low %v3320_v42, %v3327_v4  ;;  %v2474_v40 = vrot.slane %v6913_v41, %v6842_v56  ;;  %v3345_v34 = vcombine.low %v2446_v11, %v2450_v55  ;;  %v3346_v2 = vcombine.low %v2454_v36, %v2458_v49 }
 0x4d1   :  { %4289 = vperm.xlu1 %4952, %v3295_v61   ;;  %v3336_v60 = vrot.slane %v3328_v5, %v6846_v17  ;;  %v2153_v22 = vpop.xlane.xlu1 %2152  ;;  %v3347_v20 = vcombine.low %v2462_v38, %v2466_v18  ;;  %v2478_v19 = vrot.slane %v2208_v23, %v6821_v53  ;;  %v2482_v9 = vrot.slane %v2208_v23, %v6824_v28 }
 0x4d2   :  { %v3343_v47 = vrot.slane %v3329_v6, %v6846_v17  ;;  %v6960_v26 = vadd.f32 %v6818_v45, %v2153_v22  ;;  %v3348_v12 = vcombine.low %v2470_v3, %v2474_v40  ;;  %v3355_v27 = vrot.slane %v3345_v34, %v6846_v17 }
 0x4d3   :  { %v3362_v43 = vrot.slane %v3346_v2, %v6846_v17  ;;  %v3369_v41 = vrot.slane %v3347_v20, %v6846_v17  ;;  %v2486_v37 = vrot.slane %v2208_v23, %v6827_v33  ;;  %v2490_v48 = vrot.slane %v2208_v23, %v6830_v44 }
 0x4d4   :  { %v3344_v32 = vcombine.low %v3336_v60, %v3343_v47  ;;  %v3376_v46 = vrot.slane %v3348_v12, %v6846_v17  ;;  %v2494_v31 = vrot.slane %v2208_v23, %v6833_v58  ;;  %v2498_v21 = vrot.slane %v2208_v23, %v6836_v35 }
 0x4d5   :  { %v3377_v1 = vcombine.low %v3355_v27, %v3362_v43  ;;  %v2156_v54 = vpop.xlane.xlu1 %2155  ;;  %v2502_v0 = vrot.slane %v2208_v23, %v6839_v16  ;;  %v2506_v7 = vrot.slane %v2208_v23, %v6842_v56  ;;  %v3394_v39 = vcombine.low %v2478_v19, %v2482_v9 }
 0x4d6   :  { %4292 = vperm.xlu1 %4952, %v3344_v32   ;;  %v3378_v10 = vcombine.low %v3369_v41, %v3376_v46  ;;  %v6974_v14 = vadd.f32 %v6818_v45, %v2156_v54  ;;  %v3395_v63 = vcombine.low %v2486_v37, %v2490_v48  ;;  %v3396_v50 = vcombine.low %v2494_v31, %v2498_v21 }
 0x4d7   :  { %v3385_v25 = vrot.slane %v3377_v1, %v6846_v17  ;;  %v3397_v57 = vcombine.low %v2502_v0, %v2506_v7  ;;  %v2510_v52 = vrot.slane %v2209_v30, %v6821_v53  ;;  %v3404_v51 = vrot.slane %v3394_v39, %v6846_v17 }
 0x4d8   :  { %v3392_v24 = vrot.slane %v3378_v10, %v6846_v17  ;;  %v3411_v13 = vrot.slane %v3395_v63, %v6846_v17  ;;  %v2514_v23 = vrot.slane %v2209_v30, %v6824_v28  ;;  %v3418_v11 = vrot.slane %v3396_v50, %v6846_v17 }
 0x4d9   :  { %v3425_v59 = vrot.slane %v3397_v57, %v6846_v17  ;;  %v2518_v15 = vrot.slane %v2209_v30, %v6827_v33  ;;  %v2522_v42 = vrot.slane %v2209_v30, %v6830_v44  ;;  %v2526_v36 = vrot.slane %v2209_v30, %v6833_v58 }
 0x4da   :  { %v3393_v55 = vcombine.low %v3385_v25, %v3392_v24  ;;  %v3426_v4 = vcombine.low %v3404_v51, %v3411_v13  ;;  %v2530_v49 = vrot.slane %v2209_v30, %v6836_v35  ;;  %v2534_v8 = vrot.slane %v2209_v30, %v6839_v16 }
 0x4db   :  { %v3427_v38 = vcombine.low %v3418_v11, %v3425_v59  ;;  %v2159_v61 = vpop.xlane.xlu1 %2158  ;;  %v2538_v5 = vrot.slane %v2209_v30, %v6842_v56  ;;  %v3443_v18 = vcombine.low %v2510_v52, %v2514_v23  ;;  %v3444_v40 = vcombine.low %v2518_v15, %v2522_v42 }
 0x4dc   :  { %4295 = vperm.xlu1 %4952, %v3393_v55   ;;  %v3434_v3 = vrot.slane %v3426_v4, %v6846_v17  ;;  %v6992_v6 = vadd.f32 %v6818_v45, %v2159_v61  ;;  %v3445_v34 = vcombine.low %v2526_v36, %v2530_v49  ;;  %v2542_v20 = vrot.slane %v6960_v26, %v6821_v53 }
 0x4dd   :  { %v3441_v60 = vrot.slane %v3427_v38, %v6846_v17  ;;  %v3446_v22 = vcombine.low %v2534_v8, %v2538_v5  ;;  %v3453_v2 = vrot.slane %v3443_v18, %v6846_v17  ;;  %v3460_v19 = vrot.slane %v3444_v40, %v6846_v17 }
 0x4de   :  { %v3467_v30 = vrot.slane %v3445_v34, %v6846_v17  ;;  %v2546_v47 = vrot.slane %v6960_v26, %v6824_v28  ;;  %v2550_v12 = vrot.slane %v6960_v26, %v6827_v33  ;;  %v2554_v41 = vrot.slane %v6960_v26, %v6830_v44 }
 0x4df   :  { %v3442_v27 = vcombine.low %v3434_v3, %v3441_v60  ;;  %v3474_v43 = vrot.slane %v3446_v22, %v6846_v17  ;;  %v2558_v9 = vrot.slane %v6960_v26, %v6833_v58  ;;  %v3475_v37 = vcombine.low %v3453_v2, %v3460_v19 }
 0x4e0   :  { %v2562_v32 = vrot.slane %v6960_v26, %v6836_v35  ;;  %v2566_v46 = vrot.slane %v6960_v26, %v6839_v16  ;;  %v2570_v48 = vrot.slane %v6960_v26, %v6842_v56  ;;  %v3492_v1 = vcombine.low %v2542_v20, %v2546_v47 }
 0x4e1   :  { %4298 = vperm.xlu1 %4952, %v3442_v27   ;;  %v3476_v31 = vcombine.low %v3467_v30, %v3474_v43  ;;  %v3493_v54 = vcombine.low %v2550_v12, %v2554_v41  ;;  %v2574_v21 = vrot.slane %v6974_v14, %v6821_v53  ;;  %v3483_v0 = vrot.slane %v3475_v37, %v6846_v17  ;;  %v2162_v7 = vpop.xlane.xlu1 %2161 }
 0x4e2   :  { %v3494_v10 = vcombine.low %v2558_v9, %v2562_v32  ;;  %v3495_v39 = vcombine.low %v2566_v46, %v2570_v48  ;;  %v2578_v63 = vrot.slane %v6974_v14, %v6824_v28  ;;  %v7022_v50 = vadd.f32 %v6818_v45, %v2162_v7 }
 0x4e3   :  { %v3490_v25 = vrot.slane %v3476_v31, %v6846_v17  ;;  %v3502_v26 = vrot.slane %v3492_v1, %v6846_v17  ;;  %v3509_v57 = vrot.slane %v3493_v54, %v6846_v17  ;;  %v2582_v51 = vrot.slane %v6974_v14, %v6827_v33 }
 0x4e4   :  { %v3516_v52 = vrot.slane %v3494_v10, %v6846_v17  ;;  %v3523_v24 = vrot.slane %v3495_v39, %v6846_v17  ;;  %v2586_v13 = vrot.slane %v6974_v14, %v6830_v44  ;;  %v2590_v59 = vrot.slane %v6974_v14, %v6833_v58 }
 0x4e5   :  { %v3491_v23 = vcombine.low %v3483_v0, %v3490_v25  ;;  %v3524_v11 = vcombine.low %v3502_v26, %v3509_v57  ;;  %v2594_v15 = vrot.slane %v6974_v14, %v6836_v35  ;;  %v2165_v55 = vpop.xlane.xlu1 %2164  ;;  %v2598_v4 = vrot.slane %v6974_v14, %v6839_v16 }
 0x4e6   :  { %v3525_v42 = vcombine.low %v3516_v52, %v3523_v24  ;;  %v2602_v36 = vrot.slane %v6974_v14, %v6842_v56  ;;  %v3541_v49 = vcombine.low %v2574_v21, %v2578_v63  ;;  %v7042_v61 = vadd.f32 %v6818_v45, %v2165_v55 }
 0x4e7   :  { %4301 = vperm.xlu1 %4952, %v3491_v23   ;;  %v3532_v38 = vrot.slane %v3524_v11, %v6846_v17  ;;  %v3542_v8 = vcombine.low %v2582_v51, %v2586_v13  ;;  %v3543_v5 = vcombine.low %v2590_v59, %v2594_v15  ;;  %v2606_v34 = vrot.slane %v6992_v6, %v6821_v53 }
 0x4e8   :  { %v3539_v18 = vrot.slane %v3525_v42, %v6846_v17  ;;  %v3544_v3 = vcombine.low %v2598_v4, %v2602_v36  ;;  %v3551_v40 = vrot.slane %v3541_v49, %v6846_v17  ;;  %v2610_v22 = vrot.slane %v6992_v6, %v6824_v28 }
 0x4e9   :  { %v3558_v60 = vrot.slane %v3542_v8, %v6846_v17  ;;  %v3565_v14 = vrot.slane %v3543_v5, %v6846_v17  ;;  %v2614_v2 = vrot.slane %v6992_v6, %v6827_v33  ;;  %v2618_v30 = vrot.slane %v6992_v6, %v6830_v44 }
 0x4ea   :  { %v3540_v20 = vcombine.low %v3532_v38, %v3539_v18  ;;  %v3572_v19 = vrot.slane %v3544_v3, %v6846_v17  ;;  %v2622_v47 = vrot.slane %v6992_v6, %v6833_v58  ;;  %v2626_v27 = vrot.slane %v6992_v6, %v6836_v35 }
 0x4eb   :  { %v3573_v12 = vcombine.low %v3551_v40, %v3558_v60  ;;  %v2630_v43 = vrot.slane %v6992_v6, %v6839_v16  ;;  %v2634_v41 = vrot.slane %v6992_v6, %v6842_v56  ;;  %v3590_v37 = vcombine.low %v2606_v34, %v2610_v22 }
 0x4ec   :  { %4304 = vperm.xlu1 %4952, %v3540_v20   ;;  %v3574_v9 = vcombine.low %v3565_v14, %v3572_v19  ;;  %v3591_v32 = vcombine.low %v2614_v2, %v2618_v30  ;;  %v2638_v46 = vrot.slane %v7022_v50, %v6821_v53  ;;  %v3592_v1 = vcombine.low %v2622_v47, %v2626_v27 }
 0x4ed   :  { %v3581_v31 = vrot.slane %v3573_v12, %v6846_v17  ;;  %v3593_v54 = vcombine.low %v2630_v43, %v2634_v41  ;;  %v2642_v21 = vrot.slane %v7022_v50, %v6824_v28  ;;  %v3600_v7 = vrot.slane %v3590_v37, %v6846_v17 }
 0x4ee   :  { %v2168_v48 = vpop.xlane.xlu1 %2167  ;;  %v3588_v0 = vrot.slane %v3574_v9, %v6846_v17  ;;  %v3607_v6 = vrot.slane %v3591_v32, %v6846_v17  ;;  %v2646_v10 = vrot.slane %v7022_v50, %v6827_v33  ;;  %v3614_v63 = vrot.slane %v3592_v1, %v6846_v17 }
 0x4ef   :  { %v3621_v25 = vrot.slane %v3593_v54, %v6846_v17  ;;  %v2650_v26 = vrot.slane %v7022_v50, %v6830_v44  ;;  %v2654_v57 = vrot.slane %v7022_v50, %v6833_v58  ;;  %v2658_v51 = vrot.slane %v7022_v50, %v6836_v35 }
 0x4f0   :  { %v2177_v39 = vpop.xlane.xlu0 %2176  ;;  %v3589_v52 = vcombine.low %v3581_v31, %v3588_v0  ;;  %v3622_v24 = vcombine.low %v3600_v7, %v3607_v6  ;;  %v2662_v13 = vrot.slane %v7022_v50, %v6839_v16  ;;  %v2666_v11 = vrot.slane %v7022_v50, %v6842_v56 }
 0x4f1   :  { %v3623_v23 = vcombine.low %v3614_v63, %v3621_v25  ;;  %v3639_v59 = vcombine.low %v2638_v46, %v2642_v21  ;;  %v3640_v15 = vcombine.low %v2646_v10, %v2650_v26  ;;  %v3641_v4 = vcombine.low %v2654_v57, %v2658_v51 }
 0x4f2   :  { %v2171_v42 = vpop.xlane.xlu1 %2170  ;;  %4307 = vperm.xlu1 %4952, %v3589_v52   ;;  %v3630_v55 = vrot.slane %v3622_v24, %v6846_v17  ;;  %v2670_v36 = vrot.slane %v7042_v61, %v6821_v53  ;;  %v2674_v49 = vrot.slane %v7042_v61, %v6824_v28  ;;  %v3642_v8 = vcombine.low %v2662_v13, %v2666_v11 }
 0x4f3   :  { %v3637_v38 = vrot.slane %v3623_v23, %v6846_v17  ;;  %v3649_v5 = vrot.slane %v3639_v59, %v6846_v17  ;;  %v3656_v50 = vrot.slane %v3640_v15, %v6846_v17  ;;  %v3663_v3 = vrot.slane %v3641_v4, %v6846_v17 }
 0x4f4   :  { %v2678_v40 = vrot.slane %v7042_v61, %v6827_v33  ;;  %v2682_v34 = vrot.slane %v7042_v61, %v6830_v44  ;;  %v2686_v60 = vrot.slane %v7042_v61, %v6833_v58  ;;  %v3670_v22 = vrot.slane %v3642_v8, %v6846_v17 }
 0x4f5   :  { %v2180_v18 = vpop.xlane.xlu0 %2179  ;;  %v3638_v14 = vcombine.low %v3630_v55, %v3637_v38  ;;  %v3671_v2 = vcombine.low %v3649_v5, %v3656_v50  ;;  %v2690_v20 = vrot.slane %v7042_v61, %v6836_v35  ;;  %v2694_v19 = vrot.slane %v7042_v61, %v6839_v16 }
 0x4f6   :  { %v2698_v30 = vrot.slane %v7042_v61, %v6842_v56  ;;  %v3688_v47 = vcombine.low %v2670_v36, %v2674_v49  ;;  %v3689_v12 = vcombine.low %v2678_v40, %v2682_v34  ;;  %v3672_v27 = vcombine.low %v3663_v3, %v3670_v22  ;;  %v2174_v32 = vpop.xlane.xlu1 %2173 }
 0x4f7   :  { %4310 = vperm.xlu1 %4952, %v3638_v14   ;;  %v3679_v43 = vrot.slane %v3671_v2, %v6846_v17  ;;  %v3690_v41 = vcombine.low %v2686_v60, %v2690_v20  ;;  %v2218_v9 = vadd.f32 %v6818_v45, %v2177_v39  ;;  %v7114_v54 = vadd.f32 %v6818_v45, %v2168_v48 }
 0x4f8   :  { %v3691_v46 = vcombine.low %v2694_v19, %v2698_v30  ;;  %v3698_v31 = vrot.slane %v3688_v47, %v6846_v17  ;;  %v3705_v1 = vrot.slane %v3689_v12, %v6846_v17  ;;  %v3686_v61 = vrot.slane %v3672_v27, %v6846_v17 }
 0x4f9   :  { %v2183_v37 = vpop.xlane.xlu0 %2182  ;;  %v3712_v21 = vrot.slane %v3690_v41, %v6846_v17  ;;  %v2219_v0 = vadd.f32 %v6818_v45, %v2180_v18  ;;  %v7120_v7 = vadd.f32 %v6818_v45, %v2171_v42  ;;  %v7127_v63 = vadd.f32 %v6818_v45, %v2174_v32 }
 0x4fa   :  { %v3719_v6 = vrot.slane %v3691_v46, %v6846_v17  ;;  %v3720_v10 = vcombine.low %v3698_v31, %v3705_v1  ;;  %v7124_v39 = vadd.f32 %v6818_v45, %v2183_v37  ;;  %v3687_v48 = vcombine.low %v3679_v43, %v3686_v61 }
 0x4fb   :  { %v2798_v26 = vrot.slane %v2218_v9, %v6821_v53  ;;  %v2802_v57 = vrot.slane %v2218_v9, %v6824_v28  ;;  %v2806_v52 = vrot.slane %v2218_v9, %v6827_v33  ;;  %v2810_v23 = vrot.slane %v2218_v9, %v6830_v44 }
 0x4fc   :  { %v3721_v24 = vcombine.low %v3712_v21, %v3719_v6  ;;  %v3728_v51 = vrot.slane %v3720_v10, %v6846_v17  ;;  %4313 = vperm.xlu1 %4952, %v3687_v48   ;;  %v2814_v11 = vrot.slane %v2218_v9, %v6833_v58  ;;  %v2818_v59 = vrot.slane %v2218_v9, %v6836_v35 }
 0x4fd   :  { %v2186_v25 = vpop.xlane.xlu0 %2185  ;;  %v2822_v15 = vrot.slane %v2218_v9, %v6839_v16  ;;  %v2826_v42 = vrot.slane %v2218_v9, %v6842_v56  ;;  %v3884_v4 = vcombine.low %v2798_v26, %v2802_v57  ;;  %v3885_v36 = vcombine.low %v2806_v52, %v2810_v23 }
 0x4fe   :  { %v7134_v13 = vadd.f32 %v6818_v45, %v2186_v25  ;;  %v3735_v55 = vrot.slane %v3721_v24, %v6846_v17  ;;  %v2830_v49 = vrot.slane %v2219_v0, %v6821_v53  ;;  %v3886_v38 = vcombine.low %v2814_v11, %v2818_v59 }
 0x4ff   :  { %v3887_v8 = vcombine.low %v2822_v15, %v2826_v42  ;;  %v2834_v50 = vrot.slane %v2219_v0, %v6824_v28  ;;  %v2838_v18 = vrot.slane %v2219_v0, %v6827_v33  ;;  %v3894_v40 = vrot.slane %v3884_v4, %v6846_v17 }
 0x500   :  { %v3736_v3 = vcombine.low %v3728_v51, %v3735_v55  ;;  %v3901_v34 = vrot.slane %v3885_v36, %v6846_v17  ;;  %v3908_v14 = vrot.slane %v3886_v38, %v6846_v17  ;;  %v2842_v2 = vrot.slane %v2219_v0, %v6830_v44 }
 0x501   :  { %v2189_v5 = vpop.xlane.xlu0 %2188  ;;  %v3915_v22 = vrot.slane %v3887_v8, %v6846_v17  ;;  %v2846_v20 = vrot.slane %v2219_v0, %v6833_v58  ;;  %v2850_v30 = vrot.slane %v2219_v0, %v6836_v35  ;;  %v2854_v47 = vrot.slane %v2219_v0, %v6839_v16 }
 0x502   :  { %v7148_v60 = vadd.f32 %v6818_v45, %v2189_v5  ;;  %4316 = vperm.xlu1 %4952, %v3736_v3   ;;  %v3916_v19 = vcombine.low %v3894_v40, %v3901_v34  ;;  %v2858_v12 = vrot.slane %v2219_v0, %v6842_v56  ;;  %v3933_v43 = vcombine.low %v2830_v49, %v2834_v50 }
 0x503   :  { %v3917_v27 = vcombine.low %v3908_v14, %v3915_v22  ;;  %v3934_v41 = vcombine.low %v2838_v18, %v2842_v2  ;;  %v2862_v37 = vrot.slane %v7124_v39, %v6821_v53  ;;  %v3935_v46 = vcombine.low %v2846_v20, %v2850_v30 }
 0x504   :  { %v3924_v32 = vrot.slane %v3916_v19, %v6846_v17  ;;  %v3936_v31 = vcombine.low %v2854_v47, %v2858_v12  ;;  %v3943_v21 = vrot.slane %v3933_v43, %v6846_v17  ;;  %v2866_v6 = vrot.slane %v7124_v39, %v6824_v28 }
 0x505   :  { %v2192_v9 = vpop.xlane.xlu0 %2191  ;;  %v3931_v61 = vrot.slane %v3917_v27, %v6846_v17  ;;  %v3950_v0 = vrot.slane %v3934_v41, %v6846_v17  ;;  %v3957_v10 = vrot.slane %v3935_v46, %v6846_v17  ;;  %v2870_v25 = vrot.slane %v7124_v39, %v6827_v33 }
 0x506   :  { %v7161_v1 = vadd.f32 %v6818_v45, %v2192_v9  ;;  %v3964_v48 = vrot.slane %v3936_v31, %v6846_v17  ;;  %v2874_v26 = vrot.slane %v7124_v39, %v6830_v44  ;;  %v2878_v24 = vrot.slane %v7124_v39, %v6833_v58 }
 0x507   :  { %v3932_v57 = vcombine.low %v3924_v32, %v3931_v61  ;;  %v3965_v52 = vcombine.low %v3943_v21, %v3950_v0  ;;  %v2882_v51 = vrot.slane %v7124_v39, %v6836_v35  ;;  %v2886_v11 = vrot.slane %v7124_v39, %v6839_v16 }
 0x508   :  { %v3966_v23 = vcombine.low %v3957_v10, %v3964_v48  ;;  %v2890_v59 = vrot.slane %v7124_v39, %v6842_v56  ;;  %v3982_v15 = vcombine.low %v2862_v37, %v2866_v6  ;;  %v3983_v55 = vcombine.low %v2870_v25, %v2874_v26 }
 0x509   :  { %4328 = vperm.xlu0 %4953, %v3932_v57   ;;  %v3973_v42 = vrot.slane %v3965_v52, %v6846_v17  ;;  %v3984_v4 = vcombine.low %v2878_v24, %v2882_v51  ;;  %v2766_v36 = vrot.slane %v7127_v63, %v6821_v53  ;;  %v2770_v5 = vrot.slane %v7127_v63, %v6824_v28  ;;  %v2195_v40 = vpop.xlane.xlu0 %2194 }
 0x50a   :  { %v3980_v49 = vrot.slane %v3966_v23, %v6846_v17  ;;  %v3985_v38 = vcombine.low %v2886_v11, %v2890_v59  ;;  %v3992_v8 = vrot.slane %v3982_v15, %v6846_v17  ;;  %v3999_v50 = vrot.slane %v3983_v55, %v6846_v17 }
 0x50b   :  { %v4006_v39 = vrot.slane %v3984_v4, %v6846_v17  ;;  %v2774_v18 = vrot.slane %v7127_v63, %v6827_v33  ;;  %v2778_v3 = vrot.slane %v7127_v63, %v6830_v44  ;;  %v2782_v22 = vrot.slane %v7127_v63, %v6833_v58 }
 0x50c   :  { %v3981_v34 = vcombine.low %v3973_v42, %v3980_v49  ;;  %v4013_v14 = vrot.slane %v3985_v38, %v6846_v17  ;;  %v2786_v2 = vrot.slane %v7127_v63, %v6836_v35  ;;  %v4014_v20 = vcombine.low %v3992_v8, %v3999_v50 }
 0x50d   :  { %v2790_v19 = vrot.slane %v7127_v63, %v6839_v16  ;;  %v2794_v30 = vrot.slane %v7127_v63, %v6842_v56  ;;  %v3835_v47 = vcombine.low %v2766_v36, %v2770_v5  ;;  %v3836_v27 = vcombine.low %v2774_v18, %v2778_v3 }
 0x50e   :  { %4331 = vperm.xlu0 %4953, %v3981_v34   ;;  %v4015_v12 = vcombine.low %v4006_v39, %v4013_v14  ;;  %v3837_v43 = vcombine.low %v2782_v22, %v2786_v2  ;;  %v7205_v41 = vadd.f32 %v6818_v45, %v2195_v40  ;;  %v4022_v9 = vrot.slane %v4014_v20, %v6846_v17  ;;  %v2198_v39 = vpop.xlane.xlu0 %2197 }
 0x50f   :  { %v3838_v37 = vcombine.low %v2790_v19, %v2794_v30  ;;  %v3845_v32 = vrot.slane %v3835_v47, %v6846_v17  ;;  %v2894_v46 = vrot.slane %v7134_v13, %v6821_v53  ;;  %v3852_v63 = vrot.slane %v3836_v27, %v6846_v17 }
 0x510   :  { %v4029_v31 = vrot.slane %v4015_v12, %v6846_v17  ;;  %v3859_v61 = vrot.slane %v3837_v43, %v6846_v17  ;;  %v2898_v21 = vrot.slane %v7134_v13, %v6824_v28  ;;  %v2902_v6 = vrot.slane %v7134_v13, %v6827_v33 }
 0x511   :  { %v3866_v0 = vrot.slane %v3838_v37, %v6846_v17  ;;  %v2906_v10 = vrot.slane %v7134_v13, %v6830_v44  ;;  %v2910_v48 = vrot.slane %v7134_v13, %v6833_v58  ;;  %v3867_v26 = vcombine.low %v3845_v32, %v3852_v63 }
 0x512   :  { %v4030_v25 = vcombine.low %v4022_v9, %v4029_v31  ;;  %v2914_v57 = vrot.slane %v7134_v13, %v6836_v35  ;;  %v2918_v52 = vrot.slane %v7134_v13, %v6839_v16  ;;  %v2922_v51 = vrot.slane %v7134_v13, %v6842_v56 }
 0x513   :  { %v3868_v24 = vcombine.low %v3859_v61, %v3866_v0  ;;  %v4031_v23 = vcombine.low %v2894_v46, %v2898_v21  ;;  %v4032_v11 = vcombine.low %v2902_v6, %v2906_v10  ;;  %v3875_v59 = vrot.slane %v3867_v26, %v6846_v17 }
 0x514   :  { %4334 = vperm.xlu0 %4953, %v4030_v25   ;;  %v4033_v15 = vcombine.low %v2910_v48, %v2914_v57  ;;  %v2702_v42 = vrot.slane %v7114_v54, %v6821_v53  ;;  %v2706_v55 = vrot.slane %v7114_v54, %v6824_v28  ;;  %v4034_v36 = vcombine.low %v2918_v52, %v2922_v51 }
 0x515   :  { %v3882_v4 = vrot.slane %v3868_v24, %v6846_v17  ;;  %v4041_v49 = vrot.slane %v4031_v23, %v6846_v17  ;;  %v4048_v38 = vrot.slane %v4032_v11, %v6846_v17  ;;  %v2710_v8 = vrot.slane %v7114_v54, %v6827_v33 }
 0x516   :  { %v4055_v13 = vrot.slane %v4033_v15, %v6846_v17  ;;  %v2714_v5 = vrot.slane %v7114_v54, %v6830_v44  ;;  %v2718_v50 = vrot.slane %v7114_v54, %v6833_v58  ;;  %v4062_v3 = vrot.slane %v4034_v36, %v6846_v17 }
 0x517   :  { %v3883_v18 = vcombine.low %v3875_v59, %v3882_v4  ;;  %v4063_v40 = vcombine.low %v4041_v49, %v4048_v38  ;;  %v2722_v34 = vrot.slane %v7114_v54, %v6836_v35  ;;  %v2726_v14 = vrot.slane %v7114_v54, %v6839_v16 }
 0x518   :  { %v2730_v22 = vrot.slane %v7114_v54, %v6842_v56  ;;  %v3737_v2 = vcombine.low %v2702_v42, %v2706_v55  ;;  %v3738_v20 = vcombine.low %v2710_v8, %v2714_v5  ;;  %v4064_v19 = vcombine.low %v4055_v13, %v4062_v3 }
 0x519   :  { %4325 = vperm.xlu1 %4952, %v3883_v18   ;;  %v4071_v30 = vrot.slane %v4063_v40, %v6846_v17  ;;  %v3739_v47 = vcombine.low %v2718_v50, %v2722_v34  ;;  %v7253_v12 = vadd.f32 %v6818_v45, %v2198_v39  ;;  %v2926_v37 = vrot.slane %v7148_v60, %v6821_v53 }
 0x51a   :  { %v3740_v27 = vcombine.low %v2726_v14, %v2730_v22  ;;  %v3747_v43 = vrot.slane %v3737_v2, %v6846_v17  ;;  %v3754_v9 = vrot.slane %v3738_v20, %v6846_v17  ;;  %v4078_v54 = vrot.slane %v4064_v19, %v6846_v17 }
 0x51b   :  { %v3761_v32 = vrot.slane %v3739_v47, %v6846_v17  ;;  %v2930_v46 = vrot.slane %v7148_v60, %v6824_v28  ;;  %v2934_v31 = vrot.slane %v7148_v60, %v6827_v33  ;;  %v2938_v61 = vrot.slane %v7148_v60, %v6830_v44 }
 0x51c   :  { %v3768_v45 = vrot.slane %v3740_v27, %v6846_v17  ;;  %v3769_v63 = vcombine.low %v3747_v43, %v3754_v9  ;;  %v2942_v21 = vrot.slane %v7148_v60, %v6833_v58  ;;  %v4079_v0 = vcombine.low %v4071_v30, %v4078_v54 }
 0x51d   :  { %v2946_v6 = vrot.slane %v7148_v60, %v6836_v35  ;;  %v2950_v10 = vrot.slane %v7148_v60, %v6839_v16  ;;  %v2954_v48 = vrot.slane %v7148_v60, %v6842_v56  ;;  %v4080_v57 = vcombine.low %v2926_v37, %v2930_v46 }
 0x51e   :  { %v3770_v25 = vcombine.low %v3761_v32, %v3768_v45  ;;  %v3777_v26 = vrot.slane %v3769_v63, %v6846_v17  ;;  %v4081_v52 = vcombine.low %v2934_v31, %v2938_v61  ;;  %4337 = vperm.xlu0 %4953, %v4079_v0   ;;  %v2734_v23 = vrot.slane %v7120_v7, %v6821_v53 }
 0x51f   :  { %v4082_v24 = vcombine.low %v2942_v21, %v2946_v6  ;;  %v4083_v51 = vcombine.low %v2950_v10, %v2954_v48  ;;  %v2738_v11 = vrot.slane %v7120_v7, %v6824_v28  ;;  %v4090_v15 = vrot.slane %v4080_v57, %v6846_v17 }
 0x520   :  { %v3784_v59 = vrot.slane %v3770_v25, %v6846_v17  ;;  %v4097_v60 = vrot.slane %v4081_v52, %v6846_v17  ;;  %v2742_v42 = vrot.slane %v7120_v7, %v6827_v33  ;;  %v2746_v36 = vrot.slane %v7120_v7, %v6830_v44 }
 0x521   :  { %v4104_v55 = vrot.slane %v4082_v24, %v6846_v17  ;;  %v4111_v4 = vrot.slane %v4083_v51, %v6846_v17  ;;  %v2750_v49 = vrot.slane %v7120_v7, %v6833_v58  ;;  %v2754_v8 = vrot.slane %v7120_v7, %v6836_v35 }
 0x522   :  { %v3785_v38 = vcombine.low %v3777_v26, %v3784_v59  ;;  %v4112_v13 = vcombine.low %v4090_v15, %v4097_v60  ;;  %v2758_v5 = vrot.slane %v7120_v7, %v6839_v16  ;;  %v2762_v39 = vrot.slane %v7120_v7, %v6842_v56 }
 0x523   :  { %v4113_v50 = vcombine.low %v4104_v55, %v4111_v4  ;;  %v3786_v18 = vcombine.low %v2734_v23, %v2738_v11  ;;  %v3787_v3 = vcombine.low %v2742_v42, %v2746_v36  ;;  %v3788_v34 = vcombine.low %v2750_v49, %v2754_v8 }
 0x524   :  { %4319 = vperm.xlu1 %4952, %v3785_v38   ;;  %v4120_v40 = vrot.slane %v4112_v13, %v6846_v17  ;;  %v2958_v14 = vrot.slane %v7161_v1, %v6821_v53  ;;  %v2962_v22 = vrot.slane %v7161_v1, %v6824_v28  ;;  %v3789_v20 = vcombine.low %v2758_v5, %v2762_v39 }
 0x525   :  { %v4127_v2 = vrot.slane %v4113_v50, %v6846_v17  ;;  %v3796_v19 = vrot.slane %v3786_v18, %v6846_v17  ;;  %v3803_v30 = vrot.slane %v3787_v3, %v6846_v17  ;;  %v3810_v7 = vrot.slane %v3788_v34, %v6846_v17 }
 0x526   :  { %v2966_v47 = vrot.slane %v7161_v1, %v6827_v33  ;;  %v2970_v27 = vrot.slane %v7161_v1, %v6830_v44  ;;  %v2974_v43 = vrot.slane %v7161_v1, %v6833_v58  ;;  %v3817_v37 = vrot.slane %v3789_v20, %v6846_v17 }
 0x527   :  { %v4128_v9 = vcombine.low %v4120_v40, %v4127_v2  ;;  %v3818_v54 = vcombine.low %v3796_v19, %v3803_v30  ;;  %v2978_v32 = vrot.slane %v7161_v1, %v6836_v35  ;;  %v2982_v46 = vrot.slane %v7161_v1, %v6839_v16 }
 0x528   :  { %v2986_v31 = vrot.slane %v7161_v1, %v6842_v56  ;;  %v4129_v45 = vcombine.low %v2958_v14, %v2962_v22  ;;  %v4130_v63 = vcombine.low %v2966_v47, %v2970_v27  ;;  %v3819_v61 = vcombine.low %v3810_v7, %v3817_v37 }
 0x529   :  { %4340 = vperm.xlu0 %4953, %v4128_v9   ;;  %v3826_v21 = vrot.slane %v3818_v54, %v6846_v17  ;;  %v4131_v0 = vcombine.low %v2974_v43, %v2978_v32  ;;  %v2990_v6 = vrot.slane %v7205_v41, %v6821_v53  ;;  %v2994_v26 = vrot.slane %v7205_v41, %v6824_v28 }
 0x52a   :  { %v4132_v10 = vcombine.low %v2982_v46, %v2986_v31  ;;  %v4139_v48 = vrot.slane %v4129_v45, %v6846_v17  ;;  %v4146_v25 = vrot.slane %v4130_v63, %v6846_v17  ;;  %v3833_v1 = vrot.slane %v3819_v61, %v6846_v17 }
 0x52b   :  { %v4153_v57 = vrot.slane %v4131_v0, %v6846_v17  ;;  %v2998_v52 = vrot.slane %v7205_v41, %v6827_v33  ;;  %v3002_v24 = vrot.slane %v7205_v41, %v6830_v44  ;;  %v3006_v11 = vrot.slane %v7205_v41, %v6833_v58 }
 0x52c   :  { %v4160_v51 = vrot.slane %v4132_v10, %v6846_v17  ;;  %v4161_v23 = vcombine.low %v4139_v48, %v4146_v25  ;;  %v3010_v59 = vrot.slane %v7205_v41, %v6836_v35  ;;  %v3834_v15 = vcombine.low %v3826_v21, %v3833_v1 }
 0x52d   :  { %v3014_v60 = vrot.slane %v7205_v41, %v6839_v16  ;;  %v3018_v42 = vrot.slane %v7205_v41, %v6842_v56  ;;  %v4178_v55 = vcombine.low %v2990_v6, %v2994_v26  ;;  %v4179_v49 = vcombine.low %v2998_v52, %v3002_v24 }
 0x52e   :  { %v4162_v4 = vcombine.low %v4153_v57, %v4160_v51  ;;  %v4169_v36 = vrot.slane %v4161_v23, %v6846_v17  ;;  %v4180_v38 = vcombine.low %v3006_v11, %v3010_v59  ;;  %4322 = vperm.xlu1 %4952, %v3834_v15   ;;  %v3022_v5 = vrot.slane %v7253_v12, %v6821_v53 }
 0x52f   :  { %v4181_v13 = vcombine.low %v3014_v60, %v3018_v42  ;;  %v4188_v8 = vrot.slane %v4178_v55, %v6846_v17  ;;  %v3026_v50 = vrot.slane %v7253_v12, %v6824_v28  ;;  %v4195_v41 = vrot.slane %v4179_v49, %v6846_v17 }
 0x530   :  { %v4176_v39 = vrot.slane %v4162_v4, %v6846_v17  ;;  %v4202_v18 = vrot.slane %v4180_v38, %v6846_v17  ;;  %v3030_v3 = vrot.slane %v7253_v12, %v6827_v33  ;;  %v3034_v34 = vrot.slane %v7253_v12, %v6830_v44 }
 0x531   :  { %v4209_v40 = vrot.slane %v4181_v13, %v6846_v17  ;;  %v3038_v53 = vrot.slane %v7253_v12, %v6833_v58  ;;  %v3042_v28 = vrot.slane %v7253_v12, %v6836_v35  ;;  %v4210_v22 = vcombine.low %v4188_v8, %v4195_v41 }
 0x532   :  { %v4177_v14 = vcombine.low %v4169_v36, %v4176_v39  ;;  %v3046_v2 = vrot.slane %v7253_v12, %v6839_v16  ;;  %v3050_v20 = vrot.slane %v7253_v12, %v6842_v56  ;;  %v4227_v19 = vcombine.low %v3022_v5, %v3026_v50 }
 0x533   :  { %v4211_v33 = vcombine.low %v4202_v18, %v4209_v40  ;;  %v4228_v30 = vcombine.low %v3030_v3, %v3034_v34  ;;  %v4229_v7 = vcombine.low %v3038_v53, %v3042_v28  ;;  %v4218_v44 = vrot.slane %v4210_v22, %v6846_v17 }
 0x534   :  { %4343 = vperm.xlu0 %4953, %v4177_v14   ;;  %v4230_v47 = vcombine.low %v3046_v2, %v3050_v20  ;;  %v4237_v35 = vrot.slane %v4227_v19, %v6846_v17  ;;  %v4278_v46 = vpop.permute.xlu1 %4277  ;;  %v4352_v52 = vand.u32 127, %v2251_v29 }
 0x535   :  { %v4225_v58 = vrot.slane %v4211_v33, %v6846_v17  ;;  %v4244_v27 = vrot.slane %v4228_v30, %v6846_v17  ;;  %v4251_v43 = vrot.slane %v4229_v7, %v6846_v17 }
 0x536   :  { %v4258_v16 = vrot.slane %v4230_v47, %v6846_v17  ;;  %v4357_v24 = vadd.s32 4294967288, %v4352_v52  ;;  %v4355_v59 = vsub.s32 %v4352_v52, %v6813_v62  ;;  %v4364_v15 = vadd.s32 4294967280, %v4352_v52 }
 0x537   :  { %v4226_v9 = vcombine.low %v4218_v44, %v4225_v58  ;;  %v4259_v56 = vcombine.low %v4237_v35, %v4244_v27  ;;  %v4371_v60 = vadd.s32 4294967272, %v4352_v52  ;;  %v4378_v55 = vadd.s32 4294967264, %v4352_v52 }
 0x538   :  { %v4260_v12 = vcombine.low %v4251_v43, %v4258_v16  ;;  %v4360_v11 = vsub.s32 %v4357_v24, %v6813_v62  ;;  %v4385_v49 = vadd.s32 4294967256, %v4352_v52  ;;  %v4356_v38 = vrot.slane %v4278_v46, %v4355_v59 }
 0x539   :  { %4346 = vperm.xlu0 %4953, %v4226_v9   ;;  %v4267_v37 = vrot.slane %v4259_v56, %v6846_v17  ;;  %v4392_v13 = vadd.s32 4294967248, %v4352_v52  ;;  %v4367_v8 = vsub.s32 %v4364_v15, %v6813_v62  ;;  %v7407_v5 = vsub.s32 %v4371_v60, %v6813_v62 }
 0x53a   :  { %v4274_v54 = vrot.slane %v4260_v12, %v6846_v17  ;;  %v4281_v48 = vpop.permute.xlu0 %4280  ;;  %v4399_v50 = vadd.s32 4294967240, %v4352_v52  ;;  %v7410_v39 = vsub.s32 %v4378_v55, %v6813_v62  ;;  %v4406_v41 = vadd.s32 4294967232, %v4352_v52 }
 0x53b   :  { %v4361_v36 = vrot.slane %v4281_v48, %v4360_v11  ;;  %v7414_v40 = vsub.s32 %v4385_v49, %v6813_v62  ;;  %v4413_v34 = vadd.s32 4294967224, %v4352_v52  ;;  %v7419_v28 = vsub.s32 %v4392_v13, %v6813_v62 }
 0x53c   :  { %v4275_v32 = vcombine.low %v4267_v37, %v4274_v54  ;;  %v4420_v14 = vadd.s32 4294967216, %v4352_v52  ;;  %v4427_v22 = vadd.s32 4294967208, %v4352_v52  ;;  %v7423_v20 = vsub.s32 %v4399_v50, %v6813_v62 }
 0x53d   :  { %v4363_v3 = vsel %vm4362_vm2, %v4361_v36, %v4356_v38  ;;  %v7428_v30 = vsub.s32 %v4406_v41, %v6813_v62  ;;  %v4416_v44 = vsub.s32 %v4413_v34, %v6813_v62  ;;  %v4434_v47 = vadd.s32 4294967200, %v4352_v52 }
 0x53e   :  { %4349 = vperm.xlu0 %4953, %v4275_v32   ;;  %v4423_v27 = vsub.s32 %v4420_v14, %v6813_v62  ;;  %v4430_v43 = vsub.s32 %v4427_v22, %v6813_v62  ;;  %v4441_v16 = vadd.s32 4294967192, %v4352_v52  ;;  %v4448_v37 = vadd.s32 4294967184, %v4352_v52 }
 0x541   :  { %v7372_v31 = vpop.permute.xlu1 %4283 }
 0x542   :  { %v4368_v2 = vrot.slane %v7372_v31, %v4367_v8 }
 0x544   :  { %v4370_v9 = vsel %vm4369_vm3, %v4368_v2, %v4363_v3 }
 0x546   :  { %v7374_v45 = vpop.permute.xlu1 %4286 }
 0x547   :  { %v4375_v19 = vrot.slane %v7374_v45, %v7407_v5 }
 0x549   :  { %v4377_v46 = vsel %vm4376_vm4, %v4375_v19, %v4370_v9 }
 0x54c   :  { %v7376_v63 = vpop.permute.xlu1 %4289 }
 0x54d   :  { %v4382_v7 = vrot.slane %v7376_v63, %v7410_v39  ;;  %v4455_v63 = vadd.s32 4294967176, %v4352_v52 }
 0x54f   :  { %v4458_v55 = vsub.s32 %v4455_v63, %v6813_v62 }
 0x551   :  { %v7378_v61 = vpop.permute.xlu1 %4292 }
 0x552   :  { %v4389_v35 = vrot.slane %v7378_v61, %v7414_v40  ;;  %v4384_v61 = vsel %vm4383_vm5, %v4382_v7, %v4377_v46 }
 0x557   :  { %v7380_v21 = vpop.permute.xlu1 %4295 }
 0x558   :  { %v4396_v56 = vrot.slane %v7380_v21, %v7419_v28  ;;  %v4437_v21 = vsub.s32 %v4434_v47, %v6813_v62 }
 0x55c   :  { %v7382_v0 = vpop.permute.xlu1 %4298 }
 0x55d   :  { %v4403_v31 = vrot.slane %v7382_v0, %v7423_v20 }
 0x562   :  { %v7384_v6 = vpop.permute.xlu1 %4301 }
 0x563   :  { %v4410_v48 = vrot.slane %v7384_v6, %v7428_v30  ;;  %v4451_v6 = vsub.s32 %v4448_v37, %v6813_v62 }
 0x567   :  { %v7386_v10 = vpop.permute.xlu1 %4304 }
 0x568   :  { %v4417_v24 = vrot.slane %v7386_v10, %v4416_v44 }
 0x56d   :  { %v7388_v26 = vpop.permute.xlu1 %4307 }
 0x572   :  { %v7392_v57 = vpop.permute.xlu1 %4310 }
 0x573   :  { %v4431_v60 = vrot.slane %v7392_v57, %v4430_v43 }
 0x577   :  { %v7397_v23 = vpop.permute.xlu1 %4313 }
 0x578   :  { %v4438_v38 = vrot.slane %v7397_v23, %v4437_v21 }
 0x57d   :  { %v7403_v4 = vpop.permute.xlu1 %4316 }
 0x584   :  { %v4329_v25 = vpop.permute.xlu0 %4328 }
 0x585   :  { %v4469_v58 = vrot.slane %v4329_v25, %v4360_v11  ;;  %v4391_v25 = vsel %vm4390_vm6, %v4389_v35, %v4384_v61  ;;  %v4444_v11 = vsub.s32 %v4441_v16, %v6813_v62 }
 0x586   :  { %v4398_v0 = vsel %vm4397_vm7, %v4396_v56, %v4391_v25 }
 0x587   :  { %v4405_v15 = vsel %vm4404_vm8, %v4403_v31, %v4398_v0  ;;  %v4445_v57 = vrot.slane %v7403_v4, %v4444_v11 }
 0x588   :  { %v4412_v49 = vsel %vm4411_vm9, %v4410_v48, %v4405_v15 }
 0x589   :  { %v7390_v1 = vpop.permute.xlu0 %4331 }
 0x58a   :  { %v4474_v45 = vrot.slane %v7390_v1, %v4367_v8  ;;  %v4424_v1 = vrot.slane %v7388_v26, %v4423_v27  ;;  %v4419_v8 = vsel %vm4418_vm10, %v4417_v24, %v4412_v49 }
 0x58c   :  { %v4426_v62 = vsel %vm4425_vm11, %v4424_v1, %v4419_v8 }
 0x58d   :  { %v4433_v23 = vsel %vm4432_vm12, %v4431_v60, %v4426_v62 }
 0x58f   :  { %v7395_v51 = vpop.permute.xlu0 %4334 }
 0x590   :  { %v4479_v52 = vrot.slane %v7395_v51, %v7407_v5 }
 0x594   :  { %v4326_v18 = vpop.permute.xlu1 %4325 }
 0x595   :  { %v4465_v33 = vrot.slane %v4326_v18, %v4355_v59  ;;  %v4440_v18 = vsel %vm4439_vm0, %v4438_v38, %v4433_v23 }
 0x596   :  { %v4447_v4 = vsel %vm4446_vm13, %v4445_v57, %v4440_v18 }
 0x597   :  { %v4470_v12 = vsel %vm4362_vm2, %v4469_v58, %v4465_v33 }
 0x598   :  { %v4475_v59 = vsel %vm4369_vm3, %v4474_v45, %v4470_v12 }
 0x599   :  { %v7401_v42 = vpop.permute.xlu0 %4337  ;;  %v4480_v26 = vsel %vm4376_vm4, %v4479_v52, %v4475_v59 }
 0x59a   :  { %v4484_v10 = vrot.slane %v7401_v42, %v7410_v39 }
 0x59c   :  { %v4485_v39 = vsel %vm4383_vm5, %v4484_v10, %v4480_v26 }
 0x59f   :  { %v4320_v54 = vpop.permute.xlu1 %4319 }
 0x5a0   :  { %v4452_v5 = vrot.slane %v4320_v54, %v4451_v6 }
 0x5a4   :  { %v7416_v53 = vpop.permute.xlu0 %4340 }
 0x5a5   :  { %v4489_v51 = vrot.slane %v7416_v53, %v7414_v40 }
 0x5a7   :  { %v4490_v3 = vsel %vm4390_vm6, %v4489_v51, %v4485_v39 }
 0x5a9   :  { %v4323_v13 = vpop.permute.xlu1 %4322 }
 0x5aa   :  { %v4459_v41 = vrot.slane %v4323_v13, %v4458_v55 }
 0x5af   :  { %v4344_v32 = vpop.permute.xlu0 %4343 }
 0x5b0   :  { %v4494_v42 = vrot.slane %v4344_v32, %v7419_v28  ;;  %v4454_v28 = vsel %vm4453_vm14, %v4452_v5, %v4447_v4 }
 0x5b1   :  { %v4461_v22 = vsel %vm4460_vm15, %v4459_v41, %v4454_v28 }
 0x5b2   :  { %v4495_v34 = vsel %vm4397_vm7, %v4494_v42, %v4490_v3 }
 0x5b4   :  { %v4347_v36 = vpop.permute.xlu0 %4346 }
 0x5b5   :  { %v4499_v50 = vrot.slane %v4347_v36, %v7423_v20 }
 0x5b7   :  { %v4500_v14 = vsel %vm4404_vm8, %v4499_v50, %v4495_v34 }
 0x5b9   :  { %v4350_v40 = vpop.permute.xlu0 %4349 }
 0x5ba   :  { %v4504_v53 = vrot.slane %v4350_v40, %v7428_v30 }
 0x5bc   :  { %v4505_v2 = vsel %vm4411_vm9, %v4504_v53, %v4500_v14 }
 0x5bd   :  { %v4506_v20 = vcombine.low %v4461_v22, %v4505_v2 }
 0x5bf   :  { %v4513_v33 = vrot.slane %v4506_v20, %v6846_v17 }
 0x5c1   :  { %v4520_v19 = vrot.slane %v4513_v33, %v6846_v17 }
 0x5c3   :  { %4526 = vst.msk [vmem:[#allocation3] sm:$0x3] %vm4524_vm1, %v4520_v19 }
 0x5c4   :  { %5165 = shalt.err (!%p5162_p4)
}
 0x5c5   :  { %4536 = dma.vmem_to_hbm [thread:$0]  %s4534_s24, 32, %s7493_s7, [#allocation4]  }
 0x5c6   :  { %5174 = dma.done.wait [#allocation4], 32  }
 0x5c7   :  { %5175 = vsyncadd [#allocation4], 4294967264 }
 0x5c8   :  { %4540 = vsyncpa [#allocation4], 1 }

</bundles_post_ra>
